<compile_context>
chip_gen: v7x
topology: tpu7x:2x2x1
jax: 0.10.0
libtpu: 0.0.40
codegen_flags: <defaults>
</compile_context>

<pallas_src>
import math

import jax
import jax.numpy as jnp
from jax.experimental import pallas as pl
from jax.experimental.pallas import tpu as pltpu

channels = 1
img_size = 32
img_shape = (channels, img_size, img_size)
latent_dim = 100
n_classes = 10

BN_EPS = 0.8            # positional eps arg of BatchNorm1d in the original code
LRELU_SLOPE = 0.2
IMG_FLAT = int(channels * img_size * img_size)   # 1024
IN_DIM = latent_dim + n_classes                  # 110
IN_PAD = 128                                     # lane-aligned input width
HEAD_TILE = 512                                  # output-column tile of the head
VMEM_LIMIT = 16 << 20                            # actual footprint is ~4 MiB @ B=8


# ---------------------------------------------------------------------------
# in-kernel helpers
# ---------------------------------------------------------------------------
def _leaky_relu(x):
    # slope in (0,1): max(x, a*x) == LeakyReLU(a); cheaper than cmp+select.
    return jnp.maximum(x, LRELU_SLOPE * x)


def _mm(x_f32, w_ref):
    # bf16 x bf16 -> f32 MXU pass; weights are already bf16 in VMEM.
    return jnp.dot(x_f32.astype(jnp.bfloat16), w_ref[...],
                   preferred_element_type=jnp.float32)


def _bn_lrelu(h, gamma, beta):
    # Training-mode BatchNorm1d (biased batch stats) folded to scale/shift,
    # followed by LeakyReLU.  rsqrt lands on the otherwise-idle EUP slot.
    mean = jnp.mean(h, axis=0, keepdims=True)
    c = h - mean
    var = jnp.mean(c * c, axis=0, keepdims=True)
    scale = gamma * jax.lax.rsqrt(var + BN_EPS)
    return _leaky_relu(c * scale + beta)


def _trunk_body(x_ref, w1_ref, b1_ref,
                w2_ref, g2_ref, be2_ref,
                w3_ref, g3_ref, be3_ref,
                w4_ref, g4_ref, be4_ref):
    x = x_ref[...]
    # block 1: Linear(128-padded -> 128), no BN
    h = _leaky_relu(_mm(x, w1_ref) + b1_ref[...])
    # blocks 2-4: Linear -> BN(batch stats) -> LeakyReLU.
    # Linear biases b2/b3/b4 are omitted: they are cancelled exactly by the
    # BN mean subtraction (batch-statistics mode).
    h = _bn_lrelu(_mm(h, w2_ref), g2_ref[...], be2_ref[...])
    h = _bn_lrelu(_mm(h, w3_ref), g3_ref[...], be3_ref[...])
    h = _bn_lrelu(_mm(h, w4_ref), g4_ref[...], be4_ref[...])
    return h


# ---------------------------------------------------------------------------
# kernels
# ---------------------------------------------------------------------------
def fused_kernel(x_ref, w1_ref, b1_ref,
                 w2_ref, g2_ref, be2_ref,
                 w3_ref, g3_ref, be3_ref,
                 w4_ref, g4_ref, be4_ref,
                 w5_ref, b5_ref, out_ref):
    h = _trunk_body(x_ref, w1_ref, b1_ref, w2_ref, g2_ref, be2_ref,
                    w3_ref, g3_ref, be3_ref, w4_ref, g4_ref, be4_ref)
    out_ref[...] = jnp.tanh(_mm(h, w5_ref) + b5_ref[...])


def trunk_kernel(x_ref, w1_ref, b1_ref,
                 w2_ref, g2_ref, be2_ref,
                 w3_ref, g3_ref, be3_ref,
                 w4_ref, g4_ref, be4_ref, h_ref):
    h_ref[...] = _trunk_body(x_ref, w1_ref, b1_ref, w2_ref, g2_ref, be2_ref,
                             w3_ref, g3_ref, be3_ref, w4_ref, g4_ref, be4_ref)


def head_kernel(h_ref, w5_ref, b5_ref, out_ref):
    # Linear(1024 -> HEAD_TILE column slab) + Tanh; independent per column tile.
    out_ref[...] = jnp.tanh(_mm(h_ref[...], w5_ref) + b5_ref[...])


# ---------------------------------------------------------------------------
# parameters
# ---------------------------------------------------------------------------
def init_params(key):
    """Deterministic init mimicking PyTorch defaults. Weights stored bf16."""
    dims = [IN_DIM, 128, 256, 512, 1024, IMG_FLAT]
    keys = jax.random.split(key, 2 * (len(dims) - 1) + 1)
    params = {}
    # nn.Embedding(n_classes, n_classes): N(0, 1)
    params["emb"] = jax.random.normal(keys[0], (n_classes, n_classes),
                                      dtype=jnp.float32)
    for i in range(len(dims) - 1):
        fan_in, fan_out = dims[i], dims[i + 1]
        bound = 1.0 / math.sqrt(fan_in)
        w = jax.random.uniform(keys[2 * i + 1], (fan_in, fan_out),
                               minval=-bound, maxval=bound, dtype=jnp.float32)
        if i == 0:
            # zero-pad the 110 input rows up to 128 (exactness preserved)
            w = jnp.pad(w, ((0, IN_PAD - IN_DIM), (0, 0)))
        params[f"w{i+1}"] = w.astype(jnp.bfloat16)       # stream as bf16
        b = jax.random.uniform(keys[2 * i + 2], (1, fan_out),
                               minval=-bound, maxval=bound, dtype=jnp.float32)
        # b2/b3/b4 are mathematically cancelled by batch-stat BN -> not stored.
        if i in (0, len(dims) - 2):
            params[f"b{i+1}"] = b
    # BatchNorm affine params (gamma=1, beta=0) for layers 2, 3, 4 (f32)
    for i, d in zip((2, 3, 4), (256, 512, 1024)):
        params[f"g{i}"] = jnp.ones((1, d), dtype=jnp.float32)
        params[f"be{i}"] = jnp.zeros((1, d), dtype=jnp.float32)
    return params


# ---------------------------------------------------------------------------
# forward
# ---------------------------------------------------------------------------
def _use_split_head():
    # v7x has 2 TensorCores per chip: give the head its own column-parallel
    # grid.  Single-TC chips (v5e/v6e) keep the fully fused gridless kernel.
    try:
        kind = jax.devices()[0].device_kind.lower()
    except Exception:
        return False
    return "v7" in kind


def generator_forward(params, noise, labels):
    # XLA glue: embedding gather + concat + lane padding (no compute to speak of)
    emb = jnp.take(params["emb"], labels, axis=0)             # (B, 10)
    gen_input = jnp.concatenate([emb, noise], axis=-1)        # (B, 110)
    x = jnp.pad(gen_input, ((0, 0), (0, IN_PAD - IN_DIM)))    # (B, 128)
    B = x.shape[0]

    vmem_spec = pl.BlockSpec(memory_space=pltpu.MemorySpace.VMEM)
    trunk_args = (
        x,
        params["w1"], params["b1"],
        params["w2"], params["g2"], params["be2"],
        params["w3"], params["g3"], params["be3"],
        params["w4"], params["g4"], params["be4"],
    )

    if not _use_split_head():
        # single fused gridless kernel (best on 1-TC chips: v5e / v6e)
        flat = pl.pallas_call(
            fused_kernel,
            out_shape=jax.ShapeDtypeStruct((B, IMG_FLAT), jnp.float32),
            in_specs=[vmem_spec] * (len(trunk_args) + 2),
            out_specs=vmem_spec,
            compiler_params=pltpu.CompilerParams(vmem_limit_bytes=VMEM_LIMIT),
        )(*trunk_args, params["w5"], params["b5"])
    else:
        # v7x: trunk (needs the whole batch for BN) on one call, then the
        # dominant 1024x1024 head sharded over output columns across both TCs.
        h = pl.pallas_call(
            trunk_kernel,
            out_shape=jax.ShapeDtypeStruct((B, 1024), jnp.float32),
            in_specs=[vmem_spec] * len(trunk_args),
            out_specs=vmem_spec,
            compiler_params=pltpu.CompilerParams(vmem_limit_bytes=VMEM_LIMIT),
        )(*trunk_args)

        n_tiles = IMG_FLAT // HEAD_TILE
        flat = pl.pallas_call(
            head_kernel,
            out_shape=jax.ShapeDtypeStruct((B, IMG_FLAT), jnp.float32),
            grid_spec=pltpu.PrefetchScalarGridSpec(
                num_scalar_prefetch=0,
                grid=(n_tiles,),
                in_specs=[
                    pl.BlockSpec((B, 1024), lambda j: (0, 0)),
                    pl.BlockSpec((1024, HEAD_TILE), lambda j: (0, j)),
                    pl.BlockSpec((1, HEAD_TILE), lambda j: (0, j)),
                ],
                out_specs=pl.BlockSpec((B, HEAD_TILE), lambda j: (0, j)),
            ),
            compiler_params=pltpu.CompilerParams(
                dimension_semantics=("parallel",),
                vmem_limit_bytes=VMEM_LIMIT),
        )(h, params["w5"], params["b5"])

    # view(B, *img_shape) -> NCHW
    return flat.reshape(B, *img_shape)


if __name__ == "__main__":
    key = jax.random.PRNGKey(0)
    pkey, nkey, lkey = jax.random.split(key, 3)

    params = init_params(pkey)

    batch = 8   # keep B a multiple of 8 (f32 sublanes); BN uses the full batch
    noise = jax.random.normal(nkey, (batch, latent_dim), dtype=jnp.float32)
    labels = jax.random.randint(lkey, (batch,), 0, n_classes, dtype=jnp.int32)

    img = generator_forward(params, noise, labels)
    img = jax.block_until_ready(img)

    assert img.shape == (batch, channels, img_size, img_size)
    assert img.dtype == jnp.float32
    assert bool(jnp.all(jnp.isfinite(img)))
    print("KERNEL_OK")
</pallas_src>

<mosaic_0001>
module attributes {stable_mosaic.version = 11 : i64} {
  func.func @fused_kernel(%arg0: memref<8x128xf32, #tpu.memory_space<vmem>>, %arg1: memref<128x128xbf16, #tpu.memory_space<vmem>>, %arg2: memref<1x128xf32, #tpu.memory_space<vmem>>, %arg3: memref<128x256xbf16, #tpu.memory_space<vmem>>, %arg4: memref<1x256xf32, #tpu.memory_space<vmem>>, %arg5: memref<1x256xf32, #tpu.memory_space<vmem>>, %arg6: memref<256x512xbf16, #tpu.memory_space<vmem>>, %arg7: memref<1x512xf32, #tpu.memory_space<vmem>>, %arg8: memref<1x512xf32, #tpu.memory_space<vmem>>, %arg9: memref<512x1024xbf16, #tpu.memory_space<vmem>>, %arg10: memref<1x1024xf32, #tpu.memory_space<vmem>>, %arg11: memref<1x1024xf32, #tpu.memory_space<vmem>>, %arg12: memref<1024x1024xbf16, #tpu.memory_space<vmem>>, %arg13: memref<1x1024xf32, #tpu.memory_space<vmem>>, %arg14: memref<8x1024xf32, #tpu.memory_space<vmem>>) attributes {dimension_semantics = [], scalar_prefetch = 0 : i64, scratch_operands = 0 : i64, tpu.core_type = #tpu.core_type<tc>} {
    %c0 = arith.constant 0 : index
    %c0_0 = arith.constant 0 : index
    %0 = vector.load %arg0[%c0, %c0_0] : memref<8x128xf32, #tpu.memory_space<vmem>>, vector<8x128xf32>
    %1 = arith.truncf %0 : vector<8x128xf32> to vector<8x128xbf16>
    %c0_1 = arith.constant 0 : index
    %c0_2 = arith.constant 0 : index
    %2 = vector.load %arg1[%c0_1, %c0_2] : memref<128x128xbf16, #tpu.memory_space<vmem>>, vector<128x128xbf16>
    %cst = arith.constant dense<0.000000e+00> : vector<8x128xf32>
    %3 = tpu.matmul %1, %2, %cst {dimension_numbers = #tpu.dot_dimension_numbers<[1], [0], [0], [1], [0, 0, 1, 1], [], []>} : vector<8x128xbf16>, vector<128x128xbf16>, vector<8x128xf32> -> vector<8x128xf32>
    %c0_3 = arith.constant 0 : index
    %c0_4 = arith.constant 0 : index
    %4 = vector.load %arg2[%c0_3, %c0_4] : memref<1x128xf32, #tpu.memory_space<vmem>>, vector<1x128xf32>
    %5 = vector.broadcast %4 : vector<1x128xf32> to vector<8x128xf32>
    %6 = arith.addf %3, %5 : vector<8x128xf32>
    %cst_5 = arith.constant 2.000000e-01 : f32
    %7 = vector.broadcast %cst_5 : f32 to vector<8x128xf32>
    %8 = arith.mulf %7, %6 : vector<8x128xf32>
    %9 = arith.maximumf %6, %8 : vector<8x128xf32>
    %10 = arith.truncf %9 : vector<8x128xf32> to vector<8x128xbf16>
    %c0_6 = arith.constant 0 : index
    %c0_7 = arith.constant 0 : index
    %11 = vector.load %arg3[%c0_6, %c0_7] : memref<128x256xbf16, #tpu.memory_space<vmem>>, vector<128x256xbf16>
    %cst_8 = arith.constant dense<0.000000e+00> : vector<8x256xf32>
    %12 = tpu.matmul %10, %11, %cst_8 {dimension_numbers = #tpu.dot_dimension_numbers<[1], [0], [0], [1], [0, 0, 1, 1], [], []>} : vector<8x128xbf16>, vector<128x256xbf16>, vector<8x256xf32> -> vector<8x256xf32>
    %c0_9 = arith.constant 0 : index
    %c0_10 = arith.constant 0 : index
    %13 = vector.load %arg4[%c0_9, %c0_10] : memref<1x256xf32, #tpu.memory_space<vmem>>, vector<1x256xf32>
    %c0_11 = arith.constant 0 : index
    %c0_12 = arith.constant 0 : index
    %14 = vector.load %arg5[%c0_11, %c0_12] : memref<1x256xf32, #tpu.memory_space<vmem>>, vector<1x256xf32>
    %cst_13 = arith.constant dense<0.000000e+00> : vector<256xf32>
    %15 = vector.multi_reduction <add>, %12, %cst_13 [0] : vector<8x256xf32> to vector<256xf32>
    %16 = vector.shape_cast %15 : vector<256xf32> to vector<1x256xf32>
    %cst_14 = arith.constant 8.000000e+00 : f32
    %17 = vector.broadcast %cst_14 : f32 to vector<1x256xf32>
    %18 = arith.divf %16, %17 : vector<1x256xf32>
    %19 = vector.broadcast %18 : vector<1x256xf32> to vector<8x256xf32>
    %20 = arith.subf %12, %19 : vector<8x256xf32>
    %21 = arith.mulf %20, %20 : vector<8x256xf32>
    %cst_15 = arith.constant dense<0.000000e+00> : vector<256xf32>
    %22 = vector.multi_reduction <add>, %21, %cst_15 [0] : vector<8x256xf32> to vector<256xf32>
    %23 = vector.shape_cast %22 : vector<256xf32> to vector<1x256xf32>
    %cst_16 = arith.constant 8.000000e+00 : f32
    %24 = vector.broadcast %cst_16 : f32 to vector<1x256xf32>
    %25 = arith.divf %23, %24 : vector<1x256xf32>
    %cst_17 = arith.constant 8.000000e-01 : f32
    %26 = vector.broadcast %cst_17 : f32 to vector<1x256xf32>
    %27 = arith.addf %25, %26 : vector<1x256xf32>
    %28 = math.rsqrt %27 : vector<1x256xf32>
    %29 = arith.mulf %13, %28 : vector<1x256xf32>
    %30 = vector.broadcast %29 : vector<1x256xf32> to vector<8x256xf32>
    %31 = arith.mulf %20, %30 : vector<8x256xf32>
    %32 = vector.broadcast %14 : vector<1x256xf32> to vector<8x256xf32>
    %33 = arith.addf %31, %32 : vector<8x256xf32>
    %cst_18 = arith.constant 2.000000e-01 : f32
    %34 = vector.broadcast %cst_18 : f32 to vector<8x256xf32>
    %35 = arith.mulf %34, %33 : vector<8x256xf32>
    %36 = arith.maximumf %33, %35 : vector<8x256xf32>
    %37 = arith.truncf %36 : vector<8x256xf32> to vector<8x256xbf16>
    %c0_19 = arith.constant 0 : index
    %c0_20 = arith.constant 0 : index
    %38 = vector.load %arg6[%c0_19, %c0_20] : memref<256x512xbf16, #tpu.memory_space<vmem>>, vector<256x512xbf16>
    %cst_21 = arith.constant dense<0.000000e+00> : vector<8x512xf32>
    %39 = tpu.matmul %37, %38, %cst_21 {dimension_numbers = #tpu.dot_dimension_numbers<[1], [0], [0], [1], [0, 0, 1, 1], [], []>} : vector<8x256xbf16>, vector<256x512xbf16>, vector<8x512xf32> -> vector<8x512xf32>
    %c0_22 = arith.constant 0 : index
    %c0_23 = arith.constant 0 : index
    %40 = vector.load %arg7[%c0_22, %c0_23] : memref<1x512xf32, #tpu.memory_space<vmem>>, vector<1x512xf32>
    %c0_24 = arith.constant 0 : index
    %c0_25 = arith.constant 0 : index
    %41 = vector.load %arg8[%c0_24, %c0_25] : memref<1x512xf32, #tpu.memory_space<vmem>>, vector<1x512xf32>
    %cst_26 = arith.constant dense<0.000000e+00> : vector<512xf32>
    %42 = vector.multi_reduction <add>, %39, %cst_26 [0] : vector<8x512xf32> to vector<512xf32>
    %43 = vector.shape_cast %42 : vector<512xf32> to vector<1x512xf32>
    %cst_27 = arith.constant 8.000000e+00 : f32
    %44 = vector.broadcast %cst_27 : f32 to vector<1x512xf32>
    %45 = arith.divf %43, %44 : vector<1x512xf32>
    %46 = vector.broadcast %45 : vector<1x512xf32> to vector<8x512xf32>
    %47 = arith.subf %39, %46 : vector<8x512xf32>
    %48 = arith.mulf %47, %47 : vector<8x512xf32>
    %cst_28 = arith.constant dense<0.000000e+00> : vector<512xf32>
    %49 = vector.multi_reduction <add>, %48, %cst_28 [0] : vector<8x512xf32> to vector<512xf32>
    %50 = vector.shape_cast %49 : vector<512xf32> to vector<1x512xf32>
    %cst_29 = arith.constant 8.000000e+00 : f32
    %51 = vector.broadcast %cst_29 : f32 to vector<1x512xf32>
    %52 = arith.divf %50, %51 : vector<1x512xf32>
    %cst_30 = arith.constant 8.000000e-01 : f32
    %53 = vector.broadcast %cst_30 : f32 to vector<1x512xf32>
    %54 = arith.addf %52, %53 : vector<1x512xf32>
    %55 = math.rsqrt %54 : vector<1x512xf32>
    %56 = arith.mulf %40, %55 : vector<1x512xf32>
    %57 = vector.broadcast %56 : vector<1x512xf32> to vector<8x512xf32>
    %58 = arith.mulf %47, %57 : vector<8x512xf32>
    %59 = vector.broadcast %41 : vector<1x512xf32> to vector<8x512xf32>
    %60 = arith.addf %58, %59 : vector<8x512xf32>
    %cst_31 = arith.constant 2.000000e-01 : f32
    %61 = vector.broadcast %cst_31 : f32 to vector<8x512xf32>
    %62 = arith.mulf %61, %60 : vector<8x512xf32>
    %63 = arith.maximumf %60, %62 : vector<8x512xf32>
    %64 = arith.truncf %63 : vector<8x512xf32> to vector<8x512xbf16>
    %c0_32 = arith.constant 0 : index
    %c0_33 = arith.constant 0 : index
    %65 = vector.load %arg9[%c0_32, %c0_33] : memref<512x1024xbf16, #tpu.memory_space<vmem>>, vector<512x1024xbf16>
    %cst_34 = arith.constant dense<0.000000e+00> : vector<8x1024xf32>
    %66 = tpu.matmul %64, %65, %cst_34 {dimension_numbers = #tpu.dot_dimension_numbers<[1], [0], [0], [1], [0, 0, 1, 1], [], []>} : vector<8x512xbf16>, vector<512x1024xbf16>, vector<8x1024xf32> -> vector<8x1024xf32>
    %c0_35 = arith.constant 0 : index
    %c0_36 = arith.constant 0 : index
    %67 = vector.load %arg10[%c0_35, %c0_36] : memref<1x1024xf32, #tpu.memory_space<vmem>>, vector<1x1024xf32>
    %c0_37 = arith.constant 0 : index
    %c0_38 = arith.constant 0 : index
    %68 = vector.load %arg11[%c0_37, %c0_38] : memref<1x1024xf32, #tpu.memory_space<vmem>>, vector<1x1024xf32>
    %cst_39 = arith.constant dense<0.000000e+00> : vector<1024xf32>
    %69 = vector.multi_reduction <add>, %66, %cst_39 [0] : vector<8x1024xf32> to vector<1024xf32>
    %70 = vector.shape_cast %69 : vector<1024xf32> to vector<1x1024xf32>
    %cst_40 = arith.constant 8.000000e+00 : f32
    %71 = vector.broadcast %cst_40 : f32 to vector<1x1024xf32>
    %72 = arith.divf %70, %71 : vector<1x1024xf32>
    %73 = vector.broadcast %72 : vector<1x1024xf32> to vector<8x1024xf32>
    %74 = arith.subf %66, %73 : vector<8x1024xf32>
    %75 = arith.mulf %74, %74 : vector<8x1024xf32>
    %cst_41 = arith.constant dense<0.000000e+00> : vector<1024xf32>
    %76 = vector.multi_reduction <add>, %75, %cst_41 [0] : vector<8x1024xf32> to vector<1024xf32>
    %77 = vector.shape_cast %76 : vector<1024xf32> to vector<1x1024xf32>
    %cst_42 = arith.constant 8.000000e+00 : f32
    %78 = vector.broadcast %cst_42 : f32 to vector<1x1024xf32>
    %79 = arith.divf %77, %78 : vector<1x1024xf32>
    %cst_43 = arith.constant 8.000000e-01 : f32
    %80 = vector.broadcast %cst_43 : f32 to vector<1x1024xf32>
    %81 = arith.addf %79, %80 : vector<1x1024xf32>
    %82 = math.rsqrt %81 : vector<1x1024xf32>
    %83 = arith.mulf %67, %82 : vector<1x1024xf32>
    %84 = vector.broadcast %83 : vector<1x1024xf32> to vector<8x1024xf32>
    %85 = arith.mulf %74, %84 : vector<8x1024xf32>
    %86 = vector.broadcast %68 : vector<1x1024xf32> to vector<8x1024xf32>
    %87 = arith.addf %85, %86 : vector<8x1024xf32>
    %cst_44 = arith.constant 2.000000e-01 : f32
    %88 = vector.broadcast %cst_44 : f32 to vector<8x1024xf32>
    %89 = arith.mulf %88, %87 : vector<8x1024xf32>
    %90 = arith.maximumf %87, %89 : vector<8x1024xf32>
    %91 = arith.truncf %90 : vector<8x1024xf32> to vector<8x1024xbf16>
    %c0_45 = arith.constant 0 : index
    %c0_46 = arith.constant 0 : index
    %92 = vector.load %arg12[%c0_45, %c0_46] : memref<1024x1024xbf16, #tpu.memory_space<vmem>>, vector<1024x1024xbf16>
    %cst_47 = arith.constant dense<0.000000e+00> : vector<8x1024xf32>
    %93 = tpu.matmul %91, %92, %cst_47 {dimension_numbers = #tpu.dot_dimension_numbers<[1], [0], [0], [1], [0, 0, 1, 1], [], []>} : vector<8x1024xbf16>, vector<1024x1024xbf16>, vector<8x1024xf32> -> vector<8x1024xf32>
    %c0_48 = arith.constant 0 : index
    %c0_49 = arith.constant 0 : index
    %94 = vector.load %arg13[%c0_48, %c0_49] : memref<1x1024xf32, #tpu.memory_space<vmem>>, vector<1x1024xf32>
    %95 = vector.broadcast %94 : vector<1x1024xf32> to vector<8x1024xf32>
    %96 = arith.addf %93, %95 : vector<8x1024xf32>
    %97 = math.tanh %96 : vector<8x1024xf32>
    %c0_50 = arith.constant 0 : index
    %c0_51 = arith.constant 0 : index
    %98 = vector.load %arg14[%c0_50, %c0_51] : memref<8x1024xf32, #tpu.memory_space<vmem>>, vector<8x1024xf32>
    tpu.vector_store %arg14[%c0_50, %c0_51], %97 {strides = array<i32>} : memref<8x1024xf32, #tpu.memory_space<vmem>>, vector<8x1024xf32>,
    return
  }
}

</mosaic_0001>

<bundles_post_ra>
// kernel: tpu_custom_call.1
= control target key start
LH: loop header
LB: loop body
LE: loop exit
PB: predicated region body
PF: predicated region fallthrough
CT: control target
= control target key end

     0   :  { %19 = vsyncpa [#allocation3], 0  ;;  %s9303_s0 = inlined_call_operand.hbm [shape: f32[8,128], index: 0, kind: input, shape index: {}]   ;;  %s9304_s1 = inlined_call_operand.hbm [shape: bf16[128,128], index: 1, kind: input, shape index: {}]   ;;  %s9305_s2 = inlined_call_operand.hbm [shape: f32[1,128], index: 2, kind: input, shape index: {}]   ;;  %s9306_s3 = inlined_call_operand.hbm [shape: bf16[128,256], index: 3, kind: input, shape index: {}]   ;;  %s9307_s4 = inlined_call_operand.hbm [shape: f32[1,256], index: 4, kind: input, shape index: {}]   ;;  %s9308_s5 = inlined_call_operand.hbm [shape: f32[1,256], index: 5, kind: input, shape index: {}]   ;;  %s9309_s6 = inlined_call_operand.hbm [shape: bf16[256,512], index: 6, kind: input, shape index: {}]   ;;  %s9310_s7 = inlined_call_operand.hbm [shape: f32[1,512], index: 7, kind: input, shape index: {}]   ;;  %s9311_s8 = inlined_call_operand.hbm [shape: f32[1,512], index: 8, kind: input, shape index: {}]   ;;  %s9312_s9 = inlined_call_operand.hbm [shape: bf16[512,1024], index: 9, kind: input, shape index: {}]   ;;  %s9313_s10 = inlined_call_operand.hbm [shape: f32[1,1024], index: 10, kind: input, shape index: {}]   ;;  %s9314_s11 = inlined_call_operand.hbm [shape: f32[1,1024], index: 11, kind: input, shape index: {}]   ;;  %s9315_s12 = inlined_call_operand.hbm [shape: bf16[1024,1024], index: 12, kind: input, shape index: {}]   ;;  %s9316_s13 = inlined_call_operand.hbm [shape: f32[1,1024], index: 13, kind: input, shape index: {}]   ;;  %s9317_s14 = inlined_call_operand.hbm [shape: f32[8,1024], index: 14, kind: output, shape index: {}]  }
   0x1   :  { %20 = vsyncpa [#allocation6], 0 }
   0x2   :  { %21 = vsyncpa [#allocation9], 0 }
   0x3   :  { %22 = vsyncpa [#allocation12], 0 }
   0x4   :  { %23 = vsyncpa [#allocation15], 0 }
   0x5   :  { %24 = vsyncpa [#allocation18], 0 }
   0x6   :  { %25 = vsyncpa [#allocation21], 0 }
   0x7   :  { %26 = vsyncpa [#allocation24], 0 }
   0x8   :  { %27 = vsyncpa [#allocation4], 0  ;;  %s8700_s29 = smov [#allocation5]   ;;  %s8352_s17 = scalar_lea.hbm %s9304_s1, 1024 }
   0x9   :  { %s43_s30 = sshll.u32 %s8700_s29, 4  ;;  %p8353_p0 = scmp.ne.s32.totalorder %s9304_s1, %s8352_s17  ;;  %s44_s30 = int_to_ptr.vmem [resolvable:$true] %s43_s30 }
   0xa   :  { %p8356_p1 = scmp.lt.u32.totalorder %s8352_s17, %s9304_s1 }
   0xc   :  { %p8358_p2 = pnand %p8356_p1, %p8353_p0 }
   0xe   :  { %8361 = shalt.err (!%p8358_p2)
}
   0xf   :  { %s8362_s22 = scalar_lea.vmem %s44_s30, 1024  ;;  %p8367_p4 = scmp.lt.s32.totalorder %s44_s30, %s44_s30 }
  0x10   :  { %p8363_p3 = scmp.ne.s32.totalorder %s44_s30, %s8362_s22  ;;  %p8368_p5 = scmp.lt.s32.totalorder %s8362_s22, %s8362_s22 }
  0x12   :  { %p8369_p6 = por %p8368_p5, %p8367_p4 }
  0x14   :  { %p8370_p7 = pnand %p8369_p6, %p8363_p3 }
  0x16   :  { %8373 = shalt.err (!%p8370_p7)
}
  0x17   :  { %s8701_s23 = smov 64   ;;  %s8702_s24 = smov 4  }
  0x18   :  { %49 = dma.hbm_to_vmem [thread:$0]  %s9304_s1, 1024, %s44_s30, [#allocation6], %s8701_s23, %s8701_s23, %s8702_s24  }
  0x19   :  { %s8703_s27 = smov [#allocation8]   ;;  %s8374_s16 = scalar_lea.hbm %s9306_s3, 2048 }
  0x1a   :  { %s65_s28 = sshll.u32 %s8703_s27, 4  ;;  %p8375_p8 = scmp.ne.s32.totalorder %s9306_s3, %s8374_s16  ;;  %s66_s28 = int_to_ptr.vmem [resolvable:$true] %s65_s28 }
  0x1b   :  { %p8378_p9 = scmp.lt.u32.totalorder %s8374_s16, %s9306_s3 }
  0x1d   :  { %p8380_p10 = pnand %p8378_p9, %p8375_p8 }
  0x1f   :  { %8383 = shalt.err (!%p8380_p10)
}
  0x20   :  { %s8384_s21 = scalar_lea.vmem %s66_s28, 2048  ;;  %p8389_p12 = scmp.lt.s32.totalorder %s66_s28, %s66_s28 }
  0x21   :  { %p8385_p11 = scmp.ne.s32.totalorder %s66_s28, %s8384_s21  ;;  %p8390_p13 = scmp.lt.s32.totalorder %s8384_s21, %s8384_s21 }
  0x23   :  { %p8391_p0 = por %p8390_p13, %p8389_p12 }
  0x25   :  { %p8392_p1 = pnand %p8391_p0, %p8385_p11 }
  0x27   :  { %8395 = shalt.err (!%p8392_p1)
}
  0x28   :  { %s8704_s1 = smov 128   ;;  %s8705_s30 = smov 8  }
  0x29   :  { %71 = dma.hbm_to_vmem [thread:$0]  %s9306_s3, 2048, %s66_s28, [#allocation9], %s8704_s1, %s8704_s1, %s8705_s30  }
  0x2a   :  { %s8706_s24 = smov [#allocation11]   ;;  %s8707_s26 = smov [#allocation14]  }
  0x2b   :  { %s88_s25 = sshll.u32 %s8706_s24, 4  ;;  %s110_s27 = sshll.u32 %s8707_s26, 4  ;;  %s89_s25 = int_to_ptr.vmem [resolvable:$true] %s88_s25  ;;  %s111_s27 = int_to_ptr.vmem [resolvable:$true] %s110_s27 }
  0x2c   :  { %s8396_s16 = scalar_lea.hbm %s9308_s5, 32 }
  0x2d   :  { %p8397_p2 = scmp.ne.s32.totalorder %s9308_s5, %s8396_s16  ;;  %p8400_p3 = scmp.lt.u32.totalorder %s8396_s16, %s9308_s5 }
  0x2f   :  { %p8402_p4 = pnand %p8400_p3, %p8397_p2 }
  0x31   :  { %8405 = shalt.err (!%p8402_p4)
}
  0x32   :  { %s8406_s3 = scalar_lea.vmem %s89_s25, 32  ;;  %p8411_p6 = scmp.lt.s32.totalorder %s89_s25, %s89_s25 }
  0x33   :  { %p8407_p5 = scmp.ne.s32.totalorder %s89_s25, %s8406_s3  ;;  %p8412_p7 = scmp.lt.s32.totalorder %s8406_s3, %s8406_s3 }
  0x35   :  { %p8413_p8 = por %p8412_p7, %p8411_p6 }
  0x37   :  { %p8414_p9 = pnand %p8413_p8, %p8407_p5 }
  0x39   :  { %8417 = shalt.err (!%p8414_p9)
}
  0x3a   :  { %91 = dma.hbm_to_vmem [thread:$0]  %s9308_s5, 32, %s89_s25, [#allocation12]  }
  0x3b   :  { %s8418_s22 = scalar_lea.hbm %s9310_s7, 64 }
  0x3c   :  { %p8419_p10 = scmp.ne.s32.totalorder %s9310_s7, %s8418_s22  ;;  %p8422_p11 = scmp.lt.u32.totalorder %s8418_s22, %s9310_s7 }
  0x3e   :  { %p8424_p12 = pnand %p8422_p11, %p8419_p10 }
  0x40   :  { %8427 = shalt.err (!%p8424_p12)
}
  0x41   :  { %s8428_s15 = scalar_lea.vmem %s111_s27, 64  ;;  %p8433_p0 = scmp.lt.s32.totalorder %s111_s27, %s111_s27 }
  0x42   :  { %p8429_p13 = scmp.ne.s32.totalorder %s111_s27, %s8428_s15  ;;  %p8434_p1 = scmp.lt.s32.totalorder %s8428_s15, %s8428_s15 }
  0x44   :  { %p8435_p2 = por %p8434_p1, %p8433_p0 }
  0x46   :  { %p8436_p3 = pnand %p8435_p2, %p8429_p13 }
  0x48   :  { %8439 = shalt.err (!%p8436_p3)
}
  0x49   :  { %113 = dma.hbm_to_vmem [thread:$0]  %s9310_s7, 64, %s111_s27, [#allocation15]  }
  0x4a   :  { %s8708_s16 = smov [#allocation17]   ;;  %s8440_s20 = scalar_lea.hbm %s9312_s9, 32768 }
  0x4b   :  { %s129_s17 = sshll.u32 %s8708_s16, 4  ;;  %p8441_p4 = scmp.ne.s32.totalorder %s9312_s9, %s8440_s20  ;;  %s130_s17 = int_to_ptr.vmem [resolvable:$true] %s129_s17 }
  0x4c   :  { %p8444_p5 = scmp.lt.u32.totalorder %s8440_s20, %s9312_s9 }
  0x4e   :  { %p8446_p6 = pnand %p8444_p5, %p8441_p4 }
  0x50   :  { %8449 = shalt.err (!%p8446_p6)
}
  0x51   :  { %s8450_s30 = scalar_lea.vmem %s130_s17, 32768  ;;  %p8455_p8 = scmp.lt.s32.totalorder %s130_s17, %s130_s17 }
  0x52   :  { %p8451_p7 = scmp.ne.s32.totalorder %s130_s17, %s8450_s30  ;;  %p8456_p9 = scmp.lt.s32.totalorder %s8450_s30, %s8450_s30 }
  0x54   :  { %p8457_p10 = por %p8456_p9, %p8455_p8 }
  0x56   :  { %p8458_p11 = pnand %p8457_p10, %p8451_p7 }
  0x58   :  { %8461 = shalt.err (!%p8458_p11)
}
  0x59   :  { %s8709_s7 = smov 512   ;;  %s8710_s27 = smov 32  }
  0x5a   :  { %135 = dma.hbm_to_vmem [thread:$0]  %s9312_s9, 32768, %s130_s17, [#allocation18], %s8709_s7, %s8709_s7, %s8710_s27  }
  0x5b   :  { %s8711_s24 = smov [#allocation20]   ;;  %s8712_s29 = smov [#allocation2]  }
  0x5c   :  { %s152_s26 = sshll.u32 %s8711_s24, 4  ;;  %s34_s15 = sshll.u32 %s8712_s29, 4  ;;  %s153_s26 = int_to_ptr.vmem [resolvable:$true] %s152_s26  ;;  %s35_s15 = int_to_ptr.vmem [resolvable:$true] %s34_s15 }
  0x5d   :  { %s8462_s16 = scalar_lea.hbm %s9314_s11, 128 }
  0x5e   :  { %p8463_p12 = scmp.ne.s32.totalorder %s9314_s11, %s8462_s16  ;;  %p8466_p13 = scmp.lt.u32.totalorder %s8462_s16, %s9314_s11 }
  0x60   :  { %p8468_p0 = pnand %p8466_p13, %p8463_p12 }
  0x62   :  { %8471 = shalt.err (!%p8468_p0)
}
  0x63   :  { %s8472_s9 = scalar_lea.vmem %s153_s26, 128  ;;  %p8477_p2 = scmp.lt.s32.totalorder %s153_s26, %s153_s26 }
  0x64   :  { %p8473_p1 = scmp.ne.s32.totalorder %s153_s26, %s8472_s9  ;;  %p8478_p3 = scmp.lt.s32.totalorder %s8472_s9, %s8472_s9 }
  0x66   :  { %p8479_p4 = por %p8478_p3, %p8477_p2 }
  0x68   :  { %p8480_p5 = pnand %p8479_p4, %p8473_p1 }
  0x6a   :  { %8483 = shalt.err (!%p8480_p5)
}
  0x6b   :  { %155 = dma.hbm_to_vmem [thread:$0]  %s9314_s11, 128, %s153_s26, [#allocation21]  }
  0x6c   :  { %s8484_s30 = scalar_lea.hbm %s9303_s0, 128 }
  0x6d   :  { %p8485_p6 = scmp.ne.s32.totalorder %s9303_s0, %s8484_s30  ;;  %p8488_p7 = scmp.lt.u32.totalorder %s8484_s30, %s9303_s0 }
  0x6f   :  { %p8490_p8 = pnand %p8488_p7, %p8485_p6 }
  0x71   :  { %8493 = shalt.err (!%p8490_p8)
}
  0x72   :  { %s8494_s5 = scalar_lea.vmem %s35_s15, 128  ;;  %p8499_p10 = scmp.lt.s32.totalorder %s35_s15, %s35_s15 }
  0x73   :  { %p8495_p9 = scmp.ne.s32.totalorder %s35_s15, %s8494_s5  ;;  %p8500_p11 = scmp.lt.s32.totalorder %s8494_s5, %s8494_s5 }
  0x75   :  { %p8501_p12 = por %p8500_p11, %p8499_p10 }
  0x77   :  { %p8502_p13 = pnand %p8501_p12, %p8495_p9 }
  0x79   :  { %8505 = shalt.err (!%p8502_p13)
}
  0x7a   :  { %37 = dma.hbm_to_vmem [thread:$0]  %s9303_s0, 128, %s35_s15, [#allocation3]  }
  0x7b   :  { %s8713_s25 = smov [#allocation7]   ;;  %s8714_s18 = smov [#allocation10]  }
  0x7c   :  { %s56_s16 = sshll.u32 %s8713_s25, 4  ;;  %s78_s19 = sshll.u32 %s8714_s18, 4  ;;  %s57_s16 = int_to_ptr.vmem [resolvable:$true] %s56_s16  ;;  %s79_s19 = int_to_ptr.vmem [resolvable:$true] %s78_s19 }
  0x7d   :  { %s8506_s9 = scalar_lea.hbm %s9305_s2, 16 }
  0x7e   :  { %p8507_p0 = scmp.ne.s32.totalorder %s9305_s2, %s8506_s9  ;;  %p8510_p1 = scmp.lt.u32.totalorder %s8506_s9, %s9305_s2 }
  0x80   :  { %p8512_p2 = pnand %p8510_p1, %p8507_p0 }
  0x82   :  { %8515 = shalt.err (!%p8512_p2)
}
  0x83   :  { %s8516_s0 = scalar_lea.vmem %s57_s16, 16  ;;  %s8520_s15 = scalar_lea.vmem %s57_s16, 32 }
  0x84   :  { %p8517_p3 = scmp.ne.s32.totalorder %s57_s16, %s8516_s0  ;;  %p8521_p4 = scmp.lt.s32.totalorder %s57_s16, %s57_s16 }
  0x85   :  { %p8522_p5 = scmp.lt.s32.totalorder %s8520_s15, %s8516_s0 }
  0x87   :  { %p8523_p6 = por %p8522_p5, %p8521_p4 }
  0x89   :  { %p8524_p7 = pnand %p8523_p6, %p8517_p3 }
  0x8b   :  { %8527 = shalt.err (!%p8524_p7)
}
  0x8c   :  { %59 = dma.hbm_to_vmem [thread:$0]  %s9305_s2, 16, %s57_s16, [#allocation6]  }
  0x8d   :  { %s8528_s29 = scalar_lea.hbm %s9307_s4, 32 }
  0x8e   :  { %p8529_p8 = scmp.ne.s32.totalorder %s9307_s4, %s8528_s29  ;;  %p8532_p9 = scmp.lt.u32.totalorder %s8528_s29, %s9307_s4 }
  0x90   :  { %p8534_p10 = pnand %p8532_p9, %p8529_p8 }
  0x92   :  { %8537 = shalt.err (!%p8534_p10)
}
  0x93   :  { %s8538_s18 = scalar_lea.vmem %s79_s19, 32  ;;  %p8543_p12 = scmp.lt.s32.totalorder %s79_s19, %s79_s19 }
  0x94   :  { %p8539_p11 = scmp.ne.s32.totalorder %s79_s19, %s8538_s18  ;;  %p8544_p13 = scmp.lt.s32.totalorder %s8538_s18, %s8538_s18 }
  0x96   :  { %p8545_p0 = por %p8544_p13, %p8543_p12 }
  0x98   :  { %p8546_p1 = pnand %p8545_p0, %p8539_p11 }
  0x9a   :  { %8549 = shalt.err (!%p8546_p1)
}
  0x9b   :  { %81 = dma.hbm_to_vmem [thread:$0]  %s9307_s4, 32, %s79_s19, [#allocation9]  }
  0x9c   :  { %s8715_s20 = smov [#allocation13]   ;;  %s8550_s28 = scalar_lea.hbm %s9309_s6, 8192 }
  0x9d   :  { %s97_s3 = sshll.u32 %s8715_s20, 4  ;;  %p8551_p2 = scmp.ne.s32.totalorder %s9309_s6, %s8550_s28  ;;  %s98_s3 = int_to_ptr.vmem [resolvable:$true] %s97_s3 }
  0x9e   :  { %p8554_p3 = scmp.lt.u32.totalorder %s8550_s28, %s9309_s6 }
  0xa0   :  { %p8556_p4 = pnand %p8554_p3, %p8551_p2 }
  0xa2   :  { %8559 = shalt.err (!%p8556_p4)
}
  0xa3   :  { %s8560_s30 = scalar_lea.vmem %s98_s3, 8192  ;;  %p8565_p6 = scmp.lt.s32.totalorder %s98_s3, %s98_s3 }
  0xa4   :  { %p8561_p5 = scmp.ne.s32.totalorder %s98_s3, %s8560_s30  ;;  %p8566_p7 = scmp.lt.s32.totalorder %s8560_s30, %s8560_s30 }
  0xa6   :  { %p8567_p8 = por %p8566_p7, %p8565_p6 }
  0xa8   :  { %p8568_p9 = pnand %p8567_p8, %p8561_p5 }
  0xaa   :  { %8571 = shalt.err (!%p8568_p9)
}
  0xab   :  { %s8716_s4 = smov 256   ;;  %s8717_s19 = smov 16  }
  0xac   :  { %103 = dma.hbm_to_vmem [thread:$0]  %s9309_s6, 8192, %s98_s3, [#allocation12], %s8716_s4, %s8716_s4, %s8717_s19  }
  0xad   :  { %s8718_s24 = smov [#allocation16]   ;;  %s8719_s5 = smov [#allocation19]  }
  0xae   :  { %s120_s29 = sshll.u32 %s8718_s24, 4  ;;  %s142_s11 = sshll.u32 %s8719_s5, 4  ;;  %s121_s29 = int_to_ptr.vmem [resolvable:$true] %s120_s29  ;;  %s143_s11 = int_to_ptr.vmem [resolvable:$true] %s142_s11 }
  0xaf   :  { %s8572_s18 = scalar_lea.hbm %s9311_s8, 64 }
  0xb0   :  { %p8573_p10 = scmp.ne.s32.totalorder %s9311_s8, %s8572_s18  ;;  %p8576_p11 = scmp.lt.u32.totalorder %s8572_s18, %s9311_s8 }
  0xb2   :  { %p8578_p12 = pnand %p8576_p11, %p8573_p10 }
  0xb4   :  { %8581 = shalt.err (!%p8578_p12)
}
  0xb5   :  { %s8582_s6 = scalar_lea.vmem %s121_s29, 64  ;;  %p8587_p0 = scmp.lt.s32.totalorder %s121_s29, %s121_s29 }
  0xb6   :  { %p8583_p13 = scmp.ne.s32.totalorder %s121_s29, %s8582_s6  ;;  %p8588_p1 = scmp.lt.s32.totalorder %s8582_s6, %s8582_s6 }
  0xb8   :  { %p8589_p2 = por %p8588_p1, %p8587_p0 }
  0xba   :  { %p8590_p3 = pnand %p8589_p2, %p8583_p13 }
  0xbc   :  { %8593 = shalt.err (!%p8590_p3)
}
  0xbd   :  { %123 = dma.hbm_to_vmem [thread:$0]  %s9311_s8, 64, %s121_s29, [#allocation15]  }
  0xbe   :  { %s8594_s1 = scalar_lea.hbm %s9313_s10, 128 }
  0xbf   :  { %p8595_p4 = scmp.ne.s32.totalorder %s9313_s10, %s8594_s1  ;;  %p8598_p5 = scmp.lt.u32.totalorder %s8594_s1, %s9313_s10 }
  0xc1   :  { %p8600_p6 = pnand %p8598_p5, %p8595_p4 }
  0xc3   :  { %8603 = shalt.err (!%p8600_p6)
}
  0xc4   :  { %s8604_s19 = scalar_lea.vmem %s143_s11, 128  ;;  %p8609_p8 = scmp.lt.s32.totalorder %s143_s11, %s143_s11 }
  0xc5   :  { %p8605_p7 = scmp.ne.s32.totalorder %s143_s11, %s8604_s19  ;;  %p8610_p9 = scmp.lt.s32.totalorder %s8604_s19, %s8604_s19 }
  0xc7   :  { %p8611_p10 = por %p8610_p9, %p8609_p8 }
  0xc9   :  { %p8612_p11 = pnand %p8611_p10, %p8605_p7 }
  0xcb   :  { %8615 = shalt.err (!%p8612_p11)
}
  0xcc   :  { %145 = dma.hbm_to_vmem [thread:$0]  %s9313_s10, 128, %s143_s11, [#allocation18]  }
  0xcd   :  { %s8720_s23 = smov [#allocation22]   ;;  %s8721_s29 = smov [#allocation23]  }
  0xce   :  { %s161_s24 = sshll.u32 %s8720_s23, 4  ;;  %s174_s5 = sshll.u32 %s8721_s29, 4  ;;  %s162_s24 = int_to_ptr.vmem [resolvable:$true] %s161_s24  ;;  %s175_s5 = int_to_ptr.vmem [resolvable:$true] %s174_s5 }
  0xcf   :  { %s8616_s18 = scalar_lea.hbm %s9315_s12, 65536 }
  0xd0   :  { %p8617_p12 = scmp.ne.s32.totalorder %s9315_s12, %s8616_s18  ;;  %p8620_p13 = scmp.lt.u32.totalorder %s8616_s18, %s9315_s12 }
  0xd2   :  { %p8622_p0 = pnand %p8620_p13, %p8617_p12 }
  0xd4   :  { %8625 = shalt.err (!%p8622_p0)
}
  0xd5   :  { %s8626_s10 = scalar_lea.vmem %s162_s24, 65536  ;;  %p8631_p2 = scmp.lt.s32.totalorder %s162_s24, %s162_s24 }
  0xd6   :  { %p8627_p1 = scmp.ne.s32.totalorder %s162_s24, %s8626_s10  ;;  %p8632_p3 = scmp.lt.s32.totalorder %s8626_s10, %s8626_s10 }
  0xd8   :  { %p8633_p4 = por %p8632_p3, %p8631_p2 }
  0xda   :  { %p8634_p5 = pnand %p8633_p4, %p8627_p1 }
  0xdc   :  { %8637 = shalt.err (!%p8634_p5)
}
  0xdd   :  { %167 = dma.hbm_to_vmem [thread:$0]  %s9315_s12, 65536, %s162_s24, [#allocation21], %s8709_s7, %s8709_s7, %s8710_s27  }
  0xde   :  { %s8638_s28 = scalar_lea.hbm %s9316_s13, 128 }
  0xdf   :  { %p8639_p6 = scmp.ne.s32.totalorder %s9316_s13, %s8638_s28  ;;  %p8642_p7 = scmp.lt.u32.totalorder %s8638_s28, %s9316_s13 }
  0xe1   :  { %p8644_p8 = pnand %p8642_p7, %p8639_p6 }
  0xe3   :  { %8647 = shalt.err (!%p8644_p8)
}
  0xe4   :  { %s8648_s30 = scalar_lea.vmem %s175_s5, 128  ;;  %p8653_p10 = scmp.lt.s32.totalorder %s175_s5, %s175_s5 }
  0xe5   :  { %p8649_p9 = scmp.ne.s32.totalorder %s175_s5, %s8648_s30  ;;  %p8654_p11 = scmp.lt.s32.totalorder %s8648_s30, %s8648_s30 }
  0xe7   :  { %p8655_p12 = por %p8654_p11, %p8653_p10 }
  0xe9   :  { %p8656_p13 = pnand %p8655_p12, %p8649_p9 }
  0xeb   :  { %8659 = shalt.err (!%p8656_p13)
}
  0xec   :  { %177 = dma.hbm_to_vmem [thread:$0]  %s9316_s13, 128, %s175_s5, [#allocation24]  }
  0xed   :  { %8682 = dma.done.wait [#allocation3], 128  }
  0xee   :  { %8683 = vsyncadd [#allocation3], 4294967168 }
  0xef   :  { %8684 = dma.done.wait [#allocation6], 1040  }
  0xf0   :  { %8685 = vsyncadd [#allocation6], 4294966256 }
  0xf1   :  { %8686 = dma.done.wait [#allocation9], 2080  }
  0xf2   :  { %8687 = vsyncadd [#allocation9], 4294965216 }
  0xf3   :  { %8688 = dma.done.wait [#allocation12], 8224  }
  0xf4   :  { %8689 = vsyncadd [#allocation12], 4294959072 }
  0xf5   :  { %8690 = dma.done.wait [#allocation15], 128  }
  0xf6   :  { %8691 = vsyncadd [#allocation15], 4294967168 }
  0xf7   :  { %8692 = dma.done.wait [#allocation18], 32896  }
  0xf8   :  { %8693 = vsyncadd [#allocation18], 4294934400 }
  0xf9   :  { %8694 = dma.done.wait [#allocation21], 65664  }
  0xfa   :  { %8695 = vsyncadd [#allocation21], 4294901632 }
  0xfb   :  { %8696 = dma.done.wait [#allocation24], 128  }
  0xfc   :  { %8697 = vsyncadd [#allocation24], 4294967168  ;;  %v8722_v0 = vmov 0.0   ;;  %vm8723_vm0 = vmmov 0   ;;  %v8180_v1 = vld [vmem:[#allocation5] sm:$0xff]   ;;  %v8181_v2 = vld [vmem:[#allocation5 + $0x8] sm:$0xff]  }
  0xfd   :  { %8061 = vmatprep.subr.bf16.mxu0 %v8722_v0  ;;  %8077 = vmatprep.mubr.msk.bf16.mxu0 %vm8723_vm0, %v8722_v0  ;;  %v8182_v3 = vld [vmem:[#allocation5 + $0x10] sm:$0xff]   ;;  %v8190_v5 = vld [vmem:[#allocation8] ss:$8 sps:$4 sm:$0xff]   ;;  %v8183_v6 = vld [vmem:[#allocation5 + $0x18] sm:$0xff]   ;;  %v8724_v27 = vmov 0   ;;  %s8726_s13 = smov [#allocation25]  }
  0xfe   :  { %8062 = vmatpush3.bf16.msra.mxu0 %v8180_v1  ;;  %v8188_v4 = vld [vmem:[#allocation8 + $0x4] ss:$8 sps:$4 sm:$0xff]   ;;  %v8191_v7 = vld [vmem:[#allocation8 + $0x14] ss:$8 sps:$4 sm:$0xff]   ;;  %v8193_v8 = vld [vmem:[#allocation8 + $0x10] ss:$8 sps:$4 sm:$0xff]   ;;  %465 = vmatprep.mubr.bf16.mxu1 %v8724_v27 }
  0xff   :  { %8063 = vmatprep.subr.bf16.mxu0 %v8722_v0  ;;  %433 = vmatprep.subr.bf16.mxu1 %v8188_v4  ;;  %v8194_v9 = vld [vmem:[#allocation8 + $0x24] ss:$8 sps:$4 sm:$0xff]   ;;  %v8196_v12 = vld [vmem:[#allocation8 + $0x20] ss:$8 sps:$4 sm:$0xff]   ;;  %v8197_v13 = vld [vmem:[#allocation8 + $0x34] ss:$8 sps:$4 sm:$0xff]  }
 0x100   :  { %434 = vmatpush1.bf16.msra.mxu1 %v8190_v5  ;;  %v8184_v10 = vld [vmem:[#allocation5 + $0x20] sm:$0xff]   ;;  %v8185_v11 = vld [vmem:[#allocation5 + $0x28] sm:$0xff]   ;;  %v8199_v14 = vld [vmem:[#allocation8 + $0x30] ss:$8 sps:$4 sm:$0xff]   ;;  %s7179_s27 = sshll.u32 %s8726_s13, 4  ;;  %s7180_s27 = int_to_ptr.vmem [resolvable:$true] %s7179_s27 }
 0x101   :  { %435 = vmatprep.subr.bf16.mxu1 %v8191_v7  ;;  %v8200_v15 = vld [vmem:[#allocation8 + $0x44] ss:$8 sps:$4 sm:$0xff]   ;;  %v8202_v17 = vld [vmem:[#allocation8 + $0x40] ss:$8 sps:$4 sm:$0xff]   ;;  %v8203_v18 = vld [vmem:[#allocation8 + $0x54] ss:$8 sps:$4 sm:$0xff]   ;;  %p8665_p1 = scmp.lt.s32.totalorder %s7180_s27, %s7180_s27 }
 0x102   :  { %8064 = vmatpush3.bf16.msra.mxu0 %v8181_v2  ;;  %v8186_v16 = vld [vmem:[#allocation5 + $0x30] sm:$0xff]   ;;  %v8187_v19 = vld [vmem:[#allocation5 + $0x38] sm:$0xff]   ;;  %v8208_v24 = vld [vmem:[#allocation8 + $0x60] ss:$8 sps:$4 sm:$0xff]   ;;  %s8660_s4 = scalar_lea.vmem %s7180_s27, 1024 }
 0x103   :  { %8065 = vmatprep.subr.bf16.mxu0 %v8722_v0  ;;  %v221_v20 = vld [vmem:[#allocation2] sm:$0xff]  ;;  %v8206_v23 = vld [vmem:[#allocation8 + $0x64] ss:$8 sps:$4 sm:$0xff]   ;;  %v7195_v28 = vld [vmem:[#allocation7] ss:$0 sm:$0xff]  ;;  %p8661_p0 = scmp.ne.s32.totalorder %s7180_s27, %s8660_s4  ;;  %p8666_p2 = scmp.lt.s32.totalorder %s8660_s4, %s8660_s4 }
 0x104   :  { %436 = vmatpush1.bf16.msra.mxu1 %v8193_v8  ;;  %v8205_v21 = vld [vmem:[#allocation8 + $0x50] ss:$8 sps:$4 sm:$0xff]   ;;  %v222_v22 = vpack.c.bf16 %v221_v20, %v221_v20  ;;  %v8209_v25 = vld [vmem:[#allocation8 + $0x74] ss:$8 sps:$4 sm:$0xff]  }
 0x105   :  { %437 = vmatprep.subr.bf16.mxu1 %v8194_v9  ;;  %v8211_v26 = vld [vmem:[#allocation8 + $0x70] ss:$8 sps:$4 sm:$0xff]   ;;  %v8212_v39 = vld [vmem:[#allocation13] ss:$16 sps:$4 sm:$0xff]   ;;  %v8215_v40 = vld [vmem:[#allocation13 + $0x8] ss:$16 sps:$4 sm:$0xff]   ;;  %p8667_p3 = por %p8666_p2, %p8665_p1 }
 0x106   :  { %8066 = vmatpush3.bf16.msra.mxu0 %v8182_v3  ;;  %v8214_v37 = vld [vmem:[#allocation13 + $0x4] ss:$16 sps:$4 sm:$0xff]   ;;  %v8217_v38 = vld [vmem:[#allocation13 + $0xc] ss:$16 sps:$4 sm:$0xff]   ;;  %v8218_v43 = vld [vmem:[#allocation13 + $0x20] ss:$16 sps:$4 sm:$0xff]  }
 0x107   :  { %8067 = vmatprep.subr.bf16.mxu0 %v8722_v0  ;;  %v8220_v41 = vld [vmem:[#allocation13 + $0x24] ss:$16 sps:$4 sm:$0xff]   ;;  %v8223_v42 = vld [vmem:[#allocation13 + $0x2c] ss:$16 sps:$4 sm:$0xff]   ;;  %v8221_v44 = vld [vmem:[#allocation13 + $0x28] ss:$16 sps:$4 sm:$0xff]   ;;  %p8668_p4 = pnand %p8667_p3, %p8661_p0 }
 0x108   :  { %438 = vmatpush1.bf16.msra.mxu1 %v8196_v12  ;;  %v8226_v45 = vld [vmem:[#allocation13 + $0x44] ss:$16 sps:$4 sm:$0xff]   ;;  %v8229_v46 = vld [vmem:[#allocation13 + $0x4c] ss:$16 sps:$4 sm:$0xff]   ;;  %v8224_v47 = vld [vmem:[#allocation13 + $0x40] ss:$16 sps:$4 sm:$0xff]  }
 0x109   :  { %439 = vmatprep.subr.bf16.mxu1 %v8197_v13  ;;  %v8227_v48 = vld [vmem:[#allocation13 + $0x48] ss:$16 sps:$4 sm:$0xff]   ;;  %v8232_v49 = vld [vmem:[#allocation13 + $0x64] ss:$16 sps:$4 sm:$0xff]   ;;  %v8235_v50 = vld [vmem:[#allocation13 + $0x6c] ss:$16 sps:$4 sm:$0xff]  }
 0x10a   :  { %8068 = vmatpush3.bf16.msra.mxu0 %v8183_v6  ;;  %v8230_v51 = vld [vmem:[#allocation13 + $0x60] ss:$16 sps:$4 sm:$0xff]   ;;  %v8233_v52 = vld [vmem:[#allocation13 + $0x68] ss:$16 sps:$4 sm:$0xff]   ;;  %v8238_v53 = vld [vmem:[#allocation13 + $0x84] ss:$16 sps:$4 sm:$0xff]  }
 0x10b   :  { %8069 = vmatprep.subr.bf16.mxu0 %v8722_v0  ;;  %v8241_v54 = vld [vmem:[#allocation13 + $0x8c] ss:$16 sps:$4 sm:$0xff]   ;;  %v8236_v55 = vld [vmem:[#allocation13 + $0x80] ss:$16 sps:$4 sm:$0xff]   ;;  %v8239_v56 = vld [vmem:[#allocation13 + $0x88] ss:$16 sps:$4 sm:$0xff]  }
 0x10c   :  { %440 = vmatpush1.bf16.msra.mxu1 %v8199_v14  ;;  %v8244_v57 = vld [vmem:[#allocation13 + $0xa4] ss:$16 sps:$4 sm:$0xff]   ;;  %v8247_v58 = vld [vmem:[#allocation13 + $0xac] ss:$16 sps:$4 sm:$0xff]   ;;  %v8242_v59 = vld [vmem:[#allocation13 + $0xa0] ss:$16 sps:$4 sm:$0xff]  }
 0x10d   :  { %441 = vmatprep.subr.bf16.mxu1 %v8200_v15  ;;  %v8245_v60 = vld [vmem:[#allocation13 + $0xa8] ss:$16 sps:$4 sm:$0xff]   ;;  %v8250_v61 = vld [vmem:[#allocation13 + $0xc4] ss:$16 sps:$4 sm:$0xff]   ;;  %v8253_v62 = vld [vmem:[#allocation13 + $0xcc] ss:$16 sps:$4 sm:$0xff]  }
 0x10e   :  { %8070 = vmatpush3.bf16.msra.mxu0 %v8184_v10  ;;  %v8248_v63 = vld [vmem:[#allocation13 + $0xc0] ss:$16 sps:$4 sm:$0xff]   ;;  %v8256_v1 = vld [vmem:[#allocation13 + $0xe4] ss:$16 sps:$4 sm:$0xff]   ;;  %v8259_v2 = vld [vmem:[#allocation13 + $0xec] ss:$16 sps:$4 sm:$0xff]  }
 0x10f   :  { %8071 = vmatprep.subr.bf16.mxu0 %v8722_v0  ;;  %v8254_v3 = vld [vmem:[#allocation13 + $0xe0] ss:$16 sps:$4 sm:$0xff]   ;;  %v8257_v4 = vld [vmem:[#allocation13 + $0xe8] ss:$16 sps:$4 sm:$0xff]   ;;  %v8262_v5 = vld [vmem:[#allocation13 + $0x104] ss:$16 sps:$4 sm:$0xff]  }
 0x110   :  { %442 = vmatpush1.bf16.msra.mxu1 %v8202_v17  ;;  %v8265_v6 = vld [vmem:[#allocation13 + $0x10c] ss:$16 sps:$4 sm:$0xff]   ;;  %v8260_v7 = vld [vmem:[#allocation13 + $0x100] ss:$16 sps:$4 sm:$0xff]   ;;  %v8263_v8 = vld [vmem:[#allocation13 + $0x108] ss:$16 sps:$4 sm:$0xff]  }
 0x111   :  { %443 = vmatprep.subr.bf16.mxu1 %v8203_v18  ;;  %v8268_v9 = vld [vmem:[#allocation13 + $0x124] ss:$16 sps:$4 sm:$0xff]   ;;  %v8271_v10 = vld [vmem:[#allocation13 + $0x12c] ss:$16 sps:$4 sm:$0xff]   ;;  %v8269_v12 = vld [vmem:[#allocation13 + $0x128] ss:$16 sps:$4 sm:$0xff]  }
 0x112   :  { %8072 = vmatpush3.bf16.msra.mxu0 %v8185_v11  ;;  %v8266_v11 = vld [vmem:[#allocation13 + $0x120] ss:$16 sps:$4 sm:$0xff]   ;;  %v8274_v13 = vld [vmem:[#allocation13 + $0x144] ss:$16 sps:$4 sm:$0xff]   ;;  %v8277_v14 = vld [vmem:[#allocation13 + $0x14c] ss:$16 sps:$4 sm:$0xff]  }
 0x113   :  { %8073 = vmatprep.subr.bf16.mxu0 %v8722_v0  ;;  %v8272_v15 = vld [vmem:[#allocation13 + $0x140] ss:$16 sps:$4 sm:$0xff]   ;;  %v8280_v17 = vld [vmem:[#allocation13 + $0x164] ss:$16 sps:$4 sm:$0xff]   ;;  %v8283_v18 = vld [vmem:[#allocation13 + $0x16c] ss:$16 sps:$4 sm:$0xff]  }
 0x114   :  { %444 = vmatpush1.bf16.msra.mxu1 %v8205_v21  ;;  %v8281_v20 = vld [vmem:[#allocation13 + $0x168] ss:$16 sps:$4 sm:$0xff]   ;;  %v8286_v21 = vld [vmem:[#allocation13 + $0x184] ss:$16 sps:$4 sm:$0xff]   ;;  %v8290_v27 = vld [vmem:[#allocation13 + $0x1a0] ss:$16 sps:$4 sm:$0xff]  }
 0x115   :  { %445 = vmatprep.subr.bf16.mxu1 %v8206_v23  ;;  %v8284_v23 = vld [vmem:[#allocation13 + $0x180] ss:$16 sps:$4 sm:$0xff]  }
 0x116   :  { %8074 = vmatpush3.bf16.msra.mxu0 %v8186_v16  ;;  %v8275_v16 = vld [vmem:[#allocation13 + $0x148] ss:$16 sps:$4 sm:$0xff]  }
 0x117   :  { %8075 = vmatprep.subr.bf16.mxu0 %v8722_v0  ;;  %v8251_v0 = vld [vmem:[#allocation13 + $0xc8] ss:$16 sps:$4 sm:$0xff]  }
 0x118   :  { %446 = vmatpush1.bf16.msra.mxu1 %v8208_v24  ;;  %v8287_v24 = vld [vmem:[#allocation13 + $0x188] ss:$16 sps:$4 sm:$0xff]  }
 0x119   :  { %447 = vmatprep.subr.bf16.mxu1 %v8209_v25  ;;  %v8292_v25 = vld [vmem:[#allocation13 + $0x1a4] ss:$16 sps:$4 sm:$0xff]  }
 0x11a   :  { %8076 = vmatpush3.bf16.msra.mxu0 %v8187_v19  ;;  %v8278_v19 = vld [vmem:[#allocation13 + $0x160] ss:$16 sps:$4 sm:$0xff]  }
 0x11b   :  { %948 = vmatprep.subr.bf16.mxu0 %v8214_v37 }
 0x11c   :  { %448 = vmatpush1.bf16.msra.mxu1 %v8211_v26  ;;  %v8295_v26 = vld [vmem:[#allocation13 + $0x1ac] ss:$16 sps:$4 sm:$0xff]  }
 0x11d   :  { %8078 = vmatmul.mubr.bf16.vlgmr.msra.gmra.mrb[0].mxu0 %v222_v22  ;;  %989 = vmatprep.subr.bf16.mxu1 %v8217_v38  ;;  %v8289_v22 = vld [vmem:[#allocation13 + $0x18c] ss:$16 sps:$4 sm:$0xff]  }
 0x11e   :  { %949 = vmatpush1.bf16.msra.mxu0 %v8212_v39 }
 0x11f   :  { %950 = vmatprep.subr.bf16.mxu0 %v8220_v41 }
 0x122   :  { %951 = vmatpush1.bf16.msra.mxu0 %v8218_v43 }
 0x123   :  { %952 = vmatprep.subr.bf16.mxu0 %v8226_v45 }
 0x126   :  { %953 = vmatpush1.bf16.msra.mxu0 %v8224_v47 }
 0x127   :  { %954 = vmatprep.subr.bf16.mxu0 %v8232_v49 }
 0x12a   :  { %955 = vmatpush1.bf16.msra.mxu0 %v8230_v51 }
 0x12b   :  { %956 = vmatprep.subr.bf16.mxu0 %v8238_v53 }
 0x12e   :  { %957 = vmatpush1.bf16.msra.mxu0 %v8236_v55 }
 0x12f   :  { %958 = vmatprep.subr.bf16.mxu0 %v8244_v57 }
 0x132   :  { %959 = vmatpush1.bf16.msra.mxu0 %v8242_v59 }
 0x133   :  { %960 = vmatprep.subr.bf16.mxu0 %v8250_v61 }
 0x136   :  { %961 = vmatpush1.bf16.msra.mxu0 %v8248_v63 }
 0x137   :  { %962 = vmatprep.subr.bf16.mxu0 %v8256_v1 }
 0x13a   :  { %963 = vmatpush1.bf16.msra.mxu0 %v8254_v3 }
 0x13b   :  { %964 = vmatprep.subr.bf16.mxu0 %v8262_v5 }
 0x13e   :  { %965 = vmatpush1.bf16.msra.mxu0 %v8260_v7 }
 0x13f   :  { %966 = vmatprep.subr.bf16.mxu0 %v8268_v9 }
 0x142   :  { %967 = vmatpush1.bf16.msra.mxu0 %v8266_v11  ;;  %v8725_v11 = vmov 1966171168  }
 0x143   :  { %968 = vmatprep.subr.bf16.mxu0 %v8274_v13  ;;  %v519_v13 = vlaneseq }
 0x146   :  { %969 = vmatpush1.bf16.msra.mxu0 %v8272_v15  ;;  %v8976_v15 = vshrl.u32 %v519_v13, 7  ;;  %v1233_v13 = vld [vmem:[#allocation17 + $0x128] sm:$0xff] }
 0x147   :  { %970 = vmatprep.subr.bf16.mxu0 %v8280_v17 }
 0x14a   :  { %971 = vmatpush1.bf16.msra.mxu0 %v8278_v19 }
 0x14b   :  { %972 = vmatprep.subr.bf16.mxu0 %v8286_v21  ;;  %v474_v21 = vld [vmem:[#allocation10] sm:$0x3] }
 0x14e   :  { %973 = vmatpush1.bf16.msra.mxu0 %v8284_v23  ;;  %v8984_v23 = vsub.s32 0, %v8976_v15 }
 0x14f   :  { %974 = vmatprep.subr.bf16.mxu0 %v8292_v25  ;;  %v475_v25 = vld [vmem:[#allocation11] sm:$0x3] }
 0x152   :  { %975 = vmatpush1.bf16.msra.mxu0 %v8290_v27 }
 0x1f0   :  { %v328_v29 = vpop.f32.mrb[0].mxu0 }
 0x1f1   :  { %v329_v30 = vadd.f32 %v7195_v28, %v328_v29  ;;  %v8079_v31 = vpop.f32.mrb[1].mxu0  ;;  %v8293_v28 = vld [vmem:[#allocation13 + $0x1a8] ss:$16 sps:$4 sm:$0xff]   ;;  %v8296_v29 = vld [vmem:[#allocation13 + $0x1c0] ss:$16 sps:$4 sm:$0xff]  }
 0x1f2   :  { %v331_v32 = vpop.f32.mrb[2].mxu0  ;;  %v8299_v31 = vld [vmem:[#allocation13 + $0x1c8] ss:$16 sps:$4 sm:$0xff]  }
 0x1f3   :  { %v334_v33 = vmul.f32 0.2, %v329_v30  ;;  %v8080_v34 = vpop.f32.mrb[3].mxu0  ;;  %v8301_v32 = vld [vmem:[#allocation13 + $0x1cc] ss:$16 sps:$4 sm:$0xff]  }
 0x1f4   :  { %v8307_v34 = vld [vmem:[#allocation13 + $0x1ec] ss:$16 sps:$4 sm:$0xff]  }
 0x1f5   :  { %v335_v35 = vmax.f32 %v329_v30, %v334_v33  ;;  %v8298_v30 = vld [vmem:[#allocation13 + $0x1c4] ss:$16 sps:$4 sm:$0xff]  }
 0x1f6   :  { %v8304_v33 = vld [vmem:[#allocation13 + $0x1e4] ss:$16 sps:$4 sm:$0xff]   ;;  %976 = vmatprep.subr.bf16.mxu0 %v8298_v30 }
 0x1f7   :  { %v336_v36 = vpack.c.bf16 %v335_v35, %v335_v35  ;;  %977 = vmatpush1.bf16.msra.mxu0 %v8296_v29  ;;  %v8302_v35 = vld [vmem:[#allocation13 + $0x1e0] ss:$16 sps:$4 sm:$0xff]   ;;  %v549_v29 = vrot.slane %v475_v25, %v8984_v23 }
 0x1f8   :  { %978 = vmatprep.subr.bf16.mxu0 %v8304_v33 }
 0x1f9   :  { %466 = vmatmul.mubr.bf16.vlgmr.msra.gmra.mrb[0].mxu1 %v336_v36  ;;  %v8305_v36 = vld [vmem:[#allocation13 + $0x1e8] ss:$16 sps:$4 sm:$0xff]  }
 0x1fa   :  { %990 = vmatpush1.bf16.msra.mxu1 %v8215_v40 }
 0x1fb   :  { %991 = vmatprep.subr.bf16.mxu1 %v8223_v42  ;;  %979 = vmatpush1.bf16.msra.mxu0 %v8302_v35 }
 0x1fe   :  { %992 = vmatpush1.bf16.msra.mxu1 %v8221_v44 }
 0x1ff   :  { %993 = vmatprep.subr.bf16.mxu1 %v8229_v46 }
 0x202   :  { %994 = vmatpush1.bf16.msra.mxu1 %v8227_v48 }
 0x203   :  { %995 = vmatprep.subr.bf16.mxu1 %v8235_v50 }
 0x206   :  { %996 = vmatpush1.bf16.msra.mxu1 %v8233_v52 }
 0x207   :  { %997 = vmatprep.subr.bf16.mxu1 %v8241_v54 }
 0x20a   :  { %998 = vmatpush1.bf16.msra.mxu1 %v8239_v56 }
 0x20b   :  { %999 = vmatprep.subr.bf16.mxu1 %v8247_v58 }
 0x20e   :  { %1000 = vmatpush1.bf16.msra.mxu1 %v8245_v60 }
 0x20f   :  { %1001 = vmatprep.subr.bf16.mxu1 %v8253_v62 }
 0x212   :  { %1002 = vmatpush1.bf16.msra.mxu1 %v8251_v0 }
 0x213   :  { %1003 = vmatprep.subr.bf16.mxu1 %v8259_v2 }
 0x216   :  { %1004 = vmatpush1.bf16.msra.mxu1 %v8257_v4 }
 0x217   :  { %1005 = vmatprep.subr.bf16.mxu1 %v8265_v6 }
 0x21a   :  { %1006 = vmatpush1.bf16.msra.mxu1 %v8263_v8 }
 0x21b   :  { %1007 = vmatprep.subr.bf16.mxu1 %v8271_v10 }
 0x21e   :  { %1008 = vmatpush1.bf16.msra.mxu1 %v8269_v12  ;;  %v517_v12 = vunpack.c.l.s4 %v8725_v11  ;;  %v1229_v11 = vld [vmem:[#allocation17 + $0x108] sm:$0xff] }
 0x21f   :  { %1009 = vmatprep.subr.bf16.mxu1 %v8277_v14 }
 0x220   :  { %v518_v14 = vunpack.c.0.s8 %v517_v12 }
 0x222   :  { %1010 = vmatpush1.bf16.msra.mxu1 %v8275_v16  ;;  %v8979_v17 = vsub.s32 %v518_v14, %v8976_v15 }
 0x223   :  { %1011 = vmatprep.subr.bf16.mxu1 %v8283_v18 }
 0x226   :  { %1012 = vmatpush1.bf16.msra.mxu1 %v8281_v20 }
 0x227   :  { %1013 = vmatprep.subr.bf16.mxu1 %v8289_v22 }
 0x22a   :  { %1014 = vmatpush1.bf16.msra.mxu1 %v8287_v24  ;;  %v8987_v24 = vsub.s32 1, %v8976_v15 }
 0x22b   :  { %1015 = vmatprep.subr.bf16.mxu1 %v8295_v26 }
 0x22c   :  { %v553_v30 = vrot.slane %v475_v25, %v8987_v24  ;;  %v1241_v25 = vld [vmem:[#allocation17 + $0x168] sm:$0xff] }
 0x22e   :  { %1016 = vmatpush1.bf16.msra.mxu1 %v8293_v28 }
 0x22f   :  { %1017 = vmatprep.subr.bf16.mxu1 %v8301_v32 }
 0x232   :  { %1018 = vmatpush1.bf16.msra.mxu1 %v8299_v31 }
 0x233   :  { %1019 = vmatprep.subr.bf16.mxu1 %v8307_v34 }
 0x236   :  { %1020 = vmatpush1.bf16.msra.mxu1 %v8305_v36 }
 0x2cc   :  { %v467_v37 = vpop.f32.mrb[0].mxu1 }
 0x2cd   :  { %v476_v38 = vrot.slane %v467_v37, 4  ;;  %v469_v39 = vpop.f32.mrb[1].mxu1 }
 0x2ce   :  { %v482_v40 = vrot.slane %v469_v39, 4  ;;  %v471_v41 = vpop.f32.mrb[2].mxu1 }
 0x2cf   :  { %v477_v42 = vadd.f32 %v476_v38, %v467_v37  ;;  %v472_v43 = vpop.f32.mrb[3].mxu1  ;;  %v1196_v41 = vld [vmem:[#allocation17] sm:$0xff] }
 0x2d0   :  { %v483_v44 = vadd.f32 %v482_v40, %v469_v39  ;;  %v1197_v43 = vld [vmem:[#allocation17 + $0x8] sm:$0xff] }
 0x2d1   :  { %v478_v45 = vrot.slane %v477_v42, 2 }
 0x2d2   :  { %v484_v46 = vrot.slane %v483_v44, 2 }
 0x2d3   :  { %v479_v47 = vadd.f32 %v478_v45, %v477_v42  ;;  %v1200_v42 = vld [vmem:[#allocation17 + $0x20] sm:$0xff]  ;;  %v1201_v45 = vld [vmem:[#allocation17 + $0x28] sm:$0xff] }
 0x2d4   :  { %v485_v48 = vadd.f32 %v484_v46, %v483_v44  ;;  %v7285_v44 = vcombine.high %v1196_v41, %v1200_v42  ;;  %v7284_v46 = vcombine.low %v1196_v41, %v1200_v42  ;;  %v1257_v41 = vld [vmem:[#allocation17 + $0x1e8] sm:$0xff] }
 0x2d5   :  { %v480_v49 = vrot.slane %v479_v47, 1 }
 0x2d6   :  { %v486_v50 = vrot.slane %v485_v48, 1  ;;  %2732 = vmatprep.subr.bf16.mxu0 %v7285_v44 }
 0x2d7   :  { %v481_v51 = vadd.f32 %v480_v49, %v479_v47  ;;  %v7286_v47 = vcombine.low %v1197_v43, %v1201_v45  ;;  %v1204_v49 = vld [vmem:[#allocation17 + $0x40] sm:$0xff] }
 0x2d8   :  { %v487_v52 = vadd.f32 %v486_v50, %v485_v48  ;;  %v7287_v48 = vcombine.high %v1197_v43, %v1201_v45  ;;  %v1208_v50 = vld [vmem:[#allocation17 + $0x60] sm:$0xff] }
 0x2d9   :  { %v489_v53 = vmul.f32 0.125, %v481_v51  ;;  %v1205_v51 = vld [vmem:[#allocation17 + $0x48] sm:$0xff]  ;;  %v1260_v45 = vld [vmem:[#allocation17 + $0x200] sm:$0xff] }
 0x2da   :  { %v490_v54 = vmul.f32 0.125, %v487_v52  ;;  %2814 = vmatprep.subr.bf16.mxu1 %v7287_v48  ;;  %v7293_v52 = vcombine.high %v1204_v49, %v1208_v50 }
 0x2db   :  { %v491_v55 = vsub.f32 %v467_v37, %v489_v53  ;;  %v1209_v53 = vld [vmem:[#allocation17 + $0x68] sm:$0xff] }
 0x2dc   :  { %v492_v56 = vsub.f32 %v469_v39, %v490_v54  ;;  %v7292_v54 = vcombine.low %v1204_v49, %v1208_v50  ;;  %v1265_v49 = vld [vmem:[#allocation17 + $0x228] sm:$0xff] }
 0x2dd   :  { %v493_v57 = vmul.f32 %v491_v55, %v491_v55 }
 0x2de   :  { %v494_v58 = vmul.f32 %v492_v56, %v492_v56 }
 0x2df   :  { %v495_v59 = vrot.slane %v493_v57, 4 }
 0x2e0   :  { %v501_v60 = vrot.slane %v494_v58, 4 }
 0x2e1   :  { %v496_v61 = vadd.f32 %v495_v59, %v493_v57  ;;  %v1212_v57 = vld [vmem:[#allocation17 + $0x80] sm:$0xff]  ;;  %v1213_v59 = vld [vmem:[#allocation17 + $0x88] sm:$0xff] }
 0x2e2   :  { %v502_v62 = vadd.f32 %v501_v60, %v494_v58  ;;  %v1216_v58 = vld [vmem:[#allocation17 + $0xa0] sm:$0xff] }
 0x2e3   :  { %v497_v63 = vrot.slane %v496_v61, 2  ;;  %v7301_v60 = vcombine.high %v1212_v57, %v1216_v58 }
 0x2e4   :  { %v503_v0 = vrot.slane %v502_v62, 2 }
 0x2e5   :  { %v498_v1 = vadd.f32 %v497_v63, %v496_v61  ;;  %v1217_v61 = vld [vmem:[#allocation17 + $0xa8] sm:$0xff] }
 0x2e6   :  { %v504_v2 = vadd.f32 %v503_v0, %v502_v62  ;;  %v7300_v62 = vcombine.low %v1212_v57, %v1216_v58  ;;  %v7302_v63 = vcombine.low %v1213_v59, %v1217_v61  ;;  %v7303_v0 = vcombine.high %v1213_v59, %v1217_v61  ;;  %v1273_v57 = vld [vmem:[#allocation17 + $0x268] sm:$0xff]  ;;  %v1276_v61 = vld [vmem:[#allocation17 + $0x280] sm:$0xff] }
 0x2e7   :  { %v499_v3 = vrot.slane %v498_v1, 1 }
 0x2e8   :  { %v505_v4 = vrot.slane %v504_v2, 1 }
 0x2e9   :  { %v500_v5 = vadd.f32 %v499_v3, %v498_v1  ;;  %v1220_v1 = vld [vmem:[#allocation17 + $0xc0] sm:$0xff]  ;;  %v1221_v3 = vld [vmem:[#allocation17 + $0xc8] sm:$0xff] }
 0x2ea   :  { %v506_v6 = vadd.f32 %v505_v4, %v504_v2  ;;  %v1224_v2 = vld [vmem:[#allocation17 + $0xe0] sm:$0xff] }
 0x2eb   :  { %v507_v7 = vmul.f32 0.125, %v500_v5  ;;  %v7309_v4 = vcombine.high %v1220_v1, %v1224_v2  ;;  %v1225_v5 = vld [vmem:[#allocation17 + $0xe8] sm:$0xff] }
 0x2ec   :  { %v508_v8 = vmul.f32 0.125, %v506_v6  ;;  %v7308_v6 = vcombine.low %v1220_v1, %v1224_v2  ;;  %v1281_v1 = vld [vmem:[#allocation17 + $0x2a8] sm:$0xff] }
 0x2ed   :  { %v509_v9 = vadd.f32 0.8, %v507_v7  ;;  %v7310_v7 = vcombine.low %v1221_v3, %v1225_v5 }
 0x2ee   :  { %v510_v10 = vadd.f32 0.8, %v508_v8  ;;  %v7311_v8 = vcombine.high %v1221_v3, %v1225_v5  ;;  %v1284_v5 = vld [vmem:[#allocation17 + $0x2c0] sm:$0xff] }
 0x2ef   :  { %8308 = vrsqrt.f32 %v509_v9  ;;  %v1228_v9 = vld [vmem:[#allocation17 + $0x100] sm:$0xff] }
 0x2f0   :  { %8310 = vrsqrt.f32 %v510_v10  ;;  %v1232_v10 = vld [vmem:[#allocation17 + $0x120] sm:$0xff] }
 0x2f1   :  { %v7317_v12 = vcombine.high %v1228_v9, %v1232_v10  ;;  %v7316_v14 = vcombine.low %v1228_v9, %v1232_v10  ;;  %v1289_v9 = vld [vmem:[#allocation17 + $0x2e8] sm:$0xff] }
 0x2f9   :  { %v8309_v16 = vpop.eup %8308 }
 0x2fa   :  { %v8311_v18 = vpop.eup %8310 }
 0x2fb   :  { %v515_v19 = vcombine.low %v8309_v16, %v8311_v18  ;;  %v7318_v16 = vcombine.low %v1229_v11, %v1233_v13  ;;  %v7319_v18 = vcombine.high %v1229_v11, %v1233_v13  ;;  %v1292_v13 = vld [vmem:[#allocation17 + $0x300] sm:$0xff] }
 0x2fd   :  { %v522_v20 = vrot.slane %v515_v19, %v8979_v17  ;;  %v1236_v19 = vld [vmem:[#allocation17 + $0x140] sm:$0xff] }
 0x2ff   :  { %v529_v22 = vrot.slane %v522_v20, %v8979_v17  ;;  %v1240_v20 = vld [vmem:[#allocation17 + $0x160] sm:$0xff] }
 0x301   :  { %v531_v26 = vmul.f32 %v529_v22, %v474_v21  ;;  %v1237_v21 = vld [vmem:[#allocation17 + $0x148] sm:$0xff]  ;;  %v7325_v22 = vcombine.high %v1236_v19, %v1240_v20 }
 0x303   :  { %v536_v27 = vrot.slane %v531_v26, %v8984_v23  ;;  %v540_v28 = vrot.slane %v531_v26, %v8987_v24  ;;  %v7324_v26 = vcombine.low %v1236_v19, %v1240_v20  ;;  %v1297_v19 = vld [vmem:[#allocation17 + $0x328] sm:$0xff] }
 0x305   :  { %v544_v31 = vmul.f32 %v540_v28, %v492_v56  ;;  %v543_v32 = vmul.f32 %v536_v27, %v491_v55  ;;  %v7294_v55 = vcombine.low %v1205_v51, %v1209_v53  ;;  %v7295_v56 = vcombine.high %v1205_v51, %v1209_v53  ;;  %v1268_v53 = vld [vmem:[#allocation17 + $0x240] sm:$0xff] }
 0x306   :  { %v7326_v27 = vcombine.low %v1237_v21, %v1241_v25  ;;  %v7327_v28 = vcombine.high %v1237_v21, %v1241_v25  ;;  %v1300_v25 = vld [vmem:[#allocation17 + $0x340] sm:$0xff] }
 0x307   :  { %v557_v33 = vadd.f32 %v553_v30, %v544_v31  ;;  %v556_v34 = vadd.f32 %v549_v29, %v543_v32  ;;  %v1244_v29 = vld [vmem:[#allocation17 + $0x180] sm:$0xff]  ;;  %v1245_v31 = vld [vmem:[#allocation17 + $0x188] sm:$0xff] }
 0x308   :  { %v1248_v30 = vld [vmem:[#allocation17 + $0x1a0] sm:$0xff] }
 0x309   :  { %v559_v35 = vmul.f32 0.2, %v557_v33  ;;  %v558_v36 = vmul.f32 0.2, %v556_v34  ;;  %v7333_v32 = vcombine.high %v1244_v29, %v1248_v30 }
 0x30b   :  { %v561_v37 = vmax.f32 %v557_v33, %v559_v35  ;;  %v560_v38 = vmax.f32 %v556_v34, %v558_v36  ;;  %v1249_v33 = vld [vmem:[#allocation17 + $0x1a8] sm:$0xff]  ;;  %v7332_v34 = vcombine.low %v1244_v29, %v1248_v30 }
 0x30c   :  { %v7334_v35 = vcombine.low %v1245_v31, %v1249_v33  ;;  %v7335_v36 = vcombine.high %v1245_v31, %v1249_v33  ;;  %v1305_v29 = vld [vmem:[#allocation17 + $0x368] sm:$0xff]  ;;  %v1308_v33 = vld [vmem:[#allocation17 + $0x380] sm:$0xff] }
 0x30d   :  { %v563_v39 = vpack.c.bf16 %v561_v37, %v561_v37  ;;  %v562_v40 = vpack.c.bf16 %v560_v38, %v560_v38  ;;  %v1252_v37 = vld [vmem:[#allocation17 + $0x1c0] sm:$0xff] }
 0x30e   :  { %v1256_v38 = vld [vmem:[#allocation17 + $0x1e0] sm:$0xff] }
 0x30f   :  { %980 = vmatprep.mubr.bf16.mxu0 %v563_v39  ;;  %1021 = vmatprep.mubr.bf16.mxu1 %v563_v39  ;;  %v1253_v39 = vld [vmem:[#allocation17 + $0x1c8] sm:$0xff]  ;;  %v7340_v42 = vcombine.low %v1252_v37, %v1256_v38 }
 0x310   :  { %981 = vmatmul.mubr.bf16.vlgmr.msra.gmra.mrb[4].mxu0 %v562_v40  ;;  %1022 = vmatmul.mubr.bf16.vlgmr.msra.gmra.mrb[4].mxu1 %v562_v40  ;;  %v7341_v40 = vcombine.high %v1252_v37, %v1256_v38  ;;  %v7342_v43 = vcombine.low %v1253_v39, %v1257_v41  ;;  %v7343_v44 = vcombine.high %v1253_v39, %v1257_v41  ;;  %v1313_v37 = vld [vmem:[#allocation17 + $0x3a8] sm:$0xff]  ;;  %v1316_v41 = vld [vmem:[#allocation17 + $0x3c0] sm:$0xff] }
 0x311   :  { %2733 = vmatpush1.bf16.msra.mxu0 %v7284_v46  ;;  %2815 = vmatpush1.bf16.msra.mxu1 %v7286_v47  ;;  %v1264_v46 = vld [vmem:[#allocation17 + $0x220] sm:$0xff]  ;;  %v1261_v47 = vld [vmem:[#allocation17 + $0x208] sm:$0xff] }
 0x312   :  { %2734 = vmatprep.subr.bf16.mxu0 %v7293_v52  ;;  %2816 = vmatprep.subr.bf16.mxu1 %v7295_v56  ;;  %v7349_v48 = vcombine.high %v1260_v45, %v1264_v46  ;;  %v7348_v50 = vcombine.low %v1260_v45, %v1264_v46  ;;  %v7350_v51 = vcombine.low %v1261_v47, %v1265_v49  ;;  %v1321_v46 = vld [vmem:[#allocation17 + $0x3e8] sm:$0xff] }
 0x313   :  { %v7351_v52 = vcombine.high %v1261_v47, %v1265_v49  ;;  %v8993_v49 = vld [vmem:[#allocation17 + $0x400] sm:$0xff] }
 0x315   :  { %2735 = vmatpush1.bf16.msra.mxu0 %v7292_v54  ;;  %2817 = vmatpush1.bf16.msra.mxu1 %v7294_v55  ;;  %v1272_v54 = vld [vmem:[#allocation17 + $0x260] sm:$0xff]  ;;  %v1269_v55 = vld [vmem:[#allocation17 + $0x248] sm:$0xff] }
 0x316   :  { %2736 = vmatprep.subr.bf16.mxu0 %v7301_v60  ;;  %2818 = vmatprep.subr.bf16.mxu1 %v7303_v0  ;;  %v7357_v56 = vcombine.high %v1268_v53, %v1272_v54  ;;  %v7356_v58 = vcombine.low %v1268_v53, %v1272_v54  ;;  %v7358_v59 = vcombine.low %v1269_v55, %v1273_v57  ;;  %v9001_v53 = vld [vmem:[#allocation17 + $0x428] sm:$0xff] }
 0x317   :  { %v7359_v60 = vcombine.high %v1269_v55, %v1273_v57 }
 0x319   :  { %2737 = vmatpush1.bf16.msra.mxu0 %v7300_v62  ;;  %2819 = vmatpush1.bf16.msra.mxu1 %v7302_v63  ;;  %v1280_v62 = vld [vmem:[#allocation17 + $0x2a0] sm:$0xff]  ;;  %v1277_v63 = vld [vmem:[#allocation17 + $0x288] sm:$0xff] }
 0x31a   :  { %2738 = vmatprep.subr.bf16.mxu0 %v7309_v4  ;;  %2820 = vmatprep.subr.bf16.mxu1 %v7311_v8  ;;  %v7365_v0 = vcombine.high %v1276_v61, %v1280_v62  ;;  %v7364_v2 = vcombine.low %v1276_v61, %v1280_v62  ;;  %v7366_v3 = vcombine.low %v1277_v63, %v1281_v1 }
 0x31b   :  { %v7367_v4 = vcombine.high %v1277_v63, %v1281_v1 }
 0x31d   :  { %2739 = vmatpush1.bf16.msra.mxu0 %v7308_v6  ;;  %2821 = vmatpush1.bf16.msra.mxu1 %v7310_v7  ;;  %v1288_v6 = vld [vmem:[#allocation17 + $0x2e0] sm:$0xff]  ;;  %v1285_v7 = vld [vmem:[#allocation17 + $0x2c8] sm:$0xff] }
 0x31e   :  { %2740 = vmatprep.subr.bf16.mxu0 %v7317_v12  ;;  %2822 = vmatprep.subr.bf16.mxu1 %v7319_v18  ;;  %v7373_v8 = vcombine.high %v1284_v5, %v1288_v6  ;;  %v7372_v10 = vcombine.low %v1284_v5, %v1288_v6  ;;  %v7374_v11 = vcombine.low %v1285_v7, %v1289_v9 }
 0x31f   :  { %v7375_v12 = vcombine.high %v1285_v7, %v1289_v9 }
 0x321   :  { %2741 = vmatpush1.bf16.msra.mxu0 %v7316_v14  ;;  %2823 = vmatpush1.bf16.msra.mxu1 %v7318_v16  ;;  %v1296_v14 = vld [vmem:[#allocation17 + $0x320] sm:$0xff]  ;;  %v1293_v16 = vld [vmem:[#allocation17 + $0x308] sm:$0xff] }
 0x322   :  { %2742 = vmatprep.subr.bf16.mxu0 %v7325_v22  ;;  %2824 = vmatprep.subr.bf16.mxu1 %v7327_v28  ;;  %v7381_v18 = vcombine.high %v1292_v13, %v1296_v14  ;;  %v7380_v20 = vcombine.low %v1292_v13, %v1296_v14  ;;  %v7382_v21 = vcombine.low %v1293_v16, %v1297_v19 }
 0x323   :  { %v7383_v22 = vcombine.high %v1293_v16, %v1297_v19 }
 0x325   :  { %2743 = vmatpush1.bf16.msra.mxu0 %v7324_v26  ;;  %2825 = vmatpush1.bf16.msra.mxu1 %v7326_v27  ;;  %v1304_v26 = vld [vmem:[#allocation17 + $0x360] sm:$0xff]  ;;  %v1301_v27 = vld [vmem:[#allocation17 + $0x348] sm:$0xff] }
 0x326   :  { %2744 = vmatprep.subr.bf16.mxu0 %v7333_v32  ;;  %2826 = vmatprep.subr.bf16.mxu1 %v7335_v36  ;;  %v7389_v28 = vcombine.high %v1300_v25, %v1304_v26  ;;  %v7388_v30 = vcombine.low %v1300_v25, %v1304_v26  ;;  %v7390_v31 = vcombine.low %v1301_v27, %v1305_v29 }
 0x327   :  { %v7391_v32 = vcombine.high %v1301_v27, %v1305_v29 }
 0x329   :  { %2745 = vmatpush1.bf16.msra.mxu0 %v7332_v34  ;;  %2827 = vmatpush1.bf16.msra.mxu1 %v7334_v35  ;;  %v1312_v34 = vld [vmem:[#allocation17 + $0x3a0] sm:$0xff]  ;;  %v1309_v35 = vld [vmem:[#allocation17 + $0x388] sm:$0xff] }
 0x32a   :  { %2746 = vmatprep.subr.bf16.mxu0 %v7341_v40  ;;  %2828 = vmatprep.subr.bf16.mxu1 %v7343_v44  ;;  %v7397_v36 = vcombine.high %v1308_v33, %v1312_v34  ;;  %v7396_v38 = vcombine.low %v1308_v33, %v1312_v34  ;;  %v7398_v39 = vcombine.low %v1309_v35, %v1313_v37 }
 0x32b   :  { %v7399_v40 = vcombine.high %v1309_v35, %v1313_v37 }
 0x32d   :  { %2747 = vmatpush1.bf16.msra.mxu0 %v7340_v42  ;;  %2829 = vmatpush1.bf16.msra.mxu1 %v7342_v43  ;;  %v1320_v42 = vld [vmem:[#allocation17 + $0x3e0] sm:$0xff]  ;;  %v1317_v43 = vld [vmem:[#allocation17 + $0x3c8] sm:$0xff] }
 0x32e   :  { %2748 = vmatprep.subr.bf16.mxu0 %v7349_v48  ;;  %2830 = vmatprep.subr.bf16.mxu1 %v7351_v52  ;;  %v7404_v44 = vcombine.low %v1316_v41, %v1320_v42  ;;  %v7405_v45 = vcombine.high %v1316_v41, %v1320_v42  ;;  %v7406_v47 = vcombine.low %v1317_v43, %v1321_v46 }
 0x32f   :  { %v7407_v48 = vcombine.high %v1317_v43, %v1321_v46 }
 0x331   :  { %2749 = vmatpush1.bf16.msra.mxu0 %v7348_v50  ;;  %2831 = vmatpush1.bf16.msra.mxu1 %v7350_v51  ;;  %v8995_v50 = vld [vmem:[#allocation17 + $0x420] sm:$0xff]  ;;  %v8997_v51 = vld [vmem:[#allocation17 + $0x408] sm:$0xff] }
 0x332   :  { %2750 = vmatprep.subr.bf16.mxu0 %v7357_v56  ;;  %2832 = vmatprep.subr.bf16.mxu1 %v7359_v60  ;;  %v7413_v52 = vcombine.high %v8993_v49, %v8995_v50  ;;  %v7412_v54 = vcombine.low %v8993_v49, %v8995_v50  ;;  %v7414_v55 = vcombine.low %v8997_v51, %v9001_v53 }
 0x333   :  { %v7415_v56 = vcombine.high %v8997_v51, %v9001_v53 }
 0x335   :  { %2751 = vmatpush1.bf16.msra.mxu0 %v7356_v58  ;;  %2833 = vmatpush1.bf16.msra.mxu1 %v7358_v59 }
 0x336   :  { %2752 = vmatprep.subr.bf16.mxu0 %v7365_v0  ;;  %2834 = vmatprep.subr.bf16.mxu1 %v7367_v4 }
 0x339   :  { %2753 = vmatpush1.bf16.msra.mxu0 %v7364_v2  ;;  %2835 = vmatpush1.bf16.msra.mxu1 %v7366_v3 }
 0x33a   :  { %2754 = vmatprep.subr.bf16.mxu0 %v7373_v8  ;;  %2836 = vmatprep.subr.bf16.mxu1 %v7375_v12 }
 0x33d   :  { %2755 = vmatpush1.bf16.msra.mxu0 %v7372_v10  ;;  %2837 = vmatpush1.bf16.msra.mxu1 %v7374_v11 }
 0x33e   :  { %2756 = vmatprep.subr.bf16.mxu0 %v7381_v18  ;;  %2838 = vmatprep.subr.bf16.mxu1 %v7383_v22 }
 0x341   :  { %2757 = vmatpush1.bf16.msra.mxu0 %v7380_v20  ;;  %2839 = vmatpush1.bf16.msra.mxu1 %v7382_v21 }
 0x342   :  { %2758 = vmatprep.subr.bf16.mxu0 %v7389_v28  ;;  %2840 = vmatprep.subr.bf16.mxu1 %v7391_v32 }
 0x345   :  { %2759 = vmatpush1.bf16.msra.mxu0 %v7388_v30  ;;  %2841 = vmatpush1.bf16.msra.mxu1 %v7390_v31 }
 0x346   :  { %2760 = vmatprep.subr.bf16.mxu0 %v7397_v36  ;;  %2842 = vmatprep.subr.bf16.mxu1 %v7399_v40 }
 0x349   :  { %2761 = vmatpush1.bf16.msra.mxu0 %v7396_v38  ;;  %2843 = vmatpush1.bf16.msra.mxu1 %v7398_v39 }
 0x34a   :  { %2762 = vmatprep.subr.bf16.mxu0 %v7405_v45  ;;  %2844 = vmatprep.subr.bf16.mxu1 %v7407_v48 }
 0x34d   :  { %2763 = vmatpush1.bf16.msra.mxu0 %v7404_v44  ;;  %2845 = vmatpush1.bf16.msra.mxu1 %v7406_v47 }
 0x34e   :  { %2773 = vmatprep.subr.bf16.mxu0 %v7413_v52  ;;  %2855 = vmatprep.subr.bf16.mxu1 %v7415_v56 }
 0x3e3   :  { %v982_v57 = vpop.f32.mrb[4].mxu0  ;;  %v1023_v58 = vpop.f32.mrb[4].mxu1 }
 0x3e4   :  { %v1032_v59 = vrot.slane %v982_v57, 4  ;;  %v1044_v60 = vrot.slane %v1023_v58, 4  ;;  %v984_v61 = vpop.f32.mrb[5].mxu0  ;;  %v1025_v62 = vpop.f32.mrb[5].mxu1 }
 0x3e5   :  { %v1038_v63 = vrot.slane %v984_v61, 4  ;;  %v1050_v0 = vrot.slane %v1025_v62, 4  ;;  %v986_v1 = vpop.f32.mrb[6].mxu0  ;;  %v1027_v2 = vpop.f32.mrb[6].mxu1 }
 0x3e6   :  { %v1033_v3 = vadd.f32 %v1032_v59, %v982_v57  ;;  %v1045_v4 = vadd.f32 %v1044_v60, %v1023_v58  ;;  %v987_v5 = vpop.f32.mrb[7].mxu0  ;;  %v1028_v6 = vpop.f32.mrb[7].mxu1 }
 0x3e7   :  { %v1039_v7 = vadd.f32 %v1038_v63, %v984_v61  ;;  %v1051_v8 = vadd.f32 %v1050_v0, %v1025_v62 }
 0x3e8   :  { %v1034_v9 = vrot.slane %v1033_v3, 2  ;;  %v1046_v10 = vrot.slane %v1045_v4, 2 }
 0x3e9   :  { %v1040_v11 = vrot.slane %v1039_v7, 2  ;;  %v1052_v12 = vrot.slane %v1051_v8, 2 }
 0x3ea   :  { %v1035_v13 = vadd.f32 %v1034_v9, %v1033_v3  ;;  %v1047_v14 = vadd.f32 %v1046_v10, %v1045_v4 }
 0x3eb   :  { %v1041_v16 = vadd.f32 %v1040_v11, %v1039_v7  ;;  %v1053_v18 = vadd.f32 %v1052_v12, %v1051_v8 }
 0x3ec   :  { %v1036_v19 = vrot.slane %v1035_v13, 1  ;;  %v1048_v20 = vrot.slane %v1047_v14, 1 }
 0x3ed   :  { %v1042_v21 = vrot.slane %v1041_v16, 1  ;;  %v1054_v22 = vrot.slane %v1053_v18, 1 }
 0x3ee   :  { %v1037_v25 = vadd.f32 %v1036_v19, %v1035_v13  ;;  %v1049_v26 = vadd.f32 %v1048_v20, %v1047_v14 }
 0x3ef   :  { %v1043_v27 = vadd.f32 %v1042_v21, %v1041_v16  ;;  %v1055_v28 = vadd.f32 %v1054_v22, %v1053_v18 }
 0x3f0   :  { %v1056_v29 = vmul.f32 0.125, %v1037_v25  ;;  %v1058_v30 = vmul.f32 0.125, %v1049_v26 }
 0x3f1   :  { %v1057_v31 = vmul.f32 0.125, %v1043_v27  ;;  %v1059_v32 = vmul.f32 0.125, %v1055_v28  ;;  %v1030_v28 = vld [vmem:[#allocation14] sm:$0xf] }
 0x3f2   :  { %v9009_v33 = vsub.f32 %v982_v57, %v1056_v29  ;;  %v9011_v34 = vsub.f32 %v1023_v58, %v1058_v30  ;;  %v1031_v29 = vld [vmem:[#allocation16] sm:$0xf] }
 0x3f3   :  { %v9013_v35 = vsub.f32 %v984_v61, %v1057_v31  ;;  %v9015_v36 = vsub.f32 %v1025_v62, %v1059_v32  ;;  %v9029_v31 = vsub.s32 3, %v8976_v15  ;;  %v9032_v32 = vsub.s32 2, %v8976_v15 }
 0x3f4   :  { %v1064_v37 = vmul.f32 %v9009_v33, %v9009_v33  ;;  %v1066_v38 = vmul.f32 %v9011_v34, %v9011_v34 }
 0x3f5   :  { %v1065_v39 = vmul.f32 %v9013_v35, %v9013_v35  ;;  %v1067_v40 = vmul.f32 %v9015_v36, %v9015_v36 }
 0x3f6   :  { %v1068_v41 = vrot.slane %v1064_v37, 4  ;;  %v1080_v42 = vrot.slane %v1066_v38, 4 }
 0x3f7   :  { %v1074_v43 = vrot.slane %v1065_v39, 4  ;;  %v1086_v44 = vrot.slane %v1067_v40, 4 }
 0x3f8   :  { %v1069_v45 = vadd.f32 %v1068_v41, %v1064_v37  ;;  %v1081_v46 = vadd.f32 %v1080_v42, %v1066_v38  ;;  %v1175_v38 = vrot.slane %v1031_v29, %v9029_v31  ;;  %v1171_v41 = vrot.slane %v1031_v29, %v9032_v32 }
 0x3f9   :  { %v1075_v47 = vadd.f32 %v1074_v43, %v1065_v39  ;;  %v1087_v48 = vadd.f32 %v1086_v44, %v1067_v40  ;;  %v1167_v39 = vrot.slane %v1031_v29, %v8987_v24  ;;  %v1163_v40 = vrot.slane %v1031_v29, %v8984_v23  ;;  %v1364_v29 = vld [vmem:[#allocation17 + $0x540] sm:$0xff] }
 0x3fa   :  { %v1070_v52 = vrot.slane %v1069_v45, 2  ;;  %v1082_v56 = vrot.slane %v1081_v46, 2 }
 0x3fb   :  { %v1076_v57 = vrot.slane %v1075_v47, 2  ;;  %v1088_v58 = vrot.slane %v1087_v48, 2 }
 0x3fc   :  { %v1071_v59 = vadd.f32 %v1070_v52, %v1069_v45  ;;  %v1083_v60 = vadd.f32 %v1082_v56, %v1081_v46 }
 0x3fd   :  { %v1077_v61 = vadd.f32 %v1076_v57, %v1075_v47  ;;  %v1089_v62 = vadd.f32 %v1088_v58, %v1087_v48 }
 0x3fe   :  { %v1072_v63 = vrot.slane %v1071_v59, 1  ;;  %v1084_v0 = vrot.slane %v1083_v60, 1 }
 0x3ff   :  { %v1078_v1 = vrot.slane %v1077_v61, 1  ;;  %v1090_v2 = vrot.slane %v1089_v62, 1 }
 0x400   :  { %v1073_v3 = vadd.f32 %v1072_v63, %v1071_v59  ;;  %v1085_v4 = vadd.f32 %v1084_v0, %v1083_v60 }
 0x401   :  { %v1079_v5 = vadd.f32 %v1078_v1, %v1077_v61  ;;  %v1091_v6 = vadd.f32 %v1090_v2, %v1089_v62  ;;  %v1332_v1 = vld [vmem:[#allocation17 + $0x440] sm:$0xff] }
 0x402   :  { %v1092_v7 = vmul.f32 0.125, %v1073_v3  ;;  %v1094_v8 = vmul.f32 0.125, %v1085_v4  ;;  %v1336_v3 = vld [vmem:[#allocation17 + $0x460] sm:$0xff]  ;;  %v1337_v4 = vld [vmem:[#allocation17 + $0x468] sm:$0xff] }
 0x403   :  { %v1093_v9 = vmul.f32 0.125, %v1079_v5  ;;  %v1095_v10 = vmul.f32 0.125, %v1091_v6  ;;  %v7421_v5 = vcombine.high %v1332_v1, %v1336_v3 }
 0x404   :  { %v1096_v11 = vadd.f32 0.8, %v1092_v7  ;;  %v1098_v12 = vadd.f32 0.8, %v1094_v8  ;;  %v1344_v7 = vld [vmem:[#allocation17 + $0x4a0] sm:$0xff]  ;;  %v1341_v8 = vld [vmem:[#allocation17 + $0x488] sm:$0xff] }
 0x405   :  { %v1097_v13 = vadd.f32 0.8, %v1093_v9  ;;  %v1099_v14 = vadd.f32 0.8, %v1095_v10  ;;  %v1345_v9 = vld [vmem:[#allocation17 + $0x4a8] sm:$0xff] }
 0x406   :  { %8312 = vrsqrt.f32 %v1096_v11  ;;  %v7420_v11 = vcombine.low %v1332_v1, %v1336_v3  ;;  %v7430_v50 = vcombine.low %v1341_v8, %v1345_v9  ;;  %v1392_v3 = vld [vmem:[#allocation17 + $0x620] sm:$0xff] }
 0x407   :  { %8314 = vrsqrt.f32 %v1098_v12 }
 0x408   :  { %8316 = vrsqrt.f32 %v1097_v13 }
 0x409   :  { %8318 = vrsqrt.f32 %v1099_v14  ;;  %v7431_v14 = vcombine.high %v1341_v8, %v1345_v9  ;;  %v1396_v8 = vld [vmem:[#allocation17 + $0x640] sm:$0xff] }
 0x40a   :  { %v1400_v9 = vld [vmem:[#allocation17 + $0x660] sm:$0xff] }
 0x410   :  { %v8313_v16 = vpop.eup %8312 }
 0x411   :  { %v8315_v18 = vpop.eup %8314 }
 0x412   :  { %v8317_v19 = vpop.eup %8316 }
 0x413   :  { %v8319_v20 = vpop.eup %8318  ;;  %v1108_v21 = vcombine.low %v8313_v16, %v8317_v19  ;;  %v1348_v16 = vld [vmem:[#allocation17 + $0x4c0] sm:$0xff]  ;;  %v1349_v19 = vld [vmem:[#allocation17 + $0x4c8] sm:$0xff] }
 0x414   :  { %v1109_v22 = vcombine.low %v8315_v18, %v8319_v20  ;;  %v1352_v18 = vld [vmem:[#allocation17 + $0x4e0] sm:$0xff]  ;;  %v1353_v20 = vld [vmem:[#allocation17 + $0x4e8] sm:$0xff] }
 0x415   :  { %v1116_v25 = vrot.slane %v1108_v21, %v8979_v17  ;;  %v7437_v51 = vcombine.high %v1348_v16, %v1352_v18  ;;  %v7439_v53 = vcombine.high %v1349_v19, %v1353_v20  ;;  %v1357_v21 = vld [vmem:[#allocation17 + $0x508] sm:$0xff] }
 0x416   :  { %v1123_v26 = vrot.slane %v1109_v22, %v8979_v17  ;;  %v1361_v22 = vld [vmem:[#allocation17 + $0x528] sm:$0xff] }
 0x418   :  { %v1124_v27 = vcombine.low %v1116_v25, %v1123_v26  ;;  %v7436_v25 = vcombine.low %v1348_v16, %v1352_v18  ;;  %v7438_v26 = vcombine.low %v1349_v19, %v1353_v20  ;;  %v7485_v16 = vcombine.high %v1396_v8, %v1400_v9  ;;  %v1404_v19 = vld [vmem:[#allocation17 + $0x680] sm:$0xff] }
 0x419   :  { %v1408_v20 = vld [vmem:[#allocation17 + $0x6a0] sm:$0xff] }
 0x41a   :  { %v1131_v30 = vrot.slane %v1124_v27, %v8979_v17 }
 0x41c   :  { %v1133_v37 = vmul.f32 %v1131_v30, %v1030_v28  ;;  %v7447_v28 = vcombine.high %v1357_v21, %v1361_v22  ;;  %v1368_v30 = vld [vmem:[#allocation17 + $0x560] sm:$0xff] }
 0x41e   :  { %v1150_v42 = vrot.slane %v1133_v37, %v9029_v31  ;;  %v1142_v43 = vrot.slane %v1133_v37, %v8987_v24  ;;  %v1138_v44 = vrot.slane %v1133_v37, %v8984_v23  ;;  %v1146_v45 = vrot.slane %v1133_v37, %v9032_v32  ;;  %v1365_v37 = vld [vmem:[#allocation17 + $0x548] sm:$0xff] }
 0x420   :  { %v1158_v46 = vmul.f32 %v1150_v42, %v9015_v36  ;;  %v1156_v47 = vmul.f32 %v1142_v43, %v9013_v35  ;;  %v1155_v48 = vmul.f32 %v1138_v44, %v9009_v33  ;;  %v1157_v52 = vmul.f32 %v1146_v45, %v9011_v34  ;;  %v1333_v36 = vld [vmem:[#allocation17 + $0x448] sm:$0xff]  ;;  %v1340_v34 = vld [vmem:[#allocation17 + $0x480] sm:$0xff] }
 0x421   :  { %v7423_v6 = vcombine.high %v1333_v36, %v1337_v4  ;;  %v7422_v12 = vcombine.low %v1333_v36, %v1337_v4  ;;  %v7429_v13 = vcombine.high %v1340_v34, %v1344_v7  ;;  %v7428_v49 = vcombine.low %v1340_v34, %v1344_v7  ;;  %v1372_v43 = vld [vmem:[#allocation17 + $0x580] sm:$0xff]  ;;  %v1373_v45 = vld [vmem:[#allocation17 + $0x588] sm:$0xff] }
 0x422   :  { %v1183_v56 = vadd.f32 %v1175_v38, %v1158_v46  ;;  %v1181_v57 = vadd.f32 %v1167_v39, %v1156_v47  ;;  %v1180_v58 = vadd.f32 %v1163_v40, %v1155_v48  ;;  %v9046_v59 = vadd.f32 %v1171_v41, %v1157_v52  ;;  %v1369_v38 = vld [vmem:[#allocation17 + $0x568] sm:$0xff]  ;;  %v1376_v44 = vld [vmem:[#allocation17 + $0x5a0] sm:$0xff] }
 0x423   :  { %v7446_v40 = vcombine.low %v1357_v21, %v1361_v22  ;;  %v7453_v41 = vcombine.high %v1364_v29, %v1368_v30  ;;  %v7455_v42 = vcombine.high %v1365_v37, %v1369_v38  ;;  %v1377_v46 = vld [vmem:[#allocation17 + $0x5a8] sm:$0xff]  ;;  %v7452_v47 = vcombine.low %v1364_v29, %v1368_v30  ;;  %v1412_v21 = vld [vmem:[#allocation17 + $0x6c0] sm:$0xff] }
 0x424   :  { %v1187_v60 = vmul.f32 0.2, %v1183_v56  ;;  %v1185_v61 = vmul.f32 0.2, %v1181_v57  ;;  %v1184_v62 = vmul.f32 0.2, %v1180_v58  ;;  %v7454_v48 = vcombine.low %v1365_v37, %v1369_v38 }
 0x425   :  { %v7461_v52 = vcombine.high %v1372_v43, %v1376_v44  ;;  %v1389_v36 = vld [vmem:[#allocation17 + $0x608] sm:$0xff]  ;;  %v1416_v22 = vld [vmem:[#allocation17 + $0x6e0] sm:$0xff] }
 0x426   :  { %v1189_v63 = vmax.f32 %v1181_v57, %v1185_v61  ;;  %v1188_v0 = vmax.f32 %v1180_v58, %v1184_v62  ;;  %v1191_v2 = vmax.f32 %v1183_v56, %v1187_v60  ;;  %v7463_v56 = vcombine.high %v1373_v45, %v1377_v46  ;;  %v1380_v57 = vld [vmem:[#allocation17 + $0x5c0] sm:$0xff]  ;;  %v1381_v60 = vld [vmem:[#allocation17 + $0x5c8] sm:$0xff] }
 0x427   :  { %v1384_v58 = vld [vmem:[#allocation17 + $0x5e0] sm:$0xff]  ;;  %v1385_v61 = vld [vmem:[#allocation17 + $0x5e8] sm:$0xff]  ;;  %v7460_v62 = vcombine.low %v1372_v43, %v1376_v44  ;;  %v7501_v29 = vcombine.high %v1412_v21, %v1416_v22 }
 0x428   :  { %v9048_v35 = vpack.c.bf16 %v1189_v63, %v1189_v63  ;;  %v9050_v33 = vpack.c.bf16 %v1188_v0, %v1188_v0  ;;  %v9056_v10 = vpack.c.bf16 %v1191_v2, %v1191_v2  ;;  %v7462_v63 = vcombine.low %v1373_v45, %v1377_v46  ;;  %v1388_v2 = vld [vmem:[#allocation17 + $0x600] sm:$0xff]  ;;  %v1393_v4 = vld [vmem:[#allocation17 + $0x628] sm:$0xff] }
 0x429   :  { %v7469_v0 = vcombine.high %v1380_v57, %v1384_v58  ;;  %v7471_v1 = vcombine.high %v1381_v60, %v1385_v61  ;;  %v7468_v34 = vcombine.low %v1380_v57, %v1384_v58  ;;  %v7479_v7 = vcombine.high %v1389_v36, %v1393_v4  ;;  %v1420_v37 = vld [vmem:[#allocation17 + $0x700] sm:$0xff] }
 0x42a   :  { %2764 = vmatprep.mubr.bf16.mxu0 %v9048_v35  ;;  %2846 = vmatprep.mubr.bf16.mxu1 %v9048_v35  ;;  %v1424_v38 = vld [vmem:[#allocation17 + $0x720] sm:$0xff] }
 0x42b   :  { %2765 = vmatmul.mubr.bf16.vlgmr.msra.gmra.mrb[8].mxu0 %v9050_v33  ;;  %2847 = vmatmul.mubr.bf16.vlgmr.msra.gmra.mrb[8].mxu1 %v9050_v33  ;;  %v7509_v43 = vcombine.high %v1420_v37, %v1424_v38  ;;  %v1428_v45 = vld [vmem:[#allocation17 + $0x740] sm:$0xff] }
 0x42c   :  { %2774 = vmatpush1.bf16.msra.mxu0 %v7412_v54  ;;  %2856 = vmatpush1.bf16.msra.mxu1 %v7414_v55  ;;  %v1356_v54 = vld [vmem:[#allocation17 + $0x500] sm:$0xff] }
 0x42d   :  { %2805 = vmatprep.mubr.bf16.mxu0 %v9056_v10  ;;  %2887 = vmatprep.mubr.bf16.mxu1 %v9056_v10  ;;  %v1360_v55 = vld [vmem:[#allocation17 + $0x520] sm:$0xff] }
 0x42e   :  { %2775 = vmatprep.subr.bf16.mxu0 %v7421_v5  ;;  %2857 = vmatprep.subr.bf16.mxu1 %v7423_v6  ;;  %v7445_v27 = vcombine.high %v1356_v54, %v1360_v55  ;;  %v7444_v39 = vcombine.low %v1356_v54, %v1360_v55  ;;  %v7470_v5 = vcombine.low %v1381_v60, %v1385_v61  ;;  %v1432_v46 = vld [vmem:[#allocation17 + $0x760] sm:$0xff] }
 0x42f   :  { %v7477_v6 = vcombine.high %v1388_v2, %v1392_v3  ;;  %v7493_v54 = vcombine.high %v1404_v19, %v1408_v20  ;;  %v7517_v57 = vcombine.high %v1428_v45, %v1432_v46  ;;  %v1436_v60 = vld [vmem:[#allocation17 + $0x780] sm:$0xff] }
 0x430   :  { %2776 = vmatpush1.bf16.msra.mxu0 %v7420_v11  ;;  %2858 = vmatpush1.bf16.msra.mxu1 %v7422_v12  ;;  %v1397_v11 = vld [vmem:[#allocation17 + $0x648] sm:$0xff]  ;;  %v1440_v61 = vld [vmem:[#allocation17 + $0x7a0] sm:$0xff] }
 0x431   :  { %2777 = vmatprep.subr.bf16.mxu0 %v7429_v13  ;;  %2859 = vmatprep.subr.bf16.mxu1 %v7431_v14  ;;  %v1401_v12 = vld [vmem:[#allocation17 + $0x668] sm:$0xff]  ;;  %v7476_v13 = vcombine.low %v1388_v2, %v1392_v3  ;;  %v7478_v14 = vcombine.low %v1389_v36, %v1393_v4  ;;  %v7525_v2 = vcombine.high %v1436_v60, %v1440_v61  ;;  %v1444_v36 = vld [vmem:[#allocation17 + $0x7c0] sm:$0xff] }
 0x432   :  { %v7487_v18 = vcombine.high %v1397_v11, %v1401_v12  ;;  %v1448_v4 = vld [vmem:[#allocation17 + $0x7e0] sm:$0xff] }
 0x434   :  { %2778 = vmatpush1.bf16.msra.mxu0 %v7428_v49  ;;  %2860 = vmatpush1.bf16.msra.mxu1 %v7430_v50  ;;  %v1405_v49 = vld [vmem:[#allocation17 + $0x688] sm:$0xff] }
 0x435   :  { %2779 = vmatprep.subr.bf16.mxu0 %v7437_v51  ;;  %2861 = vmatprep.subr.bf16.mxu1 %v7439_v53  ;;  %v1409_v50 = vld [vmem:[#allocation17 + $0x6a8] sm:$0xff]  ;;  %v7484_v51 = vcombine.low %v1396_v8, %v1400_v9  ;;  %v7486_v53 = vcombine.low %v1397_v11, %v1401_v12  ;;  %v7533_v8 = vcombine.high %v1444_v36, %v1448_v4  ;;  %v1186_v11 = vmul.f32 0.2, %v9046_v59  ;;  %v1198_v12 = vld [vmem:[#allocation17 + $0x10] sm:$0xff] }
 0x436   :  { %v7495_v55 = vcombine.high %v1405_v49, %v1409_v50 }
 0x438   :  { %2780 = vmatpush1.bf16.msra.mxu0 %v7436_v25  ;;  %2862 = vmatpush1.bf16.msra.mxu1 %v7438_v26  ;;  %v1413_v25 = vld [vmem:[#allocation17 + $0x6c8] sm:$0xff] }
 0x439   :  { %2781 = vmatprep.subr.bf16.mxu0 %v7445_v27  ;;  %2863 = vmatprep.subr.bf16.mxu1 %v7447_v28  ;;  %v1417_v26 = vld [vmem:[#allocation17 + $0x6e8] sm:$0xff]  ;;  %v7492_v27 = vcombine.low %v1404_v19, %v1408_v20  ;;  %v7494_v28 = vcombine.low %v1405_v49, %v1409_v50  ;;  %v1190_v20 = vmax.f32 %v9046_v59, %v1186_v11  ;;  %v1215_v59 = vld [vmem:[#allocation17 + $0x98] sm:$0xff] }
 0x43a   :  { %v7503_v30 = vcombine.high %v1413_v25, %v1417_v26 }
 0x43c   :  { %2782 = vmatpush1.bf16.msra.mxu0 %v7444_v39  ;;  %2864 = vmatpush1.bf16.msra.mxu1 %v7446_v40  ;;  %v1421_v39 = vld [vmem:[#allocation17 + $0x708] sm:$0xff] }
 0x43d   :  { %2783 = vmatprep.subr.bf16.mxu0 %v7453_v41  ;;  %2865 = vmatprep.subr.bf16.mxu1 %v7455_v42  ;;  %v1425_v40 = vld [vmem:[#allocation17 + $0x728] sm:$0xff]  ;;  %v7500_v41 = vcombine.low %v1412_v21, %v1416_v22  ;;  %v7502_v42 = vcombine.low %v1413_v25, %v1417_v26  ;;  %v9068_v22 = vpack.c.bf16 %v1190_v20, %v1190_v20 }
 0x43e   :  { %v7511_v44 = vcombine.high %v1421_v39, %v1425_v40 }
 0x440   :  { %2784 = vmatpush1.bf16.msra.mxu0 %v7452_v47  ;;  %2866 = vmatpush1.bf16.msra.mxu1 %v7454_v48  ;;  %v1429_v47 = vld [vmem:[#allocation17 + $0x748] sm:$0xff] }
 0x441   :  { %2785 = vmatprep.subr.bf16.mxu0 %v7461_v52  ;;  %2867 = vmatprep.subr.bf16.mxu1 %v7463_v56  ;;  %v1433_v48 = vld [vmem:[#allocation17 + $0x768] sm:$0xff]  ;;  %v7508_v52 = vcombine.low %v1420_v37, %v1424_v38  ;;  %v7510_v56 = vcombine.low %v1421_v39, %v1425_v40 }
 0x442   :  { %v7519_v58 = vcombine.high %v1429_v47, %v1433_v48 }
 0x444   :  { %2786 = vmatpush1.bf16.msra.mxu0 %v7460_v62  ;;  %2868 = vmatpush1.bf16.msra.mxu1 %v7462_v63  ;;  %v1437_v62 = vld [vmem:[#allocation17 + $0x788] sm:$0xff] }
 0x445   :  { %2787 = vmatprep.subr.bf16.mxu0 %v7469_v0  ;;  %2869 = vmatprep.subr.bf16.mxu1 %v7471_v1  ;;  %v1441_v63 = vld [vmem:[#allocation17 + $0x7a8] sm:$0xff]  ;;  %v7516_v0 = vcombine.low %v1428_v45, %v1432_v46  ;;  %v7518_v1 = vcombine.low %v1429_v47, %v1433_v48 }
 0x446   :  { %v7527_v3 = vcombine.high %v1437_v62, %v1441_v63 }
 0x448   :  { %2788 = vmatpush1.bf16.msra.mxu0 %v7468_v34  ;;  %2870 = vmatpush1.bf16.msra.mxu1 %v7470_v5  ;;  %v1445_v34 = vld [vmem:[#allocation17 + $0x7c8] sm:$0xff] }
 0x449   :  { %2789 = vmatprep.subr.bf16.mxu0 %v7477_v6  ;;  %2871 = vmatprep.subr.bf16.mxu1 %v7479_v7  ;;  %v1449_v5 = vld [vmem:[#allocation17 + $0x7e8] sm:$0xff]  ;;  %v7524_v6 = vcombine.low %v1436_v60, %v1440_v61  ;;  %v7526_v7 = vcombine.low %v1437_v62, %v1441_v63  ;;  %v1238_v63 = vld [vmem:[#allocation17 + $0x150] sm:$0xff] }
 0x44a   :  { %v7535_v9 = vcombine.high %v1445_v34, %v1449_v5  ;;  %v7534_v19 = vcombine.low %v1445_v34, %v1449_v5  ;;  %v1246_v5 = vld [vmem:[#allocation17 + $0x190] sm:$0xff] }
 0x44c   :  { %2790 = vmatpush1.bf16.msra.mxu0 %v7476_v13  ;;  %2872 = vmatpush1.bf16.msra.mxu1 %v7478_v14  ;;  %v1202_v13 = vld [vmem:[#allocation17 + $0x30] sm:$0xff]  ;;  %v1199_v14 = vld [vmem:[#allocation17 + $0x18] sm:$0xff] }
 0x44d   :  { %2791 = vmatprep.subr.bf16.mxu0 %v7485_v16  ;;  %2873 = vmatprep.subr.bf16.mxu1 %v7487_v18  ;;  %v1203_v16 = vld [vmem:[#allocation17 + $0x38] sm:$0xff]  ;;  %v7532_v18 = vcombine.low %v1444_v36, %v1448_v4  ;;  %v7289_v49 = vcombine.high %v1198_v12, %v1202_v13  ;;  %v7288_v21 = vcombine.low %v1198_v12, %v1202_v13 }
 0x44e   :  { %v7291_v50 = vcombine.high %v1199_v14, %v1203_v16  ;;  %v7290_v25 = vcombine.low %v1199_v14, %v1203_v16  ;;  %v1254_v14 = vld [vmem:[#allocation17 + $0x1d0] sm:$0xff] }
 0x44f   :  { %v1258_v16 = vld [vmem:[#allocation17 + $0x1f0] sm:$0xff] }
 0x450   :  { %2792 = vmatpush1.bf16.msra.mxu0 %v7484_v51  ;;  %2874 = vmatpush1.bf16.msra.mxu1 %v7486_v53  ;;  %v1206_v51 = vld [vmem:[#allocation17 + $0x50] sm:$0xff] }
 0x451   :  { %2793 = vmatprep.subr.bf16.mxu0 %v7493_v54  ;;  %2875 = vmatprep.subr.bf16.mxu1 %v7495_v55  ;;  %v1210_v53 = vld [vmem:[#allocation17 + $0x70] sm:$0xff]  ;;  %v1207_v54 = vld [vmem:[#allocation17 + $0x58] sm:$0xff] }
 0x452   :  { %v1211_v55 = vld [vmem:[#allocation17 + $0x78] sm:$0xff]  ;;  %v7297_v26 = vcombine.high %v1206_v51, %v1210_v53  ;;  %v7296_v37 = vcombine.low %v1206_v51, %v1210_v53  ;;  %v1262_v53 = vld [vmem:[#allocation17 + $0x210] sm:$0xff] }
 0x453   :  { %v7298_v38 = vcombine.low %v1207_v54, %v1211_v55 }
 0x454   :  { %2794 = vmatpush1.bf16.msra.mxu0 %v7492_v27  ;;  %2876 = vmatpush1.bf16.msra.mxu1 %v7494_v28  ;;  %v7299_v27 = vcombine.high %v1207_v54, %v1211_v55  ;;  %v1214_v28 = vld [vmem:[#allocation17 + $0x90] sm:$0xff]  ;;  %v1263_v55 = vld [vmem:[#allocation17 + $0x218] sm:$0xff] }
 0x455   :  { %2795 = vmatprep.subr.bf16.mxu0 %v7501_v29  ;;  %2877 = vmatprep.subr.bf16.mxu1 %v7503_v30  ;;  %v1218_v29 = vld [vmem:[#allocation17 + $0xb0] sm:$0xff]  ;;  %v1219_v30 = vld [vmem:[#allocation17 + $0xb8] sm:$0xff] }
 0x456   :  { %v7305_v39 = vcombine.high %v1214_v28, %v1218_v29  ;;  %v7307_v40 = vcombine.high %v1215_v59, %v1219_v30  ;;  %v7304_v45 = vcombine.low %v1214_v28, %v1218_v29  ;;  %v7306_v46 = vcombine.low %v1215_v59, %v1219_v30  ;;  %v1266_v54 = vld [vmem:[#allocation17 + $0x230] sm:$0xff]  ;;  %v1271_v30 = vld [vmem:[#allocation17 + $0x258] sm:$0xff] }
 0x457   :  { %v1270_v29 = vld [vmem:[#allocation17 + $0x250] sm:$0xff] }
 0x458   :  { %2796 = vmatpush1.bf16.msra.mxu0 %v7500_v41  ;;  %2878 = vmatpush1.bf16.msra.mxu1 %v7502_v42  ;;  %v1222_v41 = vld [vmem:[#allocation17 + $0xd0] sm:$0xff] }
 0x459   :  { %2797 = vmatprep.subr.bf16.mxu0 %v7509_v43  ;;  %2879 = vmatprep.subr.bf16.mxu1 %v7511_v44  ;;  %v1226_v42 = vld [vmem:[#allocation17 + $0xf0] sm:$0xff]  ;;  %v1223_v43 = vld [vmem:[#allocation17 + $0xd8] sm:$0xff] }
 0x45a   :  { %v1227_v44 = vld [vmem:[#allocation17 + $0xf8] sm:$0xff]  ;;  %v7313_v47 = vcombine.high %v1222_v41, %v1226_v42  ;;  %v1274_v59 = vld [vmem:[#allocation17 + $0x270] sm:$0xff] }
 0x45b   :  { %v7315_v48 = vcombine.high %v1223_v43, %v1227_v44  ;;  %v7314_v60 = vcombine.low %v1223_v43, %v1227_v44  ;;  %v1282_v43 = vld [vmem:[#allocation17 + $0x2b0] sm:$0xff]  ;;  %v1279_v44 = vld [vmem:[#allocation17 + $0x298] sm:$0xff] }
 0x45c   :  { %2798 = vmatpush1.bf16.msra.mxu0 %v7508_v52  ;;  %2880 = vmatpush1.bf16.msra.mxu1 %v7510_v56  ;;  %v1230_v52 = vld [vmem:[#allocation17 + $0x110] sm:$0xff] }
 0x45d   :  { %2799 = vmatprep.subr.bf16.mxu0 %v7517_v57  ;;  %2881 = vmatprep.subr.bf16.mxu1 %v7519_v58  ;;  %v1234_v56 = vld [vmem:[#allocation17 + $0x130] sm:$0xff]  ;;  %v1235_v57 = vld [vmem:[#allocation17 + $0x138] sm:$0xff]  ;;  %v7312_v58 = vcombine.low %v1222_v41, %v1226_v42 }
 0x45e   :  { %v7321_v61 = vcombine.high %v1230_v52, %v1234_v56  ;;  %v1278_v42 = vld [vmem:[#allocation17 + $0x290] sm:$0xff] }
 0x460   :  { %2800 = vmatpush1.bf16.msra.mxu0 %v7516_v0  ;;  %2882 = vmatpush1.bf16.msra.mxu1 %v7518_v1  ;;  %v1242_v0 = vld [vmem:[#allocation17 + $0x170] sm:$0xff]  ;;  %v1239_v1 = vld [vmem:[#allocation17 + $0x158] sm:$0xff] }
 0x461   :  { %2801 = vmatprep.subr.bf16.mxu0 %v7525_v2  ;;  %2883 = vmatprep.subr.bf16.mxu1 %v7527_v3  ;;  %v1243_v2 = vld [vmem:[#allocation17 + $0x178] sm:$0xff]  ;;  %v7320_v3 = vcombine.low %v1230_v52, %v1234_v56  ;;  %v7329_v4 = vcombine.high %v1238_v63, %v1242_v0  ;;  %v1286_v56 = vld [vmem:[#allocation17 + $0x2d0] sm:$0xff] }
 0x462   :  { %v7331_v34 = vcombine.high %v1239_v1, %v1243_v2  ;;  %v7330_v11 = vcombine.low %v1239_v1, %v1243_v2  ;;  %v1298_v1 = vld [vmem:[#allocation17 + $0x330] sm:$0xff]  ;;  %v1295_v2 = vld [vmem:[#allocation17 + $0x318] sm:$0xff] }
 0x464   :  { %2802 = vmatpush1.bf16.msra.mxu0 %v7524_v6  ;;  %2884 = vmatpush1.bf16.msra.mxu1 %v7526_v7  ;;  %v1250_v6 = vld [vmem:[#allocation17 + $0x1b0] sm:$0xff]  ;;  %v1247_v7 = vld [vmem:[#allocation17 + $0x198] sm:$0xff] }
 0x465   :  { %2803 = vmatprep.subr.bf16.mxu0 %v7533_v8  ;;  %2885 = vmatprep.subr.bf16.mxu1 %v7535_v9  ;;  %v1251_v8 = vld [vmem:[#allocation17 + $0x1b8] sm:$0xff]  ;;  %v7328_v9 = vcombine.low %v1238_v63, %v1242_v0  ;;  %v7337_v12 = vcombine.high %v1246_v5, %v1250_v6  ;;  %v7336_v20 = vcombine.low %v1246_v5, %v1250_v6  ;;  %v1294_v0 = vld [vmem:[#allocation17 + $0x310] sm:$0xff] }
 0x466   :  { %v7339_v13 = vcombine.high %v1247_v7, %v1251_v8  ;;  %v1302_v6 = vld [vmem:[#allocation17 + $0x350] sm:$0xff] }
 0x468   :  { %2804 = vmatpush1.bf16.msra.mxu0 %v7532_v18  ;;  %2886 = vmatpush1.bf16.msra.mxu1 %v7534_v19  ;;  %v1255_v18 = vld [vmem:[#allocation17 + $0x1d8] sm:$0xff] }
 0x469   :  { %2896 = vmatprep.subr.bf16.mxu0 %v7289_v49  ;;  %2978 = vmatprep.subr.bf16.mxu1 %v7291_v50  ;;  %v1259_v19 = vld [vmem:[#allocation17 + $0x1f8] sm:$0xff]  ;;  %v7338_v49 = vcombine.low %v1247_v7, %v1251_v8  ;;  %v7345_v50 = vcombine.high %v1254_v14, %v1258_v16  ;;  %v1306_v7 = vld [vmem:[#allocation17 + $0x370] sm:$0xff] }
 0x46a   :  { %v7347_v51 = vcombine.high %v1255_v18, %v1259_v19  ;;  %v1303_v8 = vld [vmem:[#allocation17 + $0x358] sm:$0xff] }
 0x46b   :  { %2806 = vmatmul.mubr.bf16.vlgmr.msra.gmra.mrb[8].mxu0 %v9068_v22  ;;  %2888 = vmatmul.mubr.bf16.vlgmr.msra.gmra.mrb[8].mxu1 %v9068_v22 }
 0x46c   :  { %2897 = vmatpush1.bf16.msra.mxu0 %v7288_v21  ;;  %2928 = vmatprep.mubr.bf16.mxu0 %v9048_v35  ;;  %v1267_v21 = vld [vmem:[#allocation17 + $0x238] sm:$0xff] }
 0x46d   :  { %2979 = vmatpush1.bf16.msra.mxu1 %v7290_v25  ;;  %3010 = vmatprep.mubr.bf16.mxu1 %v9048_v35  ;;  %v1231_v35 = vld [vmem:[#allocation17 + $0x118] sm:$0xff]  ;;  %v7344_v25 = vcombine.low %v1254_v14, %v1258_v16  ;;  %v7355_v28 = vcombine.high %v1263_v55, %v1267_v21  ;;  %v1310_v16 = vld [vmem:[#allocation17 + $0x390] sm:$0xff] }
 0x46e   :  { %2898 = vmatprep.subr.bf16.mxu0 %v7297_v26  ;;  %2980 = vmatprep.subr.bf16.mxu1 %v7299_v27  ;;  %v7323_v62 = vcombine.high %v1231_v35, %v1235_v57  ;;  %v7322_v36 = vcombine.low %v1231_v35, %v1235_v57  ;;  %v7346_v26 = vcombine.low %v1255_v18, %v1259_v19  ;;  %v1290_v35 = vld [vmem:[#allocation17 + $0x2f0] sm:$0xff]  ;;  %v1287_v57 = vld [vmem:[#allocation17 + $0x2d8] sm:$0xff] }
 0x46f   :  { %v7353_v27 = vcombine.high %v1262_v53, %v1266_v54  ;;  %v1314_v18 = vld [vmem:[#allocation17 + $0x3b0] sm:$0xff]  ;;  %v1311_v19 = vld [vmem:[#allocation17 + $0x398] sm:$0xff] }
 0x470   :  { %2899 = vmatpush1.bf16.msra.mxu0 %v7296_v37  ;;  %v1275_v37 = vld [vmem:[#allocation17 + $0x278] sm:$0xff] }
 0x471   :  { %2981 = vmatpush1.bf16.msra.mxu1 %v7298_v38  ;;  %2900 = vmatprep.subr.bf16.mxu0 %v7305_v39  ;;  %v7352_v38 = vcombine.low %v1262_v53, %v1266_v54  ;;  %v7354_v39 = vcombine.low %v1263_v55, %v1267_v21  ;;  %v7363_v41 = vcombine.high %v1271_v30, %v1275_v37  ;;  %v1318_v54 = vld [vmem:[#allocation17 + $0x3d0] sm:$0xff]  ;;  %v1319_v21 = vld [vmem:[#allocation17 + $0x3d8] sm:$0xff] }
 0x472   :  { %2982 = vmatprep.subr.bf16.mxu1 %v7307_v40  ;;  %v7361_v40 = vcombine.high %v1270_v29, %v1274_v59  ;;  %v1322_v55 = vld [vmem:[#allocation17 + $0x3f0] sm:$0xff] }
 0x474   :  { %2901 = vmatpush1.bf16.msra.mxu0 %v7304_v45  ;;  %v1283_v45 = vld [vmem:[#allocation17 + $0x2b8] sm:$0xff] }
 0x475   :  { %2983 = vmatpush1.bf16.msra.mxu1 %v7306_v46  ;;  %2902 = vmatprep.subr.bf16.mxu0 %v7313_v47  ;;  %v7360_v46 = vcombine.low %v1270_v29, %v1274_v59  ;;  %v7362_v47 = vcombine.low %v1271_v30, %v1275_v37  ;;  %v7371_v52 = vcombine.high %v1279_v44, %v1283_v45  ;;  %v1326_v59 = vld [vmem:[#allocation17 + $0x410] sm:$0xff]  ;;  %v1327_v37 = vld [vmem:[#allocation17 + $0x418] sm:$0xff] }
 0x476   :  { %2984 = vmatprep.subr.bf16.mxu1 %v7315_v48  ;;  %v7369_v48 = vcombine.high %v1278_v42, %v1282_v43  ;;  %v1330_v30 = vld [vmem:[#allocation17 + $0x430] sm:$0xff] }
 0x478   :  { %2903 = vmatpush1.bf16.msra.mxu0 %v7312_v58  ;;  %v1291_v58 = vld [vmem:[#allocation17 + $0x2f8] sm:$0xff] }
 0x479   :  { %2985 = vmatpush1.bf16.msra.mxu1 %v7314_v60  ;;  %2904 = vmatprep.subr.bf16.mxu0 %v7321_v61  ;;  %v7368_v60 = vcombine.low %v1278_v42, %v1282_v43  ;;  %v7370_v61 = vcombine.low %v1279_v44, %v1283_v45  ;;  %v7379_v63 = vcombine.high %v1287_v57, %v1291_v58  ;;  %v1334_v43 = vld [vmem:[#allocation17 + $0x450] sm:$0xff] }
 0x47a   :  { %2986 = vmatprep.subr.bf16.mxu1 %v7323_v62  ;;  %v7377_v62 = vcombine.high %v1286_v56, %v1290_v35  ;;  %v1338_v44 = vld [vmem:[#allocation17 + $0x470] sm:$0xff]  ;;  %v7416_v45 = vcombine.low %v1326_v59, %v1330_v30 }
 0x47c   :  { %2905 = vmatpush1.bf16.msra.mxu0 %v7320_v3  ;;  %v1299_v3 = vld [vmem:[#allocation17 + $0x338] sm:$0xff] }
 0x47d   :  { %2987 = vmatpush1.bf16.msra.mxu1 %v7322_v36  ;;  %2906 = vmatprep.subr.bf16.mxu0 %v7329_v4  ;;  %v7376_v36 = vcombine.low %v1286_v56, %v1290_v35  ;;  %v7378_v4 = vcombine.low %v1287_v57, %v1291_v58  ;;  %v7387_v5 = vcombine.high %v1295_v2, %v1299_v3  ;;  %v1342_v56 = vld [vmem:[#allocation17 + $0x490] sm:$0xff]  ;;  %v1343_v58 = vld [vmem:[#allocation17 + $0x498] sm:$0xff] }
 0x47e   :  { %2988 = vmatprep.subr.bf16.mxu1 %v7331_v34  ;;  %v7385_v34 = vcombine.high %v1294_v0, %v1298_v1  ;;  %v1346_v35 = vld [vmem:[#allocation17 + $0x4b0] sm:$0xff] }
 0x480   :  { %2907 = vmatpush1.bf16.msra.mxu0 %v7328_v9  ;;  %v1307_v9 = vld [vmem:[#allocation17 + $0x378] sm:$0xff] }
 0x481   :  { %2989 = vmatpush1.bf16.msra.mxu1 %v7330_v11  ;;  %2908 = vmatprep.subr.bf16.mxu0 %v7337_v12  ;;  %v7384_v11 = vcombine.low %v1294_v0, %v1298_v1  ;;  %v7386_v12 = vcombine.low %v1295_v2, %v1299_v3  ;;  %v7395_v14 = vcombine.high %v1303_v8, %v1307_v9  ;;  %v1350_v1 = vld [vmem:[#allocation17 + $0x4d0] sm:$0xff]  ;;  %v1351_v3 = vld [vmem:[#allocation17 + $0x4d8] sm:$0xff] }
 0x482   :  { %2990 = vmatprep.subr.bf16.mxu1 %v7339_v13  ;;  %v7393_v13 = vcombine.high %v1302_v6, %v1306_v7  ;;  %v1354_v2 = vld [vmem:[#allocation17 + $0x4f0] sm:$0xff] }
 0x484   :  { %2909 = vmatpush1.bf16.msra.mxu0 %v7336_v20  ;;  %v1315_v20 = vld [vmem:[#allocation17 + $0x3b8] sm:$0xff] }
 0x485   :  { %2991 = vmatpush1.bf16.msra.mxu1 %v7338_v49  ;;  %2910 = vmatprep.subr.bf16.mxu0 %v7345_v50  ;;  %v7392_v49 = vcombine.low %v1302_v6, %v1306_v7  ;;  %v7394_v50 = vcombine.low %v1303_v8, %v1307_v9  ;;  %v7403_v53 = vcombine.high %v1311_v19, %v1315_v20  ;;  %v1358_v6 = vld [vmem:[#allocation17 + $0x510] sm:$0xff]  ;;  %v1359_v8 = vld [vmem:[#allocation17 + $0x518] sm:$0xff] }
 0x486   :  { %2992 = vmatprep.subr.bf16.mxu1 %v7347_v51  ;;  %v7401_v51 = vcombine.high %v1310_v16, %v1314_v18  ;;  %v1362_v7 = vld [vmem:[#allocation17 + $0x530] sm:$0xff]  ;;  %v1363_v9 = vld [vmem:[#allocation17 + $0x538] sm:$0xff] }
 0x488   :  { %2911 = vmatpush1.bf16.msra.mxu0 %v7344_v25  ;;  %v1323_v25 = vld [vmem:[#allocation17 + $0x3f8] sm:$0xff] }
 0x489   :  { %2993 = vmatpush1.bf16.msra.mxu1 %v7346_v26  ;;  %2912 = vmatprep.subr.bf16.mxu0 %v7353_v27  ;;  %v7400_v26 = vcombine.low %v1310_v16, %v1314_v18  ;;  %v7402_v27 = vcombine.low %v1311_v19, %v1315_v20  ;;  %v7411_v29 = vcombine.high %v1319_v21, %v1323_v25  ;;  %v1370_v16 = vld [vmem:[#allocation17 + $0x570] sm:$0xff]  ;;  %v1367_v18 = vld [vmem:[#allocation17 + $0x558] sm:$0xff] }
 0x48a   :  { %2994 = vmatprep.subr.bf16.mxu1 %v7355_v28  ;;  %v7409_v28 = vcombine.high %v1318_v54, %v1322_v55  ;;  %v1371_v19 = vld [vmem:[#allocation17 + $0x578] sm:$0xff]  ;;  %v7448_v20 = vcombine.low %v1358_v6, %v1362_v7 }
 0x48c   :  { %2913 = vmatpush1.bf16.msra.mxu0 %v7352_v38  ;;  %v1331_v38 = vld [vmem:[#allocation17 + $0x438] sm:$0xff] }
 0x48d   :  { %2995 = vmatpush1.bf16.msra.mxu1 %v7354_v39  ;;  %2914 = vmatprep.subr.bf16.mxu0 %v7361_v40  ;;  %v7408_v39 = vcombine.low %v1318_v54, %v1322_v55  ;;  %v7410_v40 = vcombine.low %v1319_v21, %v1323_v25  ;;  %v7419_v42 = vcombine.high %v1327_v37, %v1331_v38  ;;  %v1378_v54 = vld [vmem:[#allocation17 + $0x5b0] sm:$0xff]  ;;  %v1375_v55 = vld [vmem:[#allocation17 + $0x598] sm:$0xff] }
 0x48e   :  { %2996 = vmatprep.subr.bf16.mxu1 %v7363_v41  ;;  %v7417_v41 = vcombine.high %v1326_v59, %v1330_v30  ;;  %v1379_v21 = vld [vmem:[#allocation17 + $0x5b8] sm:$0xff]  ;;  %v1386_v59 = vld [vmem:[#allocation17 + $0x5f0] sm:$0xff] }
 0x48f   :  { %v1383_v30 = vld [vmem:[#allocation17 + $0x5d8] sm:$0xff] }
 0x490   :  { %2915 = vmatpush1.bf16.msra.mxu0 %v7360_v46  ;;  %v1335_v46 = vld [vmem:[#allocation17 + $0x458] sm:$0xff] }
 0x491   :  { %2997 = vmatpush1.bf16.msra.mxu1 %v7362_v47  ;;  %2916 = vmatprep.subr.bf16.mxu0 %v7369_v48  ;;  %v1339_v47 = vld [vmem:[#allocation17 + $0x478] sm:$0xff]  ;;  %v7418_v48 = vcombine.low %v1327_v37, %v1331_v38 }
 0x492   :  { %2998 = vmatprep.subr.bf16.mxu1 %v7371_v52  ;;  %v7425_v52 = vcombine.high %v1334_v43, %v1338_v44  ;;  %v7427_v57 = vcombine.high %v1335_v46, %v1339_v47  ;;  %v1387_v37 = vld [vmem:[#allocation17 + $0x5f8] sm:$0xff] }
 0x494   :  { %2917 = vmatpush1.bf16.msra.mxu0 %v7368_v60  ;;  %v1347_v60 = vld [vmem:[#allocation17 + $0x4b8] sm:$0xff] }
 0x495   :  { %2999 = vmatpush1.bf16.msra.mxu1 %v7370_v61  ;;  %2918 = vmatprep.subr.bf16.mxu0 %v7377_v62  ;;  %v7424_v61 = vcombine.low %v1334_v43, %v1338_v44  ;;  %v7426_v62 = vcombine.low %v1335_v46, %v1339_v47  ;;  %v7435_v0 = vcombine.high %v1343_v58, %v1347_v60  ;;  %v1394_v43 = vld [vmem:[#allocation17 + $0x630] sm:$0xff]  ;;  %v1391_v44 = vld [vmem:[#allocation17 + $0x618] sm:$0xff] }
 0x496   :  { %3000 = vmatprep.subr.bf16.mxu1 %v7379_v63  ;;  %v7433_v63 = vcombine.high %v1342_v56, %v1346_v35  ;;  %v7474_v47 = vcombine.low %v1383_v30, %v1387_v37 }
 0x498   :  { %2919 = vmatpush1.bf16.msra.mxu0 %v7376_v36  ;;  %v1355_v36 = vld [vmem:[#allocation17 + $0x4f8] sm:$0xff] }
 0x499   :  { %3001 = vmatpush1.bf16.msra.mxu1 %v7378_v4  ;;  %2920 = vmatprep.subr.bf16.mxu0 %v7385_v34  ;;  %v7432_v4 = vcombine.low %v1342_v56, %v1346_v35  ;;  %v7441_v34 = vcombine.high %v1350_v1, %v1354_v2  ;;  %v1398_v56 = vld [vmem:[#allocation17 + $0x650] sm:$0xff] }
 0x49a   :  { %3002 = vmatprep.subr.bf16.mxu1 %v7387_v5  ;;  %v7443_v5 = vcombine.high %v1351_v3, %v1355_v36  ;;  %v1402_v35 = vld [vmem:[#allocation17 + $0x670] sm:$0xff] }
 0x49c   :  { %2921 = vmatpush1.bf16.msra.mxu0 %v7384_v11  ;;  %v7442_v11 = vcombine.low %v1351_v3, %v1355_v36  ;;  %v1411_v3 = vld [vmem:[#allocation17 + $0x6b8] sm:$0xff]  ;;  %v7488_v36 = vcombine.low %v1398_v56, %v1402_v35 }
 0x49d   :  { %3003 = vmatpush1.bf16.msra.mxu1 %v7386_v12  ;;  %2922 = vmatprep.subr.bf16.mxu0 %v7393_v13  ;;  %v7449_v12 = vcombine.high %v1358_v6, %v1362_v7  ;;  %v7451_v13 = vcombine.high %v1359_v8, %v1363_v9  ;;  %v1418_v6 = vld [vmem:[#allocation17 + $0x6f0] sm:$0xff]  ;;  %v1415_v7 = vld [vmem:[#allocation17 + $0x6d8] sm:$0xff] }
 0x49e   :  { %3004 = vmatprep.subr.bf16.mxu1 %v7395_v14  ;;  %v1366_v14 = vld [vmem:[#allocation17 + $0x550] sm:$0xff] }
 0x49f   :  { %v7456_v25 = vcombine.low %v1366_v14, %v1370_v16 }
 0x4a0   :  { %2923 = vmatpush1.bf16.msra.mxu0 %v7392_v49  ;;  %v7450_v49 = vcombine.low %v1359_v8, %v1363_v9  ;;  %v1419_v8 = vld [vmem:[#allocation17 + $0x6f8] sm:$0xff] }
 0x4a1   :  { %3005 = vmatpush1.bf16.msra.mxu1 %v7394_v50  ;;  %2924 = vmatprep.subr.bf16.mxu0 %v7401_v51  ;;  %v7457_v50 = vcombine.high %v1366_v14, %v1370_v16  ;;  %v7459_v51 = vcombine.high %v1367_v18, %v1371_v19  ;;  %v1426_v14 = vld [vmem:[#allocation17 + $0x730] sm:$0xff]  ;;  %v1423_v16 = vld [vmem:[#allocation17 + $0x718] sm:$0xff] }
 0x4a2   :  { %3006 = vmatprep.subr.bf16.mxu1 %v7403_v53  ;;  %v1374_v53 = vld [vmem:[#allocation17 + $0x590] sm:$0xff] }
 0x4a3   :  { %v7464_v38 = vcombine.low %v1374_v53, %v1378_v54 }
 0x4a4   :  { %2925 = vmatpush1.bf16.msra.mxu0 %v7400_v26  ;;  %v7458_v26 = vcombine.low %v1367_v18, %v1371_v19  ;;  %v1427_v18 = vld [vmem:[#allocation17 + $0x738] sm:$0xff] }
 0x4a5   :  { %3007 = vmatpush1.bf16.msra.mxu1 %v7402_v27  ;;  %2926 = vmatprep.subr.bf16.mxu0 %v7409_v28  ;;  %v7465_v27 = vcombine.high %v1374_v53, %v1378_v54  ;;  %v7467_v28 = vcombine.high %v1375_v55, %v1379_v21  ;;  %v1434_v53 = vld [vmem:[#allocation17 + $0x770] sm:$0xff]  ;;  %v1431_v54 = vld [vmem:[#allocation17 + $0x758] sm:$0xff] }
 0x4a6   :  { %3008 = vmatprep.subr.bf16.mxu1 %v7411_v29  ;;  %v1382_v29 = vld [vmem:[#allocation17 + $0x5d0] sm:$0xff] }
 0x4a7   :  { %v7472_v46 = vcombine.low %v1382_v29, %v1386_v59 }
 0x4a8   :  { %2927 = vmatpush1.bf16.msra.mxu0 %v7408_v39  ;;  %v7466_v39 = vcombine.low %v1375_v55, %v1379_v21  ;;  %v1435_v55 = vld [vmem:[#allocation17 + $0x778] sm:$0xff] }
 0x4a9   :  { %3009 = vmatpush1.bf16.msra.mxu1 %v7410_v40  ;;  %2937 = vmatprep.subr.bf16.mxu0 %v7417_v41  ;;  %v7473_v40 = vcombine.high %v1382_v29, %v1386_v59  ;;  %v7475_v41 = vcombine.high %v1383_v30, %v1387_v37  ;;  %v1442_v29 = vld [vmem:[#allocation17 + $0x7b0] sm:$0xff]  ;;  %v1439_v59 = vld [vmem:[#allocation17 + $0x798] sm:$0xff] }
 0x4aa   :  { %3019 = vmatprep.subr.bf16.mxu1 %v7419_v42  ;;  %v1390_v42 = vld [vmem:[#allocation17 + $0x610] sm:$0xff]  ;;  %v1443_v30 = vld [vmem:[#allocation17 + $0x7b8] sm:$0xff] }
 0x4ab   :  { %2929 = vmatmul.mubr.bf16.vlgmr.msra.gmra.mrb[12].mxu0 %v9050_v33 }
 0x4ac   :  { %3011 = vmatmul.mubr.bf16.vlgmr.msra.gmra.mrb[12].mxu1 %v9050_v33  ;;  %2938 = vmatpush1.bf16.msra.mxu0 %v7416_v45  ;;  %v7434_v33 = vcombine.low %v1343_v58, %v1347_v60  ;;  %v1395_v45 = vld [vmem:[#allocation17 + $0x638] sm:$0xff]  ;;  %v7480_v60 = vcombine.low %v1390_v42, %v1394_v43 }
 0x4ad   :  { %2969 = vmatprep.mubr.bf16.mxu0 %v9056_v10  ;;  %3020 = vmatpush1.bf16.msra.mxu1 %v7418_v48  ;;  %v7481_v48 = vcombine.high %v1390_v42, %v1394_v43  ;;  %v1403_v58 = vld [vmem:[#allocation17 + $0x678] sm:$0xff]  ;;  %v1450_v42 = vld [vmem:[#allocation17 + $0x7f0] sm:$0xff] }
 0x4ae   :  { %3051 = vmatprep.mubr.bf16.mxu1 %v9056_v10  ;;  %2939 = vmatprep.subr.bf16.mxu0 %v7425_v52  ;;  %v7440_v10 = vcombine.low %v1350_v1, %v1354_v2  ;;  %v7483_v52 = vcombine.high %v1391_v44, %v1395_v45  ;;  %v1410_v1 = vld [vmem:[#allocation17 + $0x6b0] sm:$0xff]  ;;  %v1407_v2 = vld [vmem:[#allocation17 + $0x698] sm:$0xff] }
 0x4af   :  { %3021 = vmatprep.subr.bf16.mxu1 %v7427_v57  ;;  %v1399_v57 = vld [vmem:[#allocation17 + $0x658] sm:$0xff] }
 0x4b0   :  { %2940 = vmatpush1.bf16.msra.mxu0 %v7424_v61  ;;  %v7482_v61 = vcombine.low %v1391_v44, %v1395_v45  ;;  %v1447_v43 = vld [vmem:[#allocation17 + $0x7d8] sm:$0xff] }
 0x4b1   :  { %3022 = vmatpush1.bf16.msra.mxu1 %v7426_v62  ;;  %2941 = vmatprep.subr.bf16.mxu0 %v7433_v63  ;;  %v7489_v62 = vcombine.high %v1398_v56, %v1402_v35  ;;  %v7491_v63 = vcombine.high %v1399_v57, %v1403_v58  ;;  %v1451_v44 = vld [vmem:[#allocation17 + $0x7f8] sm:$0xff] }
 0x4b2   :  { %3023 = vmatprep.subr.bf16.mxu1 %v7435_v0  ;;  %v1406_v0 = vld [vmem:[#allocation17 + $0x690] sm:$0xff]  ;;  %v7538_v56 = vcombine.low %v1447_v43, %v1451_v44 }
 0x4b3   :  { %v7496_v9 = vcombine.low %v1406_v0, %v1410_v1 }
 0x4b4   :  { %2942 = vmatpush1.bf16.msra.mxu0 %v7432_v4  ;;  %v7490_v4 = vcombine.low %v1399_v57, %v1403_v58 }
 0x4b5   :  { %3024 = vmatpush1.bf16.msra.mxu1 %v7434_v33  ;;  %2943 = vmatprep.subr.bf16.mxu0 %v7441_v34  ;;  %v7497_v33 = vcombine.high %v1406_v0, %v1410_v1  ;;  %v7499_v34 = vcombine.high %v1407_v2, %v1411_v3 }
 0x4b6   :  { %3025 = vmatprep.subr.bf16.mxu1 %v7443_v5  ;;  %v1414_v5 = vld [vmem:[#allocation17 + $0x6d0] sm:$0xff] }
 0x4b7   :  { %v7504_v19 = vcombine.low %v1414_v5, %v1418_v6 }
 0x4b8   :  { %2944 = vmatpush1.bf16.msra.mxu0 %v7440_v10  ;;  %v7498_v10 = vcombine.low %v1407_v2, %v1411_v3 }
 0x4b9   :  { %3026 = vmatpush1.bf16.msra.mxu1 %v7442_v11  ;;  %2945 = vmatprep.subr.bf16.mxu0 %v7449_v12  ;;  %v7505_v11 = vcombine.high %v1414_v5, %v1418_v6  ;;  %v7507_v12 = vcombine.high %v1415_v7, %v1419_v8 }
 0x4ba   :  { %3027 = vmatprep.subr.bf16.mxu1 %v7451_v13  ;;  %v1422_v13 = vld [vmem:[#allocation17 + $0x710] sm:$0xff] }
 0x4bb   :  { %v7512_v21 = vcombine.low %v1422_v13, %v1426_v14 }
 0x4bc   :  { %2946 = vmatpush1.bf16.msra.mxu0 %v7448_v20  ;;  %v7506_v20 = vcombine.low %v1415_v7, %v1419_v8 }
 0x4bd   :  { %3028 = vmatpush1.bf16.msra.mxu1 %v7450_v49  ;;  %2947 = vmatprep.subr.bf16.mxu0 %v7457_v50  ;;  %v7513_v49 = vcombine.high %v1422_v13, %v1426_v14  ;;  %v7515_v50 = vcombine.high %v1423_v16, %v1427_v18 }
 0x4be   :  { %3029 = vmatprep.subr.bf16.mxu1 %v7459_v51  ;;  %v1430_v51 = vld [vmem:[#allocation17 + $0x750] sm:$0xff] }
 0x4bf   :  { %v7520_v37 = vcombine.low %v1430_v51, %v1434_v53 }
 0x4c0   :  { %2948 = vmatpush1.bf16.msra.mxu0 %v7456_v25  ;;  %v7514_v25 = vcombine.low %v1423_v16, %v1427_v18  ;;  %v3392_v16 = vld [vmem:[#allocation22 + $0x28] sm:$0xff] }
 0x4c1   :  { %3030 = vmatpush1.bf16.msra.mxu1 %v7458_v26  ;;  %2949 = vmatprep.subr.bf16.mxu0 %v7465_v27  ;;  %v7521_v26 = vcombine.high %v1430_v51, %v1434_v53  ;;  %v7523_v27 = vcombine.high %v1431_v54, %v1435_v55 }
 0x4c2   :  { %3031 = vmatprep.subr.bf16.mxu1 %v7467_v28  ;;  %v1438_v28 = vld [vmem:[#allocation17 + $0x790] sm:$0xff] }
 0x4c3   :  { %v7528_v45 = vcombine.low %v1438_v28, %v1442_v29 }
 0x4c4   :  { %2950 = vmatpush1.bf16.msra.mxu0 %v7464_v38  ;;  %v7522_v38 = vcombine.low %v1431_v54, %v1435_v55 }
 0x4c5   :  { %3032 = vmatpush1.bf16.msra.mxu1 %v7466_v39  ;;  %2951 = vmatprep.subr.bf16.mxu0 %v7473_v40  ;;  %v7529_v39 = vcombine.high %v1438_v28, %v1442_v29  ;;  %v7531_v40 = vcombine.high %v1439_v59, %v1443_v30 }
 0x4c6   :  { %3033 = vmatprep.subr.bf16.mxu1 %v7475_v41  ;;  %v1446_v41 = vld [vmem:[#allocation17 + $0x7d0] sm:$0xff] }
 0x4c8   :  { %2952 = vmatpush1.bf16.msra.mxu0 %v7472_v46  ;;  %v7530_v46 = vcombine.low %v1439_v59, %v1443_v30  ;;  %v3400_v59 = vld [vmem:[#allocation22 + $0x68] sm:$0xff] }
 0x4c9   :  { %3034 = vmatpush1.bf16.msra.mxu1 %v7474_v47  ;;  %2953 = vmatprep.subr.bf16.mxu0 %v7481_v48  ;;  %v7537_v47 = vcombine.high %v1446_v41, %v1450_v42  ;;  %v7539_v48 = vcombine.high %v1447_v43, %v1451_v44 }
 0x4ca   :  { %3035 = vmatprep.subr.bf16.mxu1 %v7483_v52  ;;  %v7536_v52 = vcombine.low %v1446_v41, %v1450_v42 }
 0x4cc   :  { %2954 = vmatpush1.bf16.msra.mxu0 %v7480_v60 }
 0x4cd   :  { %3036 = vmatpush1.bf16.msra.mxu1 %v7482_v61  ;;  %2955 = vmatprep.subr.bf16.mxu0 %v7489_v62 }
 0x4ce   :  { %3037 = vmatprep.subr.bf16.mxu1 %v7491_v63 }
 0x4d0   :  { %2956 = vmatpush1.bf16.msra.mxu0 %v7488_v36 }
 0x4d1   :  { %3038 = vmatpush1.bf16.msra.mxu1 %v7490_v4  ;;  %2957 = vmatprep.subr.bf16.mxu0 %v7497_v33 }
 0x4d2   :  { %3039 = vmatprep.subr.bf16.mxu1 %v7499_v34 }
 0x4d4   :  { %2958 = vmatpush1.bf16.msra.mxu0 %v7496_v9  ;;  %v3387_v9 = vld [vmem:[#allocation22] sm:$0xff] }
 0x4d5   :  { %3040 = vmatpush1.bf16.msra.mxu1 %v7498_v10  ;;  %2959 = vmatprep.subr.bf16.mxu0 %v7505_v11  ;;  %v3391_v10 = vld [vmem:[#allocation22 + $0x20] sm:$0xff]  ;;  %v3388_v11 = vld [vmem:[#allocation22 + $0x8] sm:$0xff] }
 0x4d6   :  { %3041 = vmatprep.subr.bf16.mxu1 %v7507_v12  ;;  %v7541_v14 = vcombine.high %v3387_v9, %v3391_v10  ;;  %v7543_v53 = vcombine.high %v3388_v11, %v3392_v16 }
 0x4d8   :  { %2960 = vmatpush1.bf16.msra.mxu0 %v7504_v19 }
 0x4d9   :  { %3042 = vmatpush1.bf16.msra.mxu1 %v7506_v20  ;;  %2961 = vmatprep.subr.bf16.mxu0 %v7513_v49  ;;  %v7540_v20 = vcombine.low %v3387_v9, %v3391_v10  ;;  %v7542_v49 = vcombine.low %v3388_v11, %v3392_v16  ;;  %v3419_v16 = vld [vmem:[#allocation22 + $0x100] sm:$0xff] }
 0x4da   :  { %3043 = vmatprep.subr.bf16.mxu1 %v7515_v50 }
 0x4dc   :  { %2962 = vmatpush1.bf16.msra.mxu0 %v7512_v21  ;;  %v3395_v21 = vld [vmem:[#allocation22 + $0x40] sm:$0xff] }
 0x4dd   :  { %3044 = vmatpush1.bf16.msra.mxu1 %v7514_v25  ;;  %2963 = vmatprep.subr.bf16.mxu0 %v7521_v26  ;;  %v3399_v25 = vld [vmem:[#allocation22 + $0x60] sm:$0xff]  ;;  %v3396_v26 = vld [vmem:[#allocation22 + $0x48] sm:$0xff] }
 0x4de   :  { %3045 = vmatprep.subr.bf16.mxu1 %v7523_v27  ;;  %v7549_v29 = vcombine.high %v3395_v21, %v3399_v25  ;;  %v7551_v42 = vcombine.high %v3396_v26, %v3400_v59 }
 0x4e0   :  { %2964 = vmatpush1.bf16.msra.mxu0 %v7520_v37 }
 0x4e1   :  { %3046 = vmatpush1.bf16.msra.mxu1 %v7522_v38  ;;  %2965 = vmatprep.subr.bf16.mxu0 %v7529_v39  ;;  %v7548_v38 = vcombine.low %v3395_v21, %v3399_v25  ;;  %v7550_v39 = vcombine.low %v3396_v26, %v3400_v59  ;;  %v3427_v59 = vld [vmem:[#allocation22 + $0x140] sm:$0xff] }
 0x4e2   :  { %3047 = vmatprep.subr.bf16.mxu1 %v7531_v40 }
 0x4e4   :  { %2966 = vmatpush1.bf16.msra.mxu0 %v7528_v45  ;;  %v3403_v45 = vld [vmem:[#allocation22 + $0x80] sm:$0xff] }
 0x4e5   :  { %3048 = vmatpush1.bf16.msra.mxu1 %v7530_v46  ;;  %2967 = vmatprep.subr.bf16.mxu0 %v7537_v47  ;;  %v3407_v46 = vld [vmem:[#allocation22 + $0xa0] sm:$0xff]  ;;  %v3404_v47 = vld [vmem:[#allocation22 + $0x88] sm:$0xff] }
 0x4e6   :  { %3049 = vmatprep.subr.bf16.mxu1 %v7539_v48 }
 0x4e8   :  { %2968 = vmatpush1.bf16.msra.mxu0 %v7536_v52 }
 0x4e9   :  { %3050 = vmatpush1.bf16.msra.mxu1 %v7538_v56  ;;  %6501 = vmatprep.subr.bf16.mxu0 %v7541_v14  ;;  %v7557_v56 = vcombine.high %v3403_v45, %v3407_v46 }
 0x4ea   :  { %6665 = vmatprep.subr.bf16.mxu1 %v7543_v53 }
 0x4eb   :  { %2970 = vmatmul.mubr.bf16.vlgmr.msra.gmra.mrb[12].mxu0 %v9068_v22 }
 0x4ec   :  { %3052 = vmatmul.mubr.bf16.vlgmr.msra.gmra.mrb[12].mxu1 %v9068_v22  ;;  %6502 = vmatpush1.bf16.msra.mxu0 %v7540_v20 }
 0x4ed   :  { %6666 = vmatpush1.bf16.msra.mxu1 %v7542_v49  ;;  %6503 = vmatprep.subr.bf16.mxu0 %v7549_v29 }
 0x4ee   :  { %6667 = vmatprep.subr.bf16.mxu1 %v7551_v42 }
 0x4f0   :  { %6504 = vmatpush1.bf16.msra.mxu0 %v7548_v38 }
 0x4f1   :  { %6668 = vmatpush1.bf16.msra.mxu1 %v7550_v39  ;;  %6505 = vmatprep.subr.bf16.mxu0 %v7557_v56 }
 0x53e   :  { %v2807_v35 = vpop.f32.mrb[8].mxu0  ;;  %v2889_v57 = vpop.f32.mrb[8].mxu1 }
 0x53f   :  { %v3062_v58 = vrot.slane %v2807_v35, 4  ;;  %v3074_v60 = vrot.slane %v2889_v57, 4  ;;  %v2809_v61 = vpop.f32.mrb[9].mxu0  ;;  %v2891_v62 = vpop.f32.mrb[9].mxu1 }
 0x540   :  { %v3068_v63 = vrot.slane %v2809_v61, 4  ;;  %v3080_v0 = vrot.slane %v2891_v62, 4  ;;  %v2811_v1 = vpop.f32.mrb[10].mxu0  ;;  %v2893_v2 = vpop.f32.mrb[10].mxu1 }
 0x541   :  { %v3063_v3 = vadd.f32 %v3062_v58, %v2807_v35  ;;  %v3075_v36 = vadd.f32 %v3074_v60, %v2889_v57  ;;  %v2812_v4 = vpop.f32.mrb[11].mxu0  ;;  %v2894_v33 = vpop.f32.mrb[11].mxu1  ;;  %v3408_v58 = vld [vmem:[#allocation22 + $0xa8] sm:$0xff] }
 0x542   :  { %v3069_v34 = vadd.f32 %v3068_v63, %v2809_v61  ;;  %v3081_v5 = vadd.f32 %v3080_v0, %v2891_v62  ;;  %v7556_v0 = vcombine.low %v3403_v45, %v3407_v46  ;;  %v7558_v1 = vcombine.low %v3404_v47, %v3408_v58  ;;  %v3412_v4 = vld [vmem:[#allocation22 + $0xc8] sm:$0xff] }
 0x543   :  { %v3064_v6 = vrot.slane %v3063_v3, 2  ;;  %v3076_v7 = vrot.slane %v3075_v36, 2 }
 0x544   :  { %v3070_v8 = vrot.slane %v3069_v34, 2  ;;  %v3082_v22 = vrot.slane %v3081_v5, 2  ;;  %6506 = vmatpush1.bf16.msra.mxu0 %v7556_v0 }
 0x545   :  { %v3065_v12 = vadd.f32 %v3064_v6, %v3063_v3  ;;  %v3077_v13 = vadd.f32 %v3076_v7, %v3075_v36  ;;  %v3415_v36 = vld [vmem:[#allocation22 + $0xe0] sm:$0xff]  ;;  %v3416_v6 = vld [vmem:[#allocation22 + $0xe8] sm:$0xff] }
 0x546   :  { %v3071_v18 = vadd.f32 %v3070_v8, %v3069_v34  ;;  %v3083_v19 = vadd.f32 %v3082_v22, %v3081_v5  ;;  %v7566_v9 = vcombine.low %v3412_v4, %v3416_v6 }
 0x547   :  { %v3066_v50 = vrot.slane %v3065_v12, 1  ;;  %v3078_v51 = vrot.slane %v3077_v13, 1 }
 0x548   :  { %v3072_v54 = vrot.slane %v3071_v18, 1  ;;  %v3084_v55 = vrot.slane %v3083_v19, 1 }
 0x549   :  { %v3067_v27 = vadd.f32 %v3066_v50, %v3065_v12  ;;  %v3079_v28 = vadd.f32 %v3078_v51, %v3077_v13  ;;  %v7567_v12 = vcombine.high %v3412_v4, %v3416_v6  ;;  %v3424_v51 = vld [vmem:[#allocation22 + $0x128] sm:$0xff] }
 0x54a   :  { %v3073_v30 = vadd.f32 %v3072_v54, %v3071_v18  ;;  %v3085_v37 = vadd.f32 %v3084_v55, %v3083_v19  ;;  %v3423_v18 = vld [vmem:[#allocation22 + $0x120] sm:$0xff]  ;;  %v3420_v19 = vld [vmem:[#allocation22 + $0x108] sm:$0xff] }
 0x54b   :  { %v3110_v40 = vmul.f32 0.125, %v3067_v27  ;;  %v3112_v41 = vmul.f32 0.125, %v3079_v28  ;;  %v7573_v50 = vcombine.high %v3419_v16, %v3423_v18  ;;  %v7572_v55 = vcombine.low %v3419_v16, %v3423_v18 }
 0x54c   :  { %v3111_v43 = vmul.f32 0.125, %v3073_v30  ;;  %v3113_v44 = vmul.f32 0.125, %v3085_v37  ;;  %v7574_v21 = vcombine.low %v3420_v19, %v3424_v51  ;;  %v7575_v27 = vcombine.high %v3420_v19, %v3424_v51  ;;  %v3431_v30 = vld [vmem:[#allocation22 + $0x160] sm:$0xff]  ;;  %v3428_v37 = vld [vmem:[#allocation22 + $0x148] sm:$0xff] }
 0x54d   :  { %v9080_v48 = vsub.f32 %v2807_v35, %v3110_v40  ;;  %v9082_v52 = vsub.f32 %v2889_v57, %v3112_v41  ;;  %v7559_v35 = vcombine.high %v3404_v47, %v3408_v58  ;;  %v7581_v40 = vcombine.high %v3427_v59, %v3431_v30  ;;  %v3432_v41 = vld [vmem:[#allocation22 + $0x168] sm:$0xff]  ;;  %v3451_v19 = vld [vmem:[#allocation22 + $0x200] sm:$0xff] }
 0x54e   :  { %v9084_v60 = vsub.f32 %v2809_v61, %v3111_v43  ;;  %v9086_v63 = vsub.f32 %v2891_v62, %v3113_v44  ;;  %v3411_v62 = vld [vmem:[#allocation22 + $0xc0] sm:$0xff]  ;;  %v7580_v44 = vcombine.low %v3427_v59, %v3431_v30  ;;  %v7582_v45 = vcombine.low %v3428_v37, %v3432_v41  ;;  %v3456_v51 = vld [vmem:[#allocation22 + $0x228] sm:$0xff] }
 0x54f   :  { %v3126_v2 = vmul.f32 %v9080_v48, %v9080_v48  ;;  %v3128_v3 = vmul.f32 %v9082_v52, %v9082_v52  ;;  %6669 = vmatprep.subr.bf16.mxu1 %v7559_v35  ;;  %v7565_v5 = vcombine.high %v3411_v62, %v3415_v36  ;;  %v7564_v22 = vcombine.low %v3411_v62, %v3415_v36  ;;  %v3440_v62 = vld [vmem:[#allocation22 + $0x1a8] sm:$0xff] }
 0x550   :  { %v3127_v57 = vmul.f32 %v9084_v60, %v9084_v60  ;;  %v3129_v61 = vmul.f32 %v9086_v63, %v9086_v63  ;;  %6670 = vmatpush1.bf16.msra.mxu1 %v7558_v1  ;;  %v7583_v56 = vcombine.high %v3428_v37, %v3432_v41  ;;  %v3435_v1 = vld [vmem:[#allocation22 + $0x180] sm:$0xff]  ;;  %v3468_v41 = vld [vmem:[#allocation22 + $0x288] sm:$0xff] }
 0x551   :  { %v3134_v33 = vrot.slane %v3126_v2, 4  ;;  %v3146_v34 = vrot.slane %v3128_v3, 4  ;;  %6507 = vmatprep.subr.bf16.mxu0 %v7565_v5  ;;  %6671 = vmatprep.subr.bf16.mxu1 %v7567_v12  ;;  %v3444_v12 = vld [vmem:[#allocation22 + $0x1c8] sm:$0xff] }
 0x552   :  { %v3140_v7 = vrot.slane %v3127_v57, 4  ;;  %v3152_v8 = vrot.slane %v3129_v61, 4  ;;  %6508 = vmatpush1.bf16.msra.mxu0 %v7564_v22 }
 0x553   :  { %v3135_v10 = vadd.f32 %v3134_v33, %v3126_v2  ;;  %v3147_v11 = vadd.f32 %v3146_v34, %v3128_v3  ;;  %6509 = vmatprep.subr.bf16.mxu0 %v7573_v50  ;;  %v3439_v2 = vld [vmem:[#allocation22 + $0x1a0] sm:$0xff]  ;;  %v3436_v3 = vld [vmem:[#allocation22 + $0x188] sm:$0xff] }
 0x554   :  { %v3141_v13 = vadd.f32 %v3140_v7, %v3127_v57  ;;  %v3153_v14 = vadd.f32 %v3152_v8, %v3129_v61  ;;  %6672 = vmatpush1.bf16.msra.mxu1 %v7566_v9  ;;  %v7589_v61 = vcombine.high %v3435_v1, %v3439_v2  ;;  %v7588_v33 = vcombine.low %v3435_v1, %v3439_v2  ;;  %v3443_v9 = vld [vmem:[#allocation22 + $0x1c0] sm:$0xff] }
 0x555   :  { %v3136_v20 = vrot.slane %v3135_v10, 2  ;;  %v3148_v49 = vrot.slane %v3147_v11, 2  ;;  %6673 = vmatprep.subr.bf16.mxu1 %v7575_v27  ;;  %v7590_v34 = vcombine.low %v3436_v3, %v3440_v62  ;;  %v7591_v7 = vcombine.high %v3436_v3, %v3440_v62  ;;  %v3475_v2 = vld [vmem:[#allocation22 + $0x2c0] sm:$0xff] }
 0x556   :  { %v3142_v53 = vrot.slane %v3141_v13, 2  ;;  %v3154_v54 = vrot.slane %v3153_v14, 2  ;;  %6510 = vmatpush1.bf16.msra.mxu0 %v7572_v55 }
 0x557   :  { %v3137_v25 = vadd.f32 %v3136_v20, %v3135_v10  ;;  %v3149_v26 = vadd.f32 %v3148_v49, %v3147_v11  ;;  %6511 = vmatprep.subr.bf16.mxu0 %v7581_v40  ;;  %v3447_v10 = vld [vmem:[#allocation22 + $0x1e0] sm:$0xff]  ;;  %v3452_v49 = vld [vmem:[#allocation22 + $0x208] sm:$0xff] }
 0x558   :  { %v3143_v28 = vadd.f32 %v3142_v53, %v3141_v13  ;;  %v3155_v29 = vadd.f32 %v3154_v54, %v3153_v14  ;;  %6674 = vmatpush1.bf16.msra.mxu1 %v7574_v21  ;;  %v7597_v11 = vcombine.high %v3443_v9, %v3447_v10  ;;  %v3448_v13 = vld [vmem:[#allocation22 + $0x1e8] sm:$0xff]  ;;  %v7596_v14 = vcombine.low %v3443_v9, %v3447_v10  ;;  %v3455_v20 = vld [vmem:[#allocation22 + $0x220] sm:$0xff] }
 0x559   :  { %v3138_v38 = vrot.slane %v3137_v25, 1  ;;  %v3150_v39 = vrot.slane %v3149_v26, 1  ;;  %6675 = vmatprep.subr.bf16.mxu1 %v7583_v56  ;;  %v7598_v16 = vcombine.low %v3444_v12, %v3448_v13  ;;  %v7599_v18 = vcombine.high %v3444_v12, %v3448_v13  ;;  %v3459_v21 = vld [vmem:[#allocation22 + $0x240] sm:$0xff] }
 0x55a   :  { %v3144_v42 = vrot.slane %v3143_v28, 1  ;;  %v3156_v43 = vrot.slane %v3155_v29, 1  ;;  %6512 = vmatpush1.bf16.msra.mxu0 %v7580_v44  ;;  %v7605_v50 = vcombine.high %v3451_v19, %v3455_v20  ;;  %v7604_v53 = vcombine.low %v3451_v19, %v3455_v20  ;;  %v3471_v40 = vld [vmem:[#allocation22 + $0x2a0] sm:$0xff]  ;;  %v3472_v44 = vld [vmem:[#allocation22 + $0x2a8] sm:$0xff] }
 0x55b   :  { %v3139_v46 = vadd.f32 %v3138_v38, %v3137_v25  ;;  %v3151_v47 = vadd.f32 %v3150_v39, %v3149_v26  ;;  %6513 = vmatprep.subr.bf16.mxu0 %v7589_v61  ;;  %v7606_v54 = vcombine.low %v3452_v49, %v3456_v51  ;;  %v7607_v55 = vcombine.high %v3452_v49, %v3456_v51  ;;  %v3463_v25 = vld [vmem:[#allocation22 + $0x260] sm:$0xff]  ;;  %v3460_v26 = vld [vmem:[#allocation22 + $0x248] sm:$0xff] }
 0x55c   :  { %v3145_v58 = vadd.f32 %v3144_v42, %v3143_v28  ;;  %v3157_v0 = vadd.f32 %v3156_v43, %v3155_v29  ;;  %6676 = vmatpush1.bf16.msra.mxu1 %v7582_v45  ;;  %v7613_v27 = vcombine.high %v3459_v21, %v3463_v25  ;;  %v3464_v28 = vld [vmem:[#allocation22 + $0x268] sm:$0xff]  ;;  %v7612_v29 = vcombine.low %v3459_v21, %v3463_v25  ;;  %v3467_v39 = vld [vmem:[#allocation22 + $0x280] sm:$0xff] }
 0x55d   :  { %v3182_v35 = vmul.f32 0.125, %v3139_v46  ;;  %v3184_v57 = vmul.f32 0.125, %v3151_v47  ;;  %6677 = vmatprep.subr.bf16.mxu1 %v7591_v7  ;;  %v7614_v59 = vcombine.low %v3460_v26, %v3464_v28  ;;  %v7615_v30 = vcombine.high %v3460_v26, %v3464_v28  ;;  %v3480_v61 = vld [vmem:[#allocation22 + $0x2e8] sm:$0xff]  ;;  %v3491_v12 = vld [vmem:[#allocation22 + $0x340] sm:$0xff] }
 0x55e   :  { %v3183_v36 = vmul.f32 0.125, %v3145_v58  ;;  %v3185_v4 = vmul.f32 0.125, %v3157_v0  ;;  %6514 = vmatpush1.bf16.msra.mxu0 %v7588_v33  ;;  %v7621_v43 = vcombine.high %v3467_v39, %v3471_v40  ;;  %v7620_v47 = vcombine.low %v3467_v39, %v3471_v40  ;;  %v3484_v7 = vld [vmem:[#allocation22 + $0x308] sm:$0xff]  ;;  %v3495_v13 = vld [vmem:[#allocation22 + $0x360] sm:$0xff] }
 0x55f   :  { %v3190_v5 = vadd.f32 0.8, %v3182_v35  ;;  %v3192_v6 = vadd.f32 0.8, %v3184_v57  ;;  %6515 = vmatprep.subr.bf16.mxu0 %v7597_v11  ;;  %v7622_v56 = vcombine.low %v3468_v41, %v3472_v44  ;;  %v7623_v58 = vcombine.high %v3468_v41, %v3472_v44  ;;  %v3479_v35 = vld [vmem:[#allocation22 + $0x2e0] sm:$0xff]  ;;  %v3476_v57 = vld [vmem:[#allocation22 + $0x2c8] sm:$0xff] }
 0x560   :  { %v3191_v8 = vadd.f32 0.8, %v3183_v36  ;;  %v3193_v22 = vadd.f32 0.8, %v3185_v4  ;;  %6678 = vmatpush1.bf16.msra.mxu1 %v7590_v34  ;;  %v7628_v62 = vcombine.low %v3475_v2, %v3479_v35  ;;  %v7629_v36 = vcombine.high %v3475_v2, %v3479_v35  ;;  %v3503_v51 = vld [vmem:[#allocation22 + $0x3a0] sm:$0xff]  ;;  %v9112_v44 = vld [vmem:[#allocation22 + $0x428] sm:$0xff] }
 0x561   :  { %8320 = vrsqrt.f32 %v3190_v5  ;;  %6679 = vmatprep.subr.bf16.mxu1 %v7599_v18  ;;  %v7630_v4 = vcombine.low %v3476_v57, %v3480_v61  ;;  %v7631_v33 = vcombine.high %v3476_v57, %v3480_v61  ;;  %v3483_v5 = vld [vmem:[#allocation22 + $0x300] sm:$0xff]  ;;  %v3496_v18 = vld [vmem:[#allocation22 + $0x368] sm:$0xff]  ;;  %v7644_v19 = vcombine.low %v3491_v12, %v3495_v13 }
 0x562   :  { %8322 = vrsqrt.f32 %v3192_v6  ;;  %6516 = vmatpush1.bf16.msra.mxu0 %v7596_v14  ;;  %v3487_v6 = vld [vmem:[#allocation22 + $0x320] sm:$0xff]  ;;  %v3492_v14 = vld [vmem:[#allocation22 + $0x348] sm:$0xff] }
 0x563   :  { %8324 = vrsqrt.f32 %v3191_v8  ;;  %6517 = vmatprep.subr.bf16.mxu0 %v7605_v50  ;;  %v7637_v8 = vcombine.high %v3483_v5, %v3487_v6  ;;  %v7636_v9 = vcombine.low %v3483_v5, %v3487_v6  ;;  %v7646_v20 = vcombine.low %v3492_v14, %v3496_v18  ;;  %v3499_v50 = vld [vmem:[#allocation22 + $0x380] sm:$0xff] }
 0x564   :  { %8326 = vrsqrt.f32 %v3193_v22  ;;  %6680 = vmatpush1.bf16.msra.mxu1 %v7598_v16  ;;  %v3488_v22 = vld [vmem:[#allocation22 + $0x328] sm:$0xff]  ;;  %v7645_v16 = vcombine.high %v3491_v12, %v3495_v13  ;;  %v7647_v49 = vcombine.high %v3492_v14, %v3496_v18  ;;  %v7652_v21 = vcombine.low %v3499_v50, %v3503_v51  ;;  %v3511_v28 = vld [vmem:[#allocation22 + $0x3e0] sm:$0xff] }
 0x565   :  { %6681 = vmatprep.subr.bf16.mxu1 %v7607_v55  ;;  %v7638_v10 = vcombine.low %v3484_v7, %v3488_v22  ;;  %v7639_v11 = vcombine.high %v3484_v7, %v3488_v22  ;;  %v3504_v55 = vld [vmem:[#allocation22 + $0x3a8] sm:$0xff]  ;;  %v9104_v40 = vld [vmem:[#allocation22 + $0x400] sm:$0xff] }
 0x566   :  { %6518 = vmatpush1.bf16.msra.mxu0 %v7604_v53  ;;  %v3500_v53 = vld [vmem:[#allocation22 + $0x388] sm:$0xff]  ;;  %v9106_v41 = vld [vmem:[#allocation22 + $0x420] sm:$0xff] }
 0x567   :  { %6519 = vmatprep.subr.bf16.mxu0 %v7613_v27  ;;  %v7654_v25 = vcombine.low %v3500_v53, %v3504_v55  ;;  %v7655_v26 = vcombine.high %v3500_v53, %v3504_v55  ;;  %v3507_v27 = vld [vmem:[#allocation22 + $0x3c0] sm:$0xff] }
 0x568   :  { %6682 = vmatpush1.bf16.msra.mxu1 %v7606_v54  ;;  %v7653_v54 = vcombine.high %v3499_v50, %v3503_v51 }
 0x569   :  { %6683 = vmatprep.subr.bf16.mxu1 %v7615_v30  ;;  %v7661_v30 = vcombine.high %v3507_v27, %v3511_v28 }
 0x56a   :  { %6520 = vmatpush1.bf16.msra.mxu0 %v7612_v29  ;;  %v3508_v29 = vld [vmem:[#allocation22 + $0x3c8] sm:$0xff] }
 0x56b   :  { %v8321_v37 = vpop.eup %8320  ;;  %6521 = vmatprep.subr.bf16.mxu0 %v7621_v43  ;;  %v7669_v43 = vcombine.high %v9104_v40, %v9106_v41 }
 0x56c   :  { %v8323_v38 = vpop.eup %8322  ;;  %6684 = vmatpush1.bf16.msra.mxu1 %v7614_v59  ;;  %v7660_v59 = vcombine.low %v3507_v27, %v3511_v28 }
 0x56d   :  { %v8325_v42 = vpop.eup %8324  ;;  %6685 = vmatprep.subr.bf16.mxu1 %v7623_v58 }
 0x56e   :  { %v8327_v45 = vpop.eup %8326  ;;  %v3214_v46 = vcombine.low %v8321_v37, %v8325_v42  ;;  %6522 = vmatpush1.bf16.msra.mxu0 %v7620_v47  ;;  %v3512_v37 = vld [vmem:[#allocation22 + $0x3e8] sm:$0xff] }
 0x56f   :  { %v3215_v0 = vcombine.low %v8323_v38, %v8327_v45  ;;  %6523 = vmatprep.subr.bf16.mxu0 %v7629_v36  ;;  %v7662_v38 = vcombine.low %v3508_v29, %v3512_v37  ;;  %v7663_v39 = vcombine.high %v3508_v29, %v3512_v37  ;;  %v9108_v42 = vld [vmem:[#allocation22 + $0x408] sm:$0xff]  ;;  %v7668_v45 = vcombine.low %v9104_v40, %v9106_v41  ;;  %v3543_v40 = vld [vmem:[#allocation22 + $0x4e0] sm:$0xff] }
 0x570   :  { %v9097_v1 = vrot.slane %v3214_v46, %v8979_v17  ;;  %6686 = vmatpush1.bf16.msra.mxu1 %v7622_v56  ;;  %v7670_v46 = vcombine.low %v9108_v42, %v9112_v44  ;;  %v7671_v47 = vcombine.high %v9108_v42, %v9112_v44  ;;  %v3540_v41 = vld [vmem:[#allocation22 + $0x4c8] sm:$0xff] }
 0x571   :  { %v9100_v3 = vrot.slane %v3215_v0, %v8979_v17  ;;  %6687 = vmatprep.subr.bf16.mxu1 %v7631_v33 }
 0x572   :  { %6524 = vmatpush1.bf16.msra.mxu0 %v7628_v62 }
 0x573   :  { %v3246_v34 = vcombine.low %v9097_v1, %v9100_v3  ;;  %6525 = vmatprep.subr.bf16.mxu0 %v7637_v8 }
 0x574   :  { %6688 = vmatpush1.bf16.msra.mxu1 %v7630_v4 }
 0x575   :  { %6689 = vmatprep.subr.bf16.mxu1 %v7639_v11 }
 0x576   :  { %6526 = vmatpush1.bf16.msra.mxu0 %v7636_v9 }
 0x577   :  { %6527 = vmatprep.subr.bf16.mxu0 %v7645_v16 }
 0x578   :  { %6690 = vmatpush1.bf16.msra.mxu1 %v7638_v10 }
 0x579   :  { %6691 = vmatprep.subr.bf16.mxu1 %v7647_v49 }
 0x57a   :  { %6528 = vmatpush1.bf16.msra.mxu0 %v7644_v19 }
 0x57b   :  { %6529 = vmatprep.subr.bf16.mxu0 %v7653_v54 }
 0x57c   :  { %6692 = vmatpush1.bf16.msra.mxu1 %v7646_v20 }
 0x57d   :  { %6693 = vmatprep.subr.bf16.mxu1 %v7655_v26 }
 0x57e   :  { %6530 = vmatpush1.bf16.msra.mxu0 %v7652_v21 }
 0x57f   :  { %6531 = vmatprep.subr.bf16.mxu0 %v7661_v30 }
 0x580   :  { %6694 = vmatpush1.bf16.msra.mxu1 %v7654_v25 }
 0x581   :  { %6695 = vmatprep.subr.bf16.mxu1 %v7663_v39 }
 0x582   :  { %6532 = vmatpush1.bf16.msra.mxu0 %v7660_v59 }
 0x583   :  { %6542 = vmatprep.subr.bf16.mxu0 %v7669_v43 }
 0x584   :  { %6696 = vmatpush1.bf16.msra.mxu1 %v7662_v38 }
 0x585   :  { %6706 = vmatprep.subr.bf16.mxu1 %v7671_v47 }
 0x5be   :  { %v2971_v56 = vpop.f32.mrb[12].mxu0 }
 0x5bf   :  { %v3086_v58 = vrot.slane %v2971_v56, 4  ;;  %v3053_v0 = vpop.f32.mrb[12].mxu1  ;;  %v2973_v2 = vpop.f32.mrb[13].mxu0 }
 0x5c0   :  { %v3098_v35 = vrot.slane %v3053_v0, 4  ;;  %v3092_v57 = vrot.slane %v2973_v2, 4  ;;  %v3055_v61 = vpop.f32.mrb[13].mxu1  ;;  %v2975_v62 = vpop.f32.mrb[14].mxu0 }
 0x5c1   :  { %v3087_v36 = vadd.f32 %v3086_v58, %v2971_v56  ;;  %v3104_v4 = vrot.slane %v3055_v61, 4  ;;  %v3057_v33 = vpop.f32.mrb[14].mxu1  ;;  %v2976_v5 = vpop.f32.mrb[15].mxu0 }
 0x5c2   :  { %v3099_v6 = vadd.f32 %v3098_v35, %v3053_v0  ;;  %v3093_v7 = vadd.f32 %v3092_v57, %v2973_v2  ;;  %v3058_v8 = vpop.f32.mrb[15].mxu1 }
 0x5c3   :  { %v3088_v22 = vrot.slane %v3087_v36, 2  ;;  %v3105_v9 = vadd.f32 %v3104_v4, %v3055_v61 }
 0x5c4   :  { %v3100_v10 = vrot.slane %v3099_v6, 2  ;;  %v3094_v11 = vrot.slane %v3093_v7, 2 }
 0x5c5   :  { %v3089_v12 = vadd.f32 %v3088_v22, %v3087_v36  ;;  %v3106_v13 = vrot.slane %v3105_v9, 2 }
 0x5c6   :  { %v3101_v14 = vadd.f32 %v3100_v10, %v3099_v6  ;;  %v3095_v16 = vadd.f32 %v3094_v11, %v3093_v7 }
 0x5c7   :  { %v3090_v18 = vrot.slane %v3089_v12, 1  ;;  %v3107_v19 = vadd.f32 %v3106_v13, %v3105_v9 }
 0x5c8   :  { %v3102_v20 = vrot.slane %v3101_v14, 1  ;;  %v3096_v49 = vrot.slane %v3095_v16, 1 }
 0x5c9   :  { %v3091_v50 = vadd.f32 %v3090_v18, %v3089_v12  ;;  %v3108_v51 = vrot.slane %v3107_v19, 1 }
 0x5ca   :  { %v3103_v53 = vadd.f32 %v3102_v20, %v3101_v14  ;;  %v3097_v54 = vadd.f32 %v3096_v49, %v3095_v16 }
 0x5cb   :  { %v3114_v55 = vmul.f32 0.125, %v3091_v50  ;;  %v3109_v21 = vadd.f32 %v3108_v51, %v3107_v19 }
 0x5cc   :  { %v3116_v25 = vmul.f32 0.125, %v3103_v53  ;;  %v3115_v26 = vmul.f32 0.125, %v3097_v54 }
 0x5cd   :  { %v9120_v27 = vsub.f32 %v2971_v56, %v3114_v55  ;;  %v3117_v28 = vmul.f32 0.125, %v3109_v21 }
 0x5ce   :  { %v9122_v29 = vsub.f32 %v3053_v0, %v3116_v25  ;;  %v9124_v59 = vsub.f32 %v2973_v2, %v3115_v26 }
 0x5cf   :  { %v3130_v30 = vmul.f32 %v9120_v27, %v9120_v27  ;;  %v9128_v37 = vsub.f32 %v3055_v61, %v3117_v28 }
 0x5d0   :  { %v3132_v38 = vmul.f32 %v9122_v29, %v9122_v29  ;;  %v3131_v39 = vmul.f32 %v9124_v59, %v9124_v59 }
 0x5d1   :  { %v3158_v43 = vrot.slane %v3130_v30, 4  ;;  %v3133_v47 = vmul.f32 %v9128_v37, %v9128_v37 }
 0x5d2   :  { %v3170_v56 = vrot.slane %v3132_v38, 4  ;;  %v3164_v58 = vrot.slane %v3131_v39, 4 }
 0x5d3   :  { %v3159_v0 = vadd.f32 %v3158_v43, %v3130_v30  ;;  %v3176_v2 = vrot.slane %v3133_v47, 4 }
 0x5d4   :  { %v3171_v35 = vadd.f32 %v3170_v56, %v3132_v38  ;;  %v3165_v57 = vadd.f32 %v3164_v58, %v3131_v39  ;;  %v3060_v58 = vld [vmem:[#allocation19] sm:$0xff] }
 0x5d5   :  { %v3160_v62 = vrot.slane %v3159_v0, 2  ;;  %v3177_v36 = vadd.f32 %v3176_v2, %v3133_v47  ;;  %v3254_v47 = vrot.slane %v3246_v34, %v8979_v17 }
 0x5d6   :  { %v3172_v61 = vrot.slane %v3171_v35, 2  ;;  %v3166_v4 = vrot.slane %v3165_v57, 2 }
 0x5d7   :  { %v3161_v33 = vadd.f32 %v3160_v62, %v3159_v0  ;;  %v3178_v5 = vrot.slane %v3177_v36, 2  ;;  %v9143_v0 = vld [vmem:[#allocation20] sm:$0xff] }
 0x5d8   :  { %v3173_v6 = vadd.f32 %v3172_v61, %v3171_v35  ;;  %v3167_v7 = vadd.f32 %v3166_v4, %v3165_v57  ;;  %v9146_v35 = vsub.s32 7, %v8976_v15  ;;  %v9149_v57 = vsub.s32 5, %v8976_v15 }
 0x5d9   :  { %v3162_v8 = vrot.slane %v3161_v33, 1  ;;  %v3179_v22 = vadd.f32 %v3178_v5, %v3177_v36  ;;  %v3322_v1 = vrot.slane %v9143_v0, %v8987_v24  ;;  %v3330_v3 = vrot.slane %v9143_v0, %v9029_v31 }
 0x5da   :  { %v3174_v9 = vrot.slane %v3173_v6, 1  ;;  %v3168_v10 = vrot.slane %v3167_v7, 1  ;;  %v3346_v36 = vrot.slane %v9143_v0, %v9146_v35 }
 0x5db   :  { %v3163_v11 = vadd.f32 %v3162_v8, %v3161_v33  ;;  %v3180_v12 = vrot.slane %v3179_v22, 1  ;;  %v3338_v8 = vrot.slane %v9143_v0, %v9149_v57 }
 0x5dc   :  { %v3175_v13 = vadd.f32 %v3174_v9, %v3173_v6  ;;  %v3169_v14 = vadd.f32 %v3168_v10, %v3167_v7  ;;  %v3326_v6 = vrot.slane %v9143_v0, %v9032_v32 }
 0x5dd   :  { %v3186_v16 = vmul.f32 0.125, %v3163_v11  ;;  %v3181_v18 = vadd.f32 %v3180_v12, %v3179_v22 }
 0x5de   :  { %v3188_v19 = vmul.f32 0.125, %v3175_v13  ;;  %v3187_v20 = vmul.f32 0.125, %v3169_v14  ;;  %v9184_v14 = vsub.s32 4, %v8976_v15 }
 0x5df   :  { %v3194_v49 = vadd.f32 0.8, %v3186_v16  ;;  %v3189_v50 = vmul.f32 0.125, %v3181_v18 }
 0x5e0   :  { %v3196_v51 = vadd.f32 0.8, %v3188_v19  ;;  %v3195_v53 = vadd.f32 0.8, %v3187_v20 }
 0x5e1   :  { %8328 = vrsqrt.f32 %v3194_v49  ;;  %v3197_v54 = vadd.f32 0.8, %v3189_v50 }
 0x5e2   :  { %8330 = vrsqrt.f32 %v3196_v51 }
 0x5e3   :  { %8332 = vrsqrt.f32 %v3195_v53  ;;  %v3527_v53 = vld [vmem:[#allocation22 + $0x460] sm:$0xff] }
 0x5e4   :  { %8334 = vrsqrt.f32 %v3197_v54  ;;  %v9195_v54 = vsub.s32 6, %v8976_v15  ;;  %v3532_v15 = vld [vmem:[#allocation22 + $0x488] sm:$0xff] }
 0x5eb   :  { %v8329_v55 = vpop.eup %8328 }
 0x5ec   :  { %v8331_v21 = vpop.eup %8330 }
 0x5ed   :  { %v8333_v25 = vpop.eup %8332 }
 0x5ee   :  { %v8335_v26 = vpop.eup %8334  ;;  %v3216_v28 = vcombine.low %v8329_v55, %v8333_v25  ;;  %v3528_v25 = vld [vmem:[#allocation22 + $0x468] sm:$0xff] }
 0x5ef   :  { %v3217_v30 = vcombine.low %v8331_v21, %v8335_v26  ;;  %v3524_v21 = vld [vmem:[#allocation22 + $0x448] sm:$0xff] }
 0x5f0   :  { %v3238_v38 = vrot.slane %v3216_v28, %v8979_v17 }
 0x5f1   :  { %v3245_v39 = vrot.slane %v3217_v30, %v8979_v17  ;;  %v3334_v30 = vrot.slane %v9143_v0, %v9184_v14 }
 0x5f3   :  { %v3247_v43 = vcombine.low %v3238_v38, %v3245_v39  ;;  %v3531_v39 = vld [vmem:[#allocation22 + $0x480] sm:$0xff] }
 0x5f5   :  { %v3261_v56 = vrot.slane %v3247_v43, %v8979_v17  ;;  %v3318_v17 = vrot.slane %v9143_v0, %v8984_v23  ;;  %v7679_v43 = vcombine.high %v3524_v21, %v3528_v25 }
 0x5f7   :  { %v3262_v2 = vcombine.low %v3254_v47, %v3261_v56  ;;  %v3535_v47 = vld [vmem:[#allocation22 + $0x4a0] sm:$0xff]  ;;  %v3536_v56 = vld [vmem:[#allocation22 + $0x4a8] sm:$0xff] }
 0x5f8   :  { %v7684_v44 = vcombine.low %v3531_v39, %v3535_v47 }
 0x5f9   :  { %v9151_v62 = vmul.f32 %v3262_v2, %v3060_v58 }
 0x5fb   :  { %v3297_v34 = vrot.slane %v9151_v62, %v9146_v35  ;;  %v3273_v61 = vrot.slane %v9151_v62, %v8987_v24  ;;  %v3269_v4 = vrot.slane %v9151_v62, %v8984_v23  ;;  %v3281_v33 = vrot.slane %v9151_v62, %v9029_v31 }
 0x5fc   :  { %v3277_v5 = vrot.slane %v9151_v62, %v9032_v32  ;;  %v3289_v7 = vrot.slane %v9151_v62, %v9149_v57  ;;  %v3293_v2 = vrot.slane %v9151_v62, %v9195_v54 }
 0x5fd   :  { %v3313_v22 = vmul.f32 %v3297_v34, %v9128_v37  ;;  %v3307_v9 = vmul.f32 %v3273_v61, %v9084_v60  ;;  %v3306_v10 = vmul.f32 %v3269_v4, %v9080_v48  ;;  %v3309_v11 = vmul.f32 %v3281_v33, %v9086_v63  ;;  %v3539_v61 = vld [vmem:[#allocation22 + $0x4c0] sm:$0xff] }
 0x5fe   :  { %v3308_v12 = vmul.f32 %v3277_v5, %v9082_v52  ;;  %v3311_v13 = vmul.f32 %v3289_v7, %v9124_v59  ;;  %v3523_v52 = vld [vmem:[#allocation22 + $0x440] sm:$0xff]  ;;  %v3285_v59 = vrot.slane %v9151_v62, %v9184_v14  ;;  %v7687_v34 = vcombine.high %v3532_v15, %v3536_v56  ;;  %v3548_v7 = vld [vmem:[#allocation22 + $0x508] sm:$0xff] }
 0x5ff   :  { %v9186_v16 = vadd.f32 %v3346_v36, %v3313_v22  ;;  %v3356_v18 = vadd.f32 %v3322_v1, %v3307_v9  ;;  %v3355_v19 = vadd.f32 %v3318_v17, %v3306_v10  ;;  %v3358_v20 = vadd.f32 %v3330_v3, %v3309_v11  ;;  %v3547_v5 = vld [vmem:[#allocation22 + $0x500] sm:$0xff] }
 0x600   :  { %v9188_v49 = vadd.f32 %v3326_v6, %v3308_v12  ;;  %v9190_v37 = vadd.f32 %v3338_v8, %v3311_v13  ;;  %v7677_v38 = vcombine.high %v3523_v52, %v3527_v53  ;;  %v3310_v58 = vmul.f32 %v3285_v59, %v9120_v27  ;;  %v3551_v6 = vld [vmem:[#allocation22 + $0x520] sm:$0xff]  ;;  %v3552_v8 = vld [vmem:[#allocation22 + $0x528] sm:$0xff] }
 0x601   :  { %v3364_v60 = vmul.f32 0.2, %v3356_v18  ;;  %v3363_v48 = vmul.f32 0.2, %v3355_v19  ;;  %v3366_v50 = vmul.f32 0.2, %v3358_v20  ;;  %v3342_v1 = vrot.slane %v9143_v0, %v9195_v54 }
 0x602   :  { %v7676_v27 = vcombine.low %v3523_v52, %v3527_v53  ;;  %v7678_v17 = vcombine.low %v3524_v21, %v3528_v25  ;;  %v9220_v62 = vadd.f32 %v3334_v30, %v3310_v58  ;;  %v7685_v3 = vcombine.high %v3531_v39, %v3535_v47  ;;  %v3555_v11 = vld [vmem:[#allocation22 + $0x540] sm:$0xff]  ;;  %v3556_v13 = vld [vmem:[#allocation22 + $0x548] sm:$0xff] }
 0x603   :  { %v3372_v63 = vmax.f32 %v3356_v18, %v3364_v60  ;;  %v3371_v51 = vmax.f32 %v3355_v19, %v3363_v48  ;;  %v3374_v55 = vmax.f32 %v3358_v20, %v3366_v50  ;;  %v3312_v0 = vmul.f32 %v3293_v2, %v9122_v29  ;;  %v3559_v12 = vld [vmem:[#allocation22 + $0x560] sm:$0xff]  ;;  %v3560_v18 = vld [vmem:[#allocation22 + $0x568] sm:$0xff] }
 0x604   :  { %v7693_v4 = vcombine.high %v3539_v61, %v3543_v40  ;;  %v7692_v29 = vcombine.low %v3539_v61, %v3543_v40  ;;  %v7701_v9 = vcombine.high %v3547_v5, %v3551_v6  ;;  %v7703_v10 = vcombine.high %v3548_v7, %v3552_v8  ;;  %v3563_v50 = vld [vmem:[#allocation22 + $0x580] sm:$0xff]  ;;  %v3568_v52 = vld [vmem:[#allocation22 + $0x5a8] sm:$0xff] }
 0x605   :  { %v9197_v26 = vpack.c.bf16 %v3372_v63, %v3372_v63  ;;  %v9199_v28 = vpack.c.bf16 %v3371_v51, %v3371_v51  ;;  %v9210_v36 = vpack.c.bf16 %v3374_v55, %v3374_v55  ;;  %v9225_v42 = vadd.f32 %v3342_v1, %v3312_v0  ;;  %v3567_v63 = vld [vmem:[#allocation22 + $0x5a0] sm:$0xff]  ;;  %v3564_v51 = vld [vmem:[#allocation22 + $0x588] sm:$0xff] }
 0x606   :  { %v7700_v19 = vcombine.low %v3547_v5, %v3551_v6  ;;  %v7702_v20 = vcombine.low %v3548_v7, %v3552_v8  ;;  %v7709_v60 = vcombine.high %v3555_v11, %v3559_v12  ;;  %v7711_v48 = vcombine.high %v3556_v13, %v3560_v18  ;;  %v3571_v25 = vld [vmem:[#allocation22 + $0x5c0] sm:$0xff]  ;;  %v3576_v39 = vld [vmem:[#allocation22 + $0x5e8] sm:$0xff] }
 0x607   :  { %6533 = vmatprep.mubr.bf16.mxu0 %v9197_v26  ;;  %6697 = vmatprep.mubr.bf16.mxu1 %v9197_v26  ;;  %v7708_v53 = vcombine.low %v3555_v11, %v3559_v12  ;;  %v7710_v59 = vcombine.low %v3556_v13, %v3560_v18  ;;  %v7717_v55 = vcombine.high %v3563_v50, %v3567_v63  ;;  %v3575_v30 = vld [vmem:[#allocation22 + $0x5e0] sm:$0xff]  ;;  %v3580_v1 = vld [vmem:[#allocation22 + $0x608] sm:$0xff] }
 0x608   :  { %6534 = vmatmul.mubr.bf16.vlgmr.msra.gmra.mrb[16].mxu0 %v9199_v28  ;;  %6698 = vmatmul.mubr.bf16.vlgmr.msra.gmra.mrb[16].mxu1 %v9199_v28  ;;  %v7719_v21 = vcombine.high %v3564_v51, %v3568_v52  ;;  %v7718_v47 = vcombine.low %v3564_v51, %v3568_v52  ;;  %v3579_v58 = vld [vmem:[#allocation22 + $0x600] sm:$0xff]  ;;  %v3596_v7 = vld [vmem:[#allocation22 + $0x688] sm:$0xff] }
 0x609   :  { %6543 = vmatpush1.bf16.msra.mxu0 %v7668_v45  ;;  %6707 = vmatpush1.bf16.msra.mxu1 %v7670_v46  ;;  %v3544_v45 = vld [vmem:[#allocation22 + $0x4e8] sm:$0xff]  ;;  %v7686_v46 = vcombine.low %v3532_v15, %v3536_v56  ;;  %v7725_v15 = vcombine.high %v3571_v25, %v3575_v30  ;;  %v3583_v2 = vld [vmem:[#allocation22 + $0x620] sm:$0xff] }
 0x60a   :  { %6574 = vmatprep.mubr.bf16.mxu0 %v9210_v36  ;;  %6738 = vmatprep.mubr.bf16.mxu1 %v9210_v36  ;;  %v7695_v33 = vcombine.high %v3540_v41, %v3544_v45  ;;  %v7694_v22 = vcombine.low %v3540_v41, %v3544_v45  ;;  %v3587_v0 = vld [vmem:[#allocation22 + $0x640] sm:$0xff]  ;;  %v3588_v41 = vld [vmem:[#allocation22 + $0x648] sm:$0xff] }
 0x60b   :  { %6544 = vmatprep.subr.bf16.mxu0 %v7677_v38  ;;  %6708 = vmatprep.subr.bf16.mxu1 %v7679_v43  ;;  %v3572_v38 = vld [vmem:[#allocation22 + $0x5c8] sm:$0xff]  ;;  %v7716_v43 = vcombine.low %v3563_v50, %v3567_v63  ;;  %v3591_v40 = vld [vmem:[#allocation22 + $0x660] sm:$0xff] }
 0x60c   :  { %v7727_v56 = vcombine.high %v3572_v38, %v3576_v39  ;;  %v3592_v45 = vld [vmem:[#allocation22 + $0x668] sm:$0xff]  ;;  %v3595_v5 = vld [vmem:[#allocation22 + $0x680] sm:$0xff] }
 0x60d   :  { %6545 = vmatpush1.bf16.msra.mxu0 %v7676_v27  ;;  %6709 = vmatpush1.bf16.msra.mxu1 %v7678_v17  ;;  %v3584_v27 = vld [vmem:[#allocation22 + $0x628] sm:$0xff]  ;;  %v7724_v17 = vcombine.low %v3571_v25, %v3575_v30  ;;  %v3599_v6 = vld [vmem:[#allocation22 + $0x6a0] sm:$0xff] }
 0x60e   :  { %6546 = vmatprep.subr.bf16.mxu0 %v7685_v3  ;;  %6710 = vmatprep.subr.bf16.mxu1 %v7687_v34  ;;  %v7726_v3 = vcombine.low %v3572_v38, %v3576_v39  ;;  %v7733_v34 = vcombine.high %v3579_v58, %v3583_v2  ;;  %v7735_v61 = vcombine.high %v3580_v1, %v3584_v27  ;;  %v3600_v8 = vld [vmem:[#allocation22 + $0x6a8] sm:$0xff]  ;;  %v3603_v11 = vld [vmem:[#allocation22 + $0x6c0] sm:$0xff] }
 0x60f   :  { %v3607_v12 = vld [vmem:[#allocation22 + $0x6e0] sm:$0xff]  ;;  %v3604_v13 = vld [vmem:[#allocation22 + $0x6c8] sm:$0xff] }
 0x610   :  { %v3608_v18 = vld [vmem:[#allocation22 + $0x6e8] sm:$0xff]  ;;  %v3611_v50 = vld [vmem:[#allocation22 + $0x700] sm:$0xff] }
 0x611   :  { %6547 = vmatpush1.bf16.msra.mxu0 %v7684_v44  ;;  %6711 = vmatpush1.bf16.msra.mxu1 %v7686_v46  ;;  %v7732_v44 = vcombine.low %v3579_v58, %v3583_v2  ;;  %v7734_v46 = vcombine.low %v3580_v1, %v3584_v27  ;;  %v3615_v63 = vld [vmem:[#allocation22 + $0x720] sm:$0xff]  ;;  %v3612_v51 = vld [vmem:[#allocation22 + $0x708] sm:$0xff] }
 0x612   :  { %6548 = vmatprep.subr.bf16.mxu0 %v7693_v4  ;;  %6712 = vmatprep.subr.bf16.mxu1 %v7695_v33  ;;  %v7741_v4 = vcombine.high %v3587_v0, %v3591_v40  ;;  %v7743_v33 = vcombine.high %v3588_v41, %v3592_v45  ;;  %v3616_v52 = vld [vmem:[#allocation22 + $0x728] sm:$0xff]  ;;  %v3619_v25 = vld [vmem:[#allocation22 + $0x740] sm:$0xff] }
 0x613   :  { %v3623_v30 = vld [vmem:[#allocation22 + $0x760] sm:$0xff]  ;;  %v3620_v38 = vld [vmem:[#allocation22 + $0x748] sm:$0xff] }
 0x614   :  { %v3624_v39 = vld [vmem:[#allocation22 + $0x768] sm:$0xff]  ;;  %v3627_v58 = vld [vmem:[#allocation22 + $0x780] sm:$0xff] }
 0x615   :  { %6549 = vmatpush1.bf16.msra.mxu0 %v7692_v29  ;;  %6713 = vmatpush1.bf16.msra.mxu1 %v7694_v22  ;;  %v7740_v29 = vcombine.low %v3587_v0, %v3591_v40  ;;  %v7742_v22 = vcombine.low %v3588_v41, %v3592_v45  ;;  %v3631_v2 = vld [vmem:[#allocation22 + $0x7a0] sm:$0xff]  ;;  %v3628_v1 = vld [vmem:[#allocation22 + $0x788] sm:$0xff] }
 0x616   :  { %6550 = vmatprep.subr.bf16.mxu0 %v7701_v9  ;;  %6714 = vmatprep.subr.bf16.mxu1 %v7703_v10  ;;  %v7749_v9 = vcombine.high %v3595_v5, %v3599_v6  ;;  %v7751_v10 = vcombine.high %v3596_v7, %v3600_v8  ;;  %v3632_v27 = vld [vmem:[#allocation22 + $0x7a8] sm:$0xff]  ;;  %v3635_v0 = vld [vmem:[#allocation22 + $0x7c0] sm:$0xff] }
 0x617   :  { %v3639_v40 = vld [vmem:[#allocation22 + $0x7e0] sm:$0xff]  ;;  %v3636_v41 = vld [vmem:[#allocation22 + $0x7c8] sm:$0xff] }
 0x618   :  { %v3640_v45 = vld [vmem:[#allocation22 + $0x7e8] sm:$0xff] }
 0x619   :  { %6551 = vmatpush1.bf16.msra.mxu0 %v7700_v19  ;;  %6715 = vmatpush1.bf16.msra.mxu1 %v7702_v20  ;;  %v7748_v19 = vcombine.low %v3595_v5, %v3599_v6  ;;  %v7750_v20 = vcombine.low %v3596_v7, %v3600_v8  ;;  %v3365_v5 = vmul.f32 0.2, %v9188_v49  ;;  %v3643_v6 = vld [vmem:[#allocation22 + $0x800] sm:$0xff]  ;;  %v3644_v8 = vld [vmem:[#allocation22 + $0x808] sm:$0xff] }
 0x61a   :  { %6552 = vmatprep.subr.bf16.mxu0 %v7709_v60  ;;  %6716 = vmatprep.subr.bf16.mxu1 %v7711_v48  ;;  %v7757_v60 = vcombine.high %v3603_v11, %v3607_v12  ;;  %v7759_v48 = vcombine.high %v3604_v13, %v3608_v18  ;;  %v3647_v7 = vld [vmem:[#allocation22 + $0x820] sm:$0xff] }
 0x61d   :  { %6553 = vmatpush1.bf16.msra.mxu0 %v7708_v53  ;;  %6717 = vmatpush1.bf16.msra.mxu1 %v7710_v59  ;;  %v7756_v53 = vcombine.low %v3603_v11, %v3607_v12  ;;  %v7758_v59 = vcombine.low %v3604_v13, %v3608_v18  ;;  %v3373_v11 = vmax.f32 %v9188_v49, %v3365_v5 }
 0x61e   :  { %6554 = vmatprep.subr.bf16.mxu0 %v7717_v55  ;;  %6718 = vmatprep.subr.bf16.mxu1 %v7719_v21  ;;  %v7765_v55 = vcombine.high %v3611_v50, %v3615_v63  ;;  %v7767_v21 = vcombine.high %v3612_v51, %v3616_v52  ;;  %v7797_v12 = vcombine.high %v3643_v6, %v3647_v7 }
 0x621   :  { %6555 = vmatpush1.bf16.msra.mxu0 %v7716_v43  ;;  %6719 = vmatpush1.bf16.msra.mxu1 %v7718_v47  ;;  %v7764_v43 = vcombine.low %v3611_v50, %v3615_v63  ;;  %v7766_v47 = vcombine.low %v3612_v51, %v3616_v52  ;;  %v7796_v50 = vcombine.low %v3643_v6, %v3647_v7 }
 0x622   :  { %6556 = vmatprep.subr.bf16.mxu0 %v7725_v15  ;;  %6720 = vmatprep.subr.bf16.mxu1 %v7727_v56  ;;  %v7773_v15 = vcombine.high %v3619_v25, %v3623_v30  ;;  %v7775_v56 = vcombine.high %v3620_v38, %v3624_v39  ;;  %v9231_v63 = vpack.c.bf16 %v3373_v11, %v3373_v11 }
 0x625   :  { %6557 = vmatpush1.bf16.msra.mxu0 %v7724_v17  ;;  %6721 = vmatpush1.bf16.msra.mxu1 %v7726_v3  ;;  %v7772_v17 = vcombine.low %v3619_v25, %v3623_v30  ;;  %v7774_v3 = vcombine.low %v3620_v38, %v3624_v39 }
 0x626   :  { %6558 = vmatprep.subr.bf16.mxu0 %v7733_v34  ;;  %6722 = vmatprep.subr.bf16.mxu1 %v7735_v61  ;;  %v7781_v34 = vcombine.high %v3627_v58, %v3631_v2  ;;  %v7783_v61 = vcombine.high %v3628_v1, %v3632_v27 }
 0x629   :  { %6559 = vmatpush1.bf16.msra.mxu0 %v7732_v44  ;;  %6723 = vmatpush1.bf16.msra.mxu1 %v7734_v46  ;;  %v7780_v44 = vcombine.low %v3627_v58, %v3631_v2  ;;  %v7782_v46 = vcombine.low %v3628_v1, %v3632_v27 }
 0x62a   :  { %6560 = vmatprep.subr.bf16.mxu0 %v7741_v4  ;;  %6724 = vmatprep.subr.bf16.mxu1 %v7743_v33  ;;  %v7789_v4 = vcombine.high %v3635_v0, %v3639_v40  ;;  %v7791_v33 = vcombine.high %v3636_v41, %v3640_v45 }
 0x62d   :  { %6561 = vmatpush1.bf16.msra.mxu0 %v7740_v29  ;;  %6725 = vmatpush1.bf16.msra.mxu1 %v7742_v22  ;;  %v3648_v29 = vld [vmem:[#allocation22 + $0x828] sm:$0xff]  ;;  %v3368_v22 = vmul.f32 0.2, %v9190_v37 }
 0x62e   :  { %6562 = vmatprep.subr.bf16.mxu0 %v7749_v9  ;;  %6726 = vmatprep.subr.bf16.mxu1 %v7751_v10  ;;  %v7788_v9 = vcombine.low %v3635_v0, %v3639_v40  ;;  %v7790_v10 = vcombine.low %v3636_v41, %v3640_v45  ;;  %v7799_v13 = vcombine.high %v3644_v8, %v3648_v29 }
 0x62f   :  { %v3376_v18 = vmax.f32 %v9190_v37, %v3368_v22  ;;  %v7798_v51 = vcombine.low %v3644_v8, %v3648_v29  ;;  %v3660_v37 = vld [vmem:[#allocation22 + $0x888] sm:$0xff]  ;;  %v3691_v29 = vld [vmem:[#allocation22 + $0x980] sm:$0xff] }
 0x630   :  { %v3695_v22 = vld [vmem:[#allocation22 + $0x9a0] sm:$0xff] }
 0x631   :  { %6563 = vmatpush1.bf16.msra.mxu0 %v7748_v19  ;;  %6727 = vmatpush1.bf16.msra.mxu1 %v7750_v20  ;;  %v3651_v19 = vld [vmem:[#allocation22 + $0x840] sm:$0xff]  ;;  %v9233_v52 = vpack.c.bf16 %v3376_v18, %v3376_v18 }
 0x632   :  { %6564 = vmatprep.subr.bf16.mxu0 %v7757_v60  ;;  %6728 = vmatprep.subr.bf16.mxu1 %v7759_v48  ;;  %v3655_v20 = vld [vmem:[#allocation22 + $0x860] sm:$0xff]  ;;  %v3652_v60 = vld [vmem:[#allocation22 + $0x848] sm:$0xff] }
 0x633   :  { %v3656_v48 = vld [vmem:[#allocation22 + $0x868] sm:$0xff]  ;;  %v7804_v25 = vcombine.low %v3651_v19, %v3655_v20 }
 0x634   :  { %v7807_v49 = vcombine.high %v3652_v60, %v3656_v48  ;;  %v7806_v30 = vcombine.low %v3652_v60, %v3656_v48  ;;  %v3700_v60 = vld [vmem:[#allocation22 + $0x9c8] sm:$0xff] }
 0x635   :  { %6565 = vmatpush1.bf16.msra.mxu0 %v7756_v53  ;;  %6729 = vmatpush1.bf16.msra.mxu1 %v7758_v59  ;;  %v7805_v53 = vcombine.high %v3651_v19, %v3655_v20  ;;  %v3659_v59 = vld [vmem:[#allocation22 + $0x880] sm:$0xff]  ;;  %v3704_v48 = vld [vmem:[#allocation22 + $0x9e8] sm:$0xff] }
 0x636   :  { %6566 = vmatprep.subr.bf16.mxu0 %v7765_v55  ;;  %6730 = vmatprep.subr.bf16.mxu1 %v7767_v21  ;;  %v3663_v55 = vld [vmem:[#allocation22 + $0x8a0] sm:$0xff]  ;;  %v3664_v21 = vld [vmem:[#allocation22 + $0x8a8] sm:$0xff] }
 0x637   :  { %v7813_v38 = vcombine.high %v3659_v59, %v3663_v55  ;;  %v7815_v39 = vcombine.high %v3660_v37, %v3664_v21  ;;  %v7812_v58 = vcombine.low %v3659_v59, %v3663_v55  ;;  %v7814_v2 = vcombine.low %v3660_v37, %v3664_v21  ;;  %v3699_v19 = vld [vmem:[#allocation22 + $0x9c0] sm:$0xff]  ;;  %v3708_v37 = vld [vmem:[#allocation22 + $0xa08] sm:$0xff] }
 0x638   :  { %v3703_v20 = vld [vmem:[#allocation22 + $0x9e0] sm:$0xff]  ;;  %v3712_v21 = vld [vmem:[#allocation22 + $0xa28] sm:$0xff] }
 0x639   :  { %6567 = vmatpush1.bf16.msra.mxu0 %v7764_v43  ;;  %6731 = vmatpush1.bf16.msra.mxu1 %v7766_v47  ;;  %v3667_v43 = vld [vmem:[#allocation22 + $0x8c0] sm:$0xff] }
 0x63a   :  { %6568 = vmatprep.subr.bf16.mxu0 %v7773_v15  ;;  %6732 = vmatprep.subr.bf16.mxu1 %v7775_v56  ;;  %v3671_v47 = vld [vmem:[#allocation22 + $0x8e0] sm:$0xff]  ;;  %v3668_v15 = vld [vmem:[#allocation22 + $0x8c8] sm:$0xff] }
 0x63b   :  { %v3672_v56 = vld [vmem:[#allocation22 + $0x8e8] sm:$0xff]  ;;  %v7821_v1 = vcombine.high %v3667_v43, %v3671_v47  ;;  %v7820_v0 = vcombine.low %v3667_v43, %v3671_v47  ;;  %v3707_v59 = vld [vmem:[#allocation22 + $0xa00] sm:$0xff] }
 0x63c   :  { %v7823_v27 = vcombine.high %v3668_v15, %v3672_v56  ;;  %v7822_v40 = vcombine.low %v3668_v15, %v3672_v56  ;;  %v3711_v55 = vld [vmem:[#allocation22 + $0xa20] sm:$0xff]  ;;  %v3716_v15 = vld [vmem:[#allocation22 + $0xa48] sm:$0xff] }
 0x63d   :  { %6569 = vmatpush1.bf16.msra.mxu0 %v7772_v17  ;;  %6733 = vmatpush1.bf16.msra.mxu1 %v7774_v3  ;;  %v3675_v17 = vld [vmem:[#allocation22 + $0x900] sm:$0xff]  ;;  %v3720_v56 = vld [vmem:[#allocation22 + $0xa68] sm:$0xff] }
 0x63e   :  { %6570 = vmatprep.subr.bf16.mxu0 %v7781_v34  ;;  %6734 = vmatprep.subr.bf16.mxu1 %v7783_v61  ;;  %v3679_v3 = vld [vmem:[#allocation22 + $0x920] sm:$0xff]  ;;  %v3676_v34 = vld [vmem:[#allocation22 + $0x908] sm:$0xff] }
 0x63f   :  { %v3680_v61 = vld [vmem:[#allocation22 + $0x928] sm:$0xff]  ;;  %v7829_v41 = vcombine.high %v3675_v17, %v3679_v3  ;;  %v7828_v5 = vcombine.low %v3675_v17, %v3679_v3  ;;  %v3715_v43 = vld [vmem:[#allocation22 + $0xa40] sm:$0xff] }
 0x640   :  { %v7831_v45 = vcombine.high %v3676_v34, %v3680_v61  ;;  %v7830_v6 = vcombine.low %v3676_v34, %v3680_v61  ;;  %v3719_v47 = vld [vmem:[#allocation22 + $0xa60] sm:$0xff]  ;;  %v3724_v34 = vld [vmem:[#allocation22 + $0xa88] sm:$0xff] }
 0x641   :  { %6571 = vmatpush1.bf16.msra.mxu0 %v7780_v44  ;;  %6735 = vmatpush1.bf16.msra.mxu1 %v7782_v46  ;;  %v3683_v44 = vld [vmem:[#allocation22 + $0x940] sm:$0xff]  ;;  %v3728_v61 = vld [vmem:[#allocation22 + $0xaa8] sm:$0xff] }
 0x642   :  { %6572 = vmatprep.subr.bf16.mxu0 %v7789_v4  ;;  %6736 = vmatprep.subr.bf16.mxu1 %v7791_v33  ;;  %v3687_v46 = vld [vmem:[#allocation22 + $0x960] sm:$0xff]  ;;  %v3684_v4 = vld [vmem:[#allocation22 + $0x948] sm:$0xff] }
 0x643   :  { %v3688_v33 = vld [vmem:[#allocation22 + $0x968] sm:$0xff]  ;;  %v7837_v7 = vcombine.high %v3683_v44, %v3687_v46  ;;  %v7836_v11 = vcombine.low %v3683_v44, %v3687_v46  ;;  %v3723_v17 = vld [vmem:[#allocation22 + $0xa80] sm:$0xff] }
 0x644   :  { %v7839_v8 = vcombine.high %v3684_v4, %v3688_v33  ;;  %v3727_v3 = vld [vmem:[#allocation22 + $0xaa0] sm:$0xff] }
 0x645   :  { %6573 = vmatpush1.bf16.msra.mxu0 %v7788_v9  ;;  %6737 = vmatpush1.bf16.msra.mxu1 %v7790_v10  ;;  %v3692_v9 = vld [vmem:[#allocation22 + $0x988] sm:$0xff]  ;;  %v3731_v44 = vld [vmem:[#allocation22 + $0xac0] sm:$0xff] }
 0x646   :  { %6583 = vmatprep.subr.bf16.mxu0 %v7797_v12  ;;  %6747 = vmatprep.subr.bf16.mxu1 %v7799_v13  ;;  %v3696_v10 = vld [vmem:[#allocation22 + $0x9a8] sm:$0xff]  ;;  %v7838_v12 = vcombine.low %v3684_v4, %v3688_v33  ;;  %v7845_v13 = vcombine.high %v3691_v29, %v3695_v22  ;;  %v3735_v46 = vld [vmem:[#allocation22 + $0xae0] sm:$0xff] }
 0x647   :  { %v7847_v18 = vcombine.high %v3692_v9, %v3696_v10  ;;  %v3732_v4 = vld [vmem:[#allocation22 + $0xac8] sm:$0xff] }
 0x648   :  { %6575 = vmatmul.mubr.bf16.vlgmr.msra.gmra.mrb[16].mxu0 %v9231_v63  ;;  %6739 = vmatmul.mubr.bf16.vlgmr.msra.gmra.mrb[16].mxu1 %v9231_v63  ;;  %v3736_v33 = vld [vmem:[#allocation22 + $0xae8] sm:$0xff] }
 0x649   :  { %6584 = vmatpush1.bf16.msra.mxu0 %v7796_v50  ;;  %6615 = vmatprep.mubr.bf16.mxu0 %v9233_v52  ;;  %v7844_v50 = vcombine.low %v3691_v29, %v3695_v22  ;;  %v3739_v29 = vld [vmem:[#allocation22 + $0xb00] sm:$0xff] }
 0x64a   :  { %6748 = vmatpush1.bf16.msra.mxu1 %v7798_v51  ;;  %6779 = vmatprep.mubr.bf16.mxu1 %v9233_v52  ;;  %v7846_v51 = vcombine.low %v3692_v9, %v3696_v10  ;;  %v3743_v22 = vld [vmem:[#allocation22 + $0xb20] sm:$0xff]  ;;  %v3740_v9 = vld [vmem:[#allocation22 + $0xb08] sm:$0xff] }
 0x64b   :  { %6585 = vmatprep.subr.bf16.mxu0 %v7805_v53  ;;  %6749 = vmatprep.subr.bf16.mxu1 %v7807_v49  ;;  %v7853_v53 = vcombine.high %v3699_v19, %v3703_v20  ;;  %v7855_v49 = vcombine.high %v3700_v60, %v3704_v48  ;;  %v3744_v10 = vld [vmem:[#allocation22 + $0xb28] sm:$0xff] }
 0x64d   :  { %6586 = vmatpush1.bf16.msra.mxu0 %v7804_v25  ;;  %v7852_v25 = vcombine.low %v3699_v19, %v3703_v20  ;;  %v3747_v19 = vld [vmem:[#allocation22 + $0xb40] sm:$0xff] }
 0x64e   :  { %6750 = vmatpush1.bf16.msra.mxu1 %v7806_v30  ;;  %6587 = vmatprep.subr.bf16.mxu0 %v7813_v38  ;;  %v7854_v30 = vcombine.low %v3700_v60, %v3704_v48  ;;  %v7861_v38 = vcombine.high %v3707_v59, %v3711_v55  ;;  %v3751_v20 = vld [vmem:[#allocation22 + $0xb60] sm:$0xff]  ;;  %v3748_v60 = vld [vmem:[#allocation22 + $0xb48] sm:$0xff] }
 0x64f   :  { %6751 = vmatprep.subr.bf16.mxu1 %v7815_v39  ;;  %v7863_v39 = vcombine.high %v3708_v37, %v3712_v21  ;;  %v3752_v48 = vld [vmem:[#allocation22 + $0xb68] sm:$0xff] }
 0x651   :  { %6588 = vmatpush1.bf16.msra.mxu0 %v7812_v58  ;;  %v7860_v58 = vcombine.low %v3707_v59, %v3711_v55  ;;  %v3755_v59 = vld [vmem:[#allocation22 + $0xb80] sm:$0xff] }
 0x652   :  { %6752 = vmatpush1.bf16.msra.mxu1 %v7814_v2  ;;  %6589 = vmatprep.subr.bf16.mxu0 %v7821_v1  ;;  %v7862_v2 = vcombine.low %v3708_v37, %v3712_v21  ;;  %v7869_v1 = vcombine.high %v3715_v43, %v3719_v47  ;;  %v3759_v55 = vld [vmem:[#allocation22 + $0xba0] sm:$0xff]  ;;  %v3756_v37 = vld [vmem:[#allocation22 + $0xb88] sm:$0xff] }
 0x653   :  { %6753 = vmatprep.subr.bf16.mxu1 %v7823_v27  ;;  %v7871_v27 = vcombine.high %v3716_v15, %v3720_v56  ;;  %v3760_v21 = vld [vmem:[#allocation22 + $0xba8] sm:$0xff] }
 0x655   :  { %6590 = vmatpush1.bf16.msra.mxu0 %v7820_v0  ;;  %v7868_v0 = vcombine.low %v3715_v43, %v3719_v47  ;;  %v3763_v43 = vld [vmem:[#allocation22 + $0xbc0] sm:$0xff] }
 0x656   :  { %6754 = vmatpush1.bf16.msra.mxu1 %v7822_v40  ;;  %6591 = vmatprep.subr.bf16.mxu0 %v7829_v41  ;;  %v7870_v40 = vcombine.low %v3716_v15, %v3720_v56  ;;  %v7877_v41 = vcombine.high %v3723_v17, %v3727_v3  ;;  %v3767_v47 = vld [vmem:[#allocation22 + $0xbe0] sm:$0xff]  ;;  %v3764_v15 = vld [vmem:[#allocation22 + $0xbc8] sm:$0xff] }
 0x657   :  { %6755 = vmatprep.subr.bf16.mxu1 %v7831_v45  ;;  %v7879_v45 = vcombine.high %v3724_v34, %v3728_v61  ;;  %v3768_v56 = vld [vmem:[#allocation22 + $0xbe8] sm:$0xff] }
 0x659   :  { %6592 = vmatpush1.bf16.msra.mxu0 %v7828_v5  ;;  %v7876_v5 = vcombine.low %v3723_v17, %v3727_v3  ;;  %v7919_v17 = vcombine.high %v3764_v15, %v3768_v56  ;;  %v3771_v3 = vld [vmem:[#allocation22 + $0xc00] sm:$0xff] }
 0x65a   :  { %6756 = vmatpush1.bf16.msra.mxu1 %v7830_v6  ;;  %6593 = vmatprep.subr.bf16.mxu0 %v7837_v7  ;;  %v7878_v6 = vcombine.low %v3724_v34, %v3728_v61  ;;  %v7885_v7 = vcombine.high %v3731_v44, %v3735_v46  ;;  %v3775_v34 = vld [vmem:[#allocation22 + $0xc20] sm:$0xff]  ;;  %v3370_v61 = vmul.f32 0.2, %v9186_v16 }
 0x65b   :  { %6757 = vmatprep.subr.bf16.mxu1 %v7839_v8  ;;  %v7887_v8 = vcombine.high %v3732_v4, %v3736_v33 }
 0x65d   :  { %6594 = vmatpush1.bf16.msra.mxu0 %v7836_v11  ;;  %v7884_v11 = vcombine.low %v3731_v44, %v3735_v46  ;;  %v7925_v46 = vcombine.high %v3771_v3, %v3775_v34 }
 0x65e   :  { %6758 = vmatpush1.bf16.msra.mxu1 %v7838_v12  ;;  %6595 = vmatprep.subr.bf16.mxu0 %v7845_v13  ;;  %v7886_v12 = vcombine.low %v3732_v4, %v3736_v33  ;;  %v7893_v13 = vcombine.high %v3739_v29, %v3743_v22  ;;  %v3378_v33 = vmax.f32 %v9186_v16, %v3370_v61 }
 0x65f   :  { %6759 = vmatprep.subr.bf16.mxu1 %v7847_v18  ;;  %v7895_v18 = vcombine.high %v3740_v9, %v3744_v10 }
 0x661   :  { %6596 = vmatpush1.bf16.msra.mxu0 %v7844_v50  ;;  %v7892_v50 = vcombine.low %v3739_v29, %v3743_v22  ;;  %v3784_v29 = vld [vmem:[#allocation22 + $0xc68] sm:$0xff] }
 0x662   :  { %6760 = vmatpush1.bf16.msra.mxu1 %v7846_v51  ;;  %6597 = vmatprep.subr.bf16.mxu0 %v7853_v53  ;;  %v7894_v51 = vcombine.low %v3740_v9, %v3744_v10  ;;  %v7901_v53 = vcombine.high %v3747_v19, %v3751_v20 }
 0x663   :  { %6761 = vmatprep.subr.bf16.mxu1 %v7855_v49  ;;  %v7903_v49 = vcombine.high %v3748_v60, %v3752_v48 }
 0x665   :  { %6598 = vmatpush1.bf16.msra.mxu0 %v7852_v25  ;;  %v7900_v25 = vcombine.low %v3747_v19, %v3751_v20 }
 0x666   :  { %6762 = vmatpush1.bf16.msra.mxu1 %v7854_v30  ;;  %6599 = vmatprep.subr.bf16.mxu0 %v7861_v38  ;;  %v7902_v30 = vcombine.low %v3748_v60, %v3752_v48  ;;  %v7909_v38 = vcombine.high %v3755_v59, %v3759_v55 }
 0x667   :  { %6763 = vmatprep.subr.bf16.mxu1 %v7863_v39  ;;  %v7911_v39 = vcombine.high %v3756_v37, %v3760_v21 }
 0x669   :  { %6600 = vmatpush1.bf16.msra.mxu0 %v7860_v58  ;;  %v7908_v58 = vcombine.low %v3755_v59, %v3759_v55 }
 0x66a   :  { %6764 = vmatpush1.bf16.msra.mxu1 %v7862_v2  ;;  %6601 = vmatprep.subr.bf16.mxu0 %v7869_v1  ;;  %v7910_v2 = vcombine.low %v3756_v37, %v3760_v21  ;;  %v7917_v1 = vcombine.high %v3763_v43, %v3767_v47 }
 0x66b   :  { %6765 = vmatprep.subr.bf16.mxu1 %v7871_v27  ;;  %v3367_v27 = vmul.f32 0.2, %v9220_v62 }
 0x66d   :  { %6602 = vmatpush1.bf16.msra.mxu0 %v7868_v0  ;;  %v3772_v0 = vld [vmem:[#allocation22 + $0xc08] sm:$0xff]  ;;  %v3375_v44 = vmax.f32 %v9220_v62, %v3367_v27  ;;  %v3791_v62 = vld [vmem:[#allocation22 + $0xca0] sm:$0xff] }
 0x66e   :  { %6766 = vmatpush1.bf16.msra.mxu1 %v7870_v40  ;;  %6603 = vmatprep.subr.bf16.mxu0 %v7877_v41  ;;  %v3776_v40 = vld [vmem:[#allocation22 + $0xc28] sm:$0xff]  ;;  %v7916_v41 = vcombine.low %v3763_v43, %v3767_v47 }
 0x66f   :  { %6767 = vmatprep.subr.bf16.mxu1 %v7879_v45  ;;  %v7918_v45 = vcombine.low %v3764_v15, %v3768_v56  ;;  %v7927_v4 = vcombine.high %v3772_v0, %v3776_v40  ;;  %v9243_v22 = vpack.c.bf16 %v3375_v44, %v3375_v44  ;;  %v7926_v9 = vcombine.low %v3772_v0, %v3776_v40  ;;  %v3816_v27 = vld [vmem:[#allocation22 + $0xd68] sm:$0xff]  ;;  %v3819_v0 = vld [vmem:[#allocation22 + $0xd80] sm:$0xff] }
 0x670   :  { %v3823_v40 = vld [vmem:[#allocation22 + $0xda0] sm:$0xff] }
 0x671   :  { %6604 = vmatpush1.bf16.msra.mxu0 %v7876_v5  ;;  %v3779_v5 = vld [vmem:[#allocation22 + $0xc40] sm:$0xff] }
 0x672   :  { %6768 = vmatpush1.bf16.msra.mxu1 %v7878_v6  ;;  %6605 = vmatprep.subr.bf16.mxu0 %v7885_v7  ;;  %v3783_v6 = vld [vmem:[#allocation22 + $0xc60] sm:$0xff]  ;;  %v7924_v7 = vcombine.low %v3771_v3, %v3775_v34 }
 0x673   :  { %6769 = vmatprep.subr.bf16.mxu1 %v7887_v8  ;;  %v3780_v8 = vld [vmem:[#allocation22 + $0xc48] sm:$0xff]  ;;  %v7933_v10 = vcombine.high %v3779_v5, %v3783_v6  ;;  %v7932_v19 = vcombine.low %v3779_v5, %v3783_v6  ;;  %v3827_v5 = vld [vmem:[#allocation22 + $0xdc0] sm:$0xff] }
 0x674   :  { %v7935_v16 = vcombine.high %v3780_v8, %v3784_v29  ;;  %v7934_v20 = vcombine.low %v3780_v8, %v3784_v29  ;;  %v3831_v6 = vld [vmem:[#allocation22 + $0xde0] sm:$0xff]  ;;  %v3832_v8 = vld [vmem:[#allocation22 + $0xde8] sm:$0xff]  ;;  %v7972_v29 = vcombine.low %v3819_v0, %v3823_v40 }
 0x675   :  { %6606 = vmatpush1.bf16.msra.mxu0 %v7884_v11  ;;  %v3787_v11 = vld [vmem:[#allocation22 + $0xc80] sm:$0xff] }
 0x676   :  { %6770 = vmatpush1.bf16.msra.mxu1 %v7886_v12  ;;  %6607 = vmatprep.subr.bf16.mxu0 %v7893_v13  ;;  %v9246_v12 = vpack.c.bf16 %v3378_v33, %v3378_v33  ;;  %v3788_v13 = vld [vmem:[#allocation22 + $0xc88] sm:$0xff]  ;;  %v7941_v60 = vcombine.high %v3787_v11, %v3791_v62  ;;  %v7940_v59 = vcombine.low %v3787_v11, %v3791_v62  ;;  %v3835_v62 = vld [vmem:[#allocation22 + $0xe00] sm:$0xff] }
 0x677   :  { %6771 = vmatprep.subr.bf16.mxu1 %v7895_v18  ;;  %v3792_v18 = vld [vmem:[#allocation22 + $0xca8] sm:$0xff] }
 0x678   :  { %v7943_v48 = vcombine.high %v3788_v13, %v3792_v18  ;;  %v7942_v55 = vcombine.low %v3788_v13, %v3792_v18  ;;  %v3836_v13 = vld [vmem:[#allocation22 + $0xe08] sm:$0xff] }
 0x679   :  { %6608 = vmatpush1.bf16.msra.mxu0 %v7892_v50  ;;  %v3795_v50 = vld [vmem:[#allocation22 + $0xcc0] sm:$0xff]  ;;  %v3840_v18 = vld [vmem:[#allocation22 + $0xe28] sm:$0xff] }
 0x67a   :  { %6772 = vmatpush1.bf16.msra.mxu1 %v7894_v51  ;;  %6609 = vmatprep.subr.bf16.mxu0 %v7901_v53  ;;  %v3799_v51 = vld [vmem:[#allocation22 + $0xce0] sm:$0xff]  ;;  %v3796_v53 = vld [vmem:[#allocation22 + $0xcc8] sm:$0xff] }
 0x67b   :  { %6773 = vmatprep.subr.bf16.mxu1 %v7903_v49  ;;  %v3800_v49 = vld [vmem:[#allocation22 + $0xce8] sm:$0xff]  ;;  %v7949_v37 = vcombine.high %v3795_v50, %v3799_v51  ;;  %v7948_v43 = vcombine.low %v3795_v50, %v3799_v51  ;;  %v3843_v50 = vld [vmem:[#allocation22 + $0xe40] sm:$0xff] }
 0x67c   :  { %v7951_v21 = vcombine.high %v3796_v53, %v3800_v49  ;;  %v7950_v47 = vcombine.low %v3796_v53, %v3800_v49  ;;  %v3847_v51 = vld [vmem:[#allocation22 + $0xe60] sm:$0xff]  ;;  %v3844_v53 = vld [vmem:[#allocation22 + $0xe48] sm:$0xff] }
 0x67d   :  { %6610 = vmatpush1.bf16.msra.mxu0 %v7900_v25  ;;  %v3803_v25 = vld [vmem:[#allocation22 + $0xd00] sm:$0xff]  ;;  %v3848_v49 = vld [vmem:[#allocation22 + $0xe68] sm:$0xff] }
 0x67e   :  { %6774 = vmatpush1.bf16.msra.mxu1 %v7902_v30  ;;  %6611 = vmatprep.subr.bf16.mxu0 %v7909_v38  ;;  %v3807_v30 = vld [vmem:[#allocation22 + $0xd20] sm:$0xff]  ;;  %v3804_v38 = vld [vmem:[#allocation22 + $0xd08] sm:$0xff] }
 0x67f   :  { %6775 = vmatprep.subr.bf16.mxu1 %v7911_v39  ;;  %v3808_v39 = vld [vmem:[#allocation22 + $0xd28] sm:$0xff]  ;;  %v7957_v15 = vcombine.high %v3803_v25, %v3807_v30 }
 0x680   :  { %v7959_v56 = vcombine.high %v3804_v38, %v3808_v39  ;;  %v7958_v3 = vcombine.low %v3804_v38, %v3808_v39  ;;  %v3852_v38 = vld [vmem:[#allocation22 + $0xe88] sm:$0xff] }
 0x681   :  { %6612 = vmatpush1.bf16.msra.mxu0 %v7908_v58  ;;  %v3811_v58 = vld [vmem:[#allocation22 + $0xd40] sm:$0xff]  ;;  %v3856_v39 = vld [vmem:[#allocation22 + $0xea8] sm:$0xff] }
 0x682   :  { %6776 = vmatpush1.bf16.msra.mxu1 %v7910_v2  ;;  %6613 = vmatprep.subr.bf16.mxu0 %v7917_v1  ;;  %v3815_v2 = vld [vmem:[#allocation22 + $0xd60] sm:$0xff]  ;;  %v3812_v1 = vld [vmem:[#allocation22 + $0xd48] sm:$0xff] }
 0x683   :  { %6777 = vmatprep.subr.bf16.mxu1 %v7919_v17  ;;  %v7956_v17 = vcombine.low %v3803_v25, %v3807_v30  ;;  %v7965_v34 = vcombine.high %v3811_v58, %v3815_v2  ;;  %v7967_v61 = vcombine.high %v3812_v1, %v3816_v27  ;;  %v7964_v44 = vcombine.low %v3811_v58, %v3815_v2  ;;  %v3851_v25 = vld [vmem:[#allocation22 + $0xe80] sm:$0xff] }
 0x684   :  { %v3855_v30 = vld [vmem:[#allocation22 + $0xea0] sm:$0xff] }
 0x685   :  { %6614 = vmatpush1.bf16.msra.mxu0 %v7916_v41  ;;  %v3820_v41 = vld [vmem:[#allocation22 + $0xd88] sm:$0xff]  ;;  %v3859_v58 = vld [vmem:[#allocation22 + $0xec0] sm:$0xff] }
 0x686   :  { %6778 = vmatpush1.bf16.msra.mxu1 %v7918_v45  ;;  %6624 = vmatprep.subr.bf16.mxu0 %v7925_v46  ;;  %v3824_v45 = vld [vmem:[#allocation22 + $0xda8] sm:$0xff]  ;;  %v7966_v46 = vcombine.low %v3812_v1, %v3816_v27  ;;  %v3863_v2 = vld [vmem:[#allocation22 + $0xee0] sm:$0xff] }
 0x687   :  { %6788 = vmatprep.subr.bf16.mxu1 %v7927_v4  ;;  %v7973_v4 = vcombine.high %v3819_v0, %v3823_v40  ;;  %v7975_v33 = vcombine.high %v3820_v41, %v3824_v45  ;;  %v3860_v1 = vld [vmem:[#allocation22 + $0xec8] sm:$0xff]  ;;  %v3867_v0 = vld [vmem:[#allocation22 + $0xf00] sm:$0xff] }
 0x688   :  { %6616 = vmatmul.mubr.bf16.vlgmr.msra.gmra.mrb[16].mxu0 %v9243_v22  ;;  %v3864_v27 = vld [vmem:[#allocation22 + $0xee8] sm:$0xff]  ;;  %v3871_v40 = vld [vmem:[#allocation22 + $0xf20] sm:$0xff] }
 0x689   :  { %6780 = vmatmul.mubr.bf16.vlgmr.msra.gmra.mrb[16].mxu1 %v9243_v22  ;;  %6625 = vmatpush1.bf16.msra.mxu0 %v7924_v7  ;;  %v3828_v7 = vld [vmem:[#allocation22 + $0xdc8] sm:$0xff] }
 0x68a   :  { %6656 = vmatprep.mubr.bf16.mxu0 %v9246_v12  ;;  %6789 = vmatpush1.bf16.msra.mxu1 %v7926_v9  ;;  %v7974_v9 = vcombine.low %v3820_v41, %v3824_v45  ;;  %v7983_v11 = vcombine.high %v3828_v7, %v3832_v8  ;;  %v3868_v41 = vld [vmem:[#allocation22 + $0xf08] sm:$0xff] }
 0x68b   :  { %6820 = vmatprep.mubr.bf16.mxu1 %v9246_v12  ;;  %6626 = vmatprep.subr.bf16.mxu0 %v7933_v10  ;;  %v7981_v10 = vcombine.high %v3827_v5, %v3831_v6  ;;  %v3872_v45 = vld [vmem:[#allocation22 + $0xf28] sm:$0xff] }
 0x68c   :  { %6790 = vmatprep.subr.bf16.mxu1 %v7935_v16  ;;  %v3839_v16 = vld [vmem:[#allocation22 + $0xe20] sm:$0xff] }
 0x68d   :  { %6627 = vmatpush1.bf16.msra.mxu0 %v7932_v19  ;;  %v7980_v19 = vcombine.low %v3827_v5, %v3831_v6  ;;  %v3875_v5 = vld [vmem:[#allocation22 + $0xf40] sm:$0xff] }
 0x68e   :  { %6791 = vmatpush1.bf16.msra.mxu1 %v7934_v20  ;;  %6628 = vmatprep.subr.bf16.mxu0 %v7941_v60  ;;  %v7982_v20 = vcombine.low %v3828_v7, %v3832_v8  ;;  %v7989_v60 = vcombine.high %v3835_v62, %v3839_v16  ;;  %v3879_v6 = vld [vmem:[#allocation22 + $0xf60] sm:$0xff]  ;;  %v3876_v7 = vld [vmem:[#allocation22 + $0xf48] sm:$0xff] }
 0x68f   :  { %6792 = vmatprep.subr.bf16.mxu1 %v7943_v48  ;;  %v7991_v48 = vcombine.high %v3836_v13, %v3840_v18  ;;  %v3880_v8 = vld [vmem:[#allocation22 + $0xf68] sm:$0xff] }
 0x691   :  { %6629 = vmatpush1.bf16.msra.mxu0 %v7940_v59  ;;  %v7988_v59 = vcombine.low %v3835_v62, %v3839_v16  ;;  %v3883_v62 = vld [vmem:[#allocation22 + $0xf80] sm:$0xff] }
 0x692   :  { %6793 = vmatpush1.bf16.msra.mxu1 %v7942_v55  ;;  %6630 = vmatprep.subr.bf16.mxu0 %v7949_v37  ;;  %v7990_v55 = vcombine.low %v3836_v13, %v3840_v18  ;;  %v7997_v37 = vcombine.high %v3843_v50, %v3847_v51  ;;  %v3887_v16 = vld [vmem:[#allocation22 + $0xfa0] sm:$0xff]  ;;  %v3884_v13 = vld [vmem:[#allocation22 + $0xf88] sm:$0xff] }
 0x693   :  { %6794 = vmatprep.subr.bf16.mxu1 %v7951_v21  ;;  %v7999_v21 = vcombine.high %v3844_v53, %v3848_v49  ;;  %v3888_v18 = vld [vmem:[#allocation22 + $0xfa8] sm:$0xff] }
 0x695   :  { %6631 = vmatpush1.bf16.msra.mxu0 %v7948_v43  ;;  %v7996_v43 = vcombine.low %v3843_v50, %v3847_v51  ;;  %v3891_v50 = vld [vmem:[#allocation22 + $0xfc0] sm:$0xff] }
 0x696   :  { %6795 = vmatpush1.bf16.msra.mxu1 %v7950_v47  ;;  %6632 = vmatprep.subr.bf16.mxu0 %v7957_v15  ;;  %v7998_v47 = vcombine.low %v3844_v53, %v3848_v49  ;;  %v8005_v15 = vcombine.high %v3851_v25, %v3855_v30  ;;  %v3895_v51 = vld [vmem:[#allocation22 + $0xfe0] sm:$0xff]  ;;  %v3892_v53 = vld [vmem:[#allocation22 + $0xfc8] sm:$0xff] }
 0x697   :  { %6796 = vmatprep.subr.bf16.mxu1 %v7959_v56  ;;  %v8007_v56 = vcombine.high %v3852_v38, %v3856_v39  ;;  %v3896_v49 = vld [vmem:[#allocation22 + $0xfe8] sm:$0xff] }
 0x699   :  { %6633 = vmatpush1.bf16.msra.mxu0 %v7956_v17  ;;  %v8004_v17 = vcombine.low %v3851_v25, %v3855_v30  ;;  %v8047_v25 = vcombine.high %v3892_v53, %v3896_v49  ;;  %v3389_v30 = vld [vmem:[#allocation22 + $0x10] sm:$0xff] }
 0x69a   :  { %6797 = vmatpush1.bf16.msra.mxu1 %v7958_v3  ;;  %6634 = vmatprep.subr.bf16.mxu0 %v7965_v34  ;;  %v8006_v3 = vcombine.low %v3852_v38, %v3856_v39  ;;  %v8013_v34 = vcombine.high %v3859_v58, %v3863_v2  ;;  %v3393_v38 = vld [vmem:[#allocation22 + $0x30] sm:$0xff]  ;;  %v3390_v39 = vld [vmem:[#allocation22 + $0x18] sm:$0xff] }
 0x69b   :  { %6798 = vmatprep.subr.bf16.mxu1 %v7967_v61  ;;  %v8015_v61 = vcombine.high %v3860_v1, %v3864_v27 }
 0x69d   :  { %6635 = vmatpush1.bf16.msra.mxu0 %v7964_v44  ;;  %v8012_v44 = vcombine.low %v3859_v58, %v3863_v2  ;;  %v7545_v58 = vcombine.high %v3389_v30, %v3393_v38 }
 0x69e   :  { %6799 = vmatpush1.bf16.msra.mxu1 %v7966_v46  ;;  %6636 = vmatprep.subr.bf16.mxu0 %v7973_v4  ;;  %v8014_v46 = vcombine.low %v3860_v1, %v3864_v27  ;;  %v8021_v4 = vcombine.high %v3867_v0, %v3871_v40  ;;  %v3397_v1 = vld [vmem:[#allocation22 + $0x50] sm:$0xff] }
 0x69f   :  { %6800 = vmatprep.subr.bf16.mxu1 %v7975_v33  ;;  %v8023_v33 = vcombine.high %v3868_v41, %v3872_v45  ;;  %v3401_v27 = vld [vmem:[#allocation22 + $0x70] sm:$0xff] }
 0x6a1   :  { %6637 = vmatpush1.bf16.msra.mxu0 %v7972_v29  ;;  %v8020_v29 = vcombine.low %v3867_v0, %v3871_v40  ;;  %v7553_v40 = vcombine.high %v3397_v1, %v3401_v27 }
 0x6a2   :  { %6801 = vmatpush1.bf16.msra.mxu1 %v7974_v9  ;;  %6638 = vmatprep.subr.bf16.mxu0 %v7981_v10  ;;  %v8022_v9 = vcombine.low %v3868_v41, %v3872_v45  ;;  %v8029_v10 = vcombine.high %v3875_v5, %v3879_v6  ;;  %v3405_v41 = vld [vmem:[#allocation22 + $0x90] sm:$0xff] }
 0x6a3   :  { %6802 = vmatprep.subr.bf16.mxu1 %v7983_v11  ;;  %v8031_v11 = vcombine.high %v3876_v7, %v3880_v8  ;;  %v3409_v45 = vld [vmem:[#allocation22 + $0xb0] sm:$0xff] }
 0x6a5   :  { %6639 = vmatpush1.bf16.msra.mxu0 %v7980_v19  ;;  %v8028_v19 = vcombine.low %v3875_v5, %v3879_v6  ;;  %v7561_v5 = vcombine.high %v3405_v41, %v3409_v45 }
 0x6a6   :  { %6803 = vmatpush1.bf16.msra.mxu1 %v7982_v20  ;;  %6640 = vmatprep.subr.bf16.mxu0 %v7989_v60  ;;  %v8030_v20 = vcombine.low %v3876_v7, %v3880_v8  ;;  %v8037_v60 = vcombine.high %v3883_v62, %v3887_v16  ;;  %v3413_v7 = vld [vmem:[#allocation22 + $0xd0] sm:$0xff] }
 0x6a7   :  { %6804 = vmatprep.subr.bf16.mxu1 %v7991_v48  ;;  %v8039_v48 = vcombine.high %v3884_v13, %v3888_v18  ;;  %v3417_v8 = vld [vmem:[#allocation22 + $0xf0] sm:$0xff] }
 0x6a9   :  { %6641 = vmatpush1.bf16.msra.mxu0 %v7988_v59  ;;  %v8036_v59 = vcombine.low %v3883_v62, %v3887_v16  ;;  %v7569_v62 = vcombine.high %v3413_v7, %v3417_v8 }
 0x6aa   :  { %6805 = vmatpush1.bf16.msra.mxu1 %v7990_v55  ;;  %6642 = vmatprep.subr.bf16.mxu0 %v7997_v37  ;;  %v8038_v55 = vcombine.low %v3884_v13, %v3888_v18  ;;  %v8045_v37 = vcombine.high %v3891_v50, %v3895_v51  ;;  %v3421_v13 = vld [vmem:[#allocation22 + $0x110] sm:$0xff] }
 0x6ab   :  { %6806 = vmatprep.subr.bf16.mxu1 %v7999_v21  ;;  %v3369_v21 = vmul.f32 0.2, %v9225_v42  ;;  %v3425_v18 = vld [vmem:[#allocation22 + $0x130] sm:$0xff] }
 0x6ad   :  { %6643 = vmatpush1.bf16.msra.mxu0 %v7996_v43  ;;  %v3394_v43 = vld [vmem:[#allocation22 + $0x38] sm:$0xff] }
 0x6ae   :  { %6807 = vmatpush1.bf16.msra.mxu1 %v7998_v47  ;;  %6644 = vmatprep.subr.bf16.mxu0 %v8005_v15  ;;  %v8044_v47 = vcombine.low %v3891_v50, %v3895_v51  ;;  %v8046_v15 = vcombine.low %v3892_v53, %v3896_v49  ;;  %v7547_v2 = vcombine.high %v3390_v39, %v3394_v43  ;;  %v3429_v51 = vld [vmem:[#allocation22 + $0x150] sm:$0xff]  ;;  %v3430_v49 = vld [vmem:[#allocation22 + $0x158] sm:$0xff] }
 0x6af   :  { %6808 = vmatprep.subr.bf16.mxu1 %v8007_v56  ;;  %v3377_v56 = vmax.f32 %v9225_v42, %v3369_v21  ;;  %v7546_v0 = vcombine.low %v3390_v39, %v3394_v43  ;;  %v3433_v53 = vld [vmem:[#allocation22 + $0x170] sm:$0xff]  ;;  %v3438_v39 = vld [vmem:[#allocation22 + $0x198] sm:$0xff] }
 0x6b0   :  { %v7585_v21 = vcombine.high %v3429_v51, %v3433_v53  ;;  %v3442_v43 = vld [vmem:[#allocation22 + $0x1b8] sm:$0xff] }
 0x6b1   :  { %6645 = vmatpush1.bf16.msra.mxu0 %v8004_v17  ;;  %v7544_v17 = vcombine.low %v3389_v30, %v3393_v38  ;;  %v3437_v30 = vld [vmem:[#allocation22 + $0x190] sm:$0xff] }
 0x6b2   :  { %6809 = vmatpush1.bf16.msra.mxu1 %v8006_v3  ;;  %6646 = vmatprep.subr.bf16.mxu0 %v8013_v34  ;;  %v3398_v3 = vld [vmem:[#allocation22 + $0x58] sm:$0xff]  ;;  %v3441_v38 = vld [vmem:[#allocation22 + $0x1b0] sm:$0xff] }
 0x6b3   :  { %6810 = vmatprep.subr.bf16.mxu1 %v8015_v61  ;;  %v3402_v34 = vld [vmem:[#allocation22 + $0x78] sm:$0xff]  ;;  %v9253_v61 = vpack.c.bf16 %v3377_v56, %v3377_v56  ;;  %v7593_v56 = vcombine.high %v3437_v30, %v3441_v38 }
 0x6b4   :  { %v7555_v42 = vcombine.high %v3398_v3, %v3402_v34 }
 0x6b5   :  { %6647 = vmatpush1.bf16.msra.mxu0 %v8012_v44  ;;  %v3406_v44 = vld [vmem:[#allocation22 + $0x98] sm:$0xff] }
 0x6b6   :  { %6811 = vmatpush1.bf16.msra.mxu1 %v8014_v46  ;;  %6648 = vmatprep.subr.bf16.mxu0 %v8021_v4  ;;  %v3410_v46 = vld [vmem:[#allocation22 + $0xb8] sm:$0xff]  ;;  %v7552_v4 = vcombine.low %v3397_v1, %v3401_v27  ;;  %v3449_v1 = vld [vmem:[#allocation22 + $0x1f0] sm:$0xff] }
 0x6b7   :  { %6812 = vmatprep.subr.bf16.mxu1 %v8023_v33  ;;  %v7554_v33 = vcombine.low %v3398_v3, %v3402_v34  ;;  %v7563_v6 = vcombine.high %v3406_v44, %v3410_v46  ;;  %v3446_v27 = vld [vmem:[#allocation22 + $0x1d8] sm:$0xff]  ;;  %v7592_v3 = vcombine.low %v3437_v30, %v3441_v38  ;;  %v7594_v34 = vcombine.low %v3438_v39, %v3442_v43  ;;  %v3489_v30 = vld [vmem:[#allocation22 + $0x330] sm:$0xff] }
 0x6b8   :  { %v3486_v38 = vld [vmem:[#allocation22 + $0x318] sm:$0xff] }
 0x6b9   :  { %6649 = vmatpush1.bf16.msra.mxu0 %v8020_v29  ;;  %v3414_v29 = vld [vmem:[#allocation22 + $0xd8] sm:$0xff] }
 0x6ba   :  { %6813 = vmatpush1.bf16.msra.mxu1 %v8022_v9  ;;  %6650 = vmatprep.subr.bf16.mxu0 %v8029_v10  ;;  %v3418_v9 = vld [vmem:[#allocation22 + $0xf8] sm:$0xff]  ;;  %v7560_v10 = vcombine.low %v3405_v41, %v3409_v45  ;;  %v3453_v41 = vld [vmem:[#allocation22 + $0x210] sm:$0xff] }
 0x6bb   :  { %6814 = vmatprep.subr.bf16.mxu1 %v8031_v11  ;;  %v7562_v11 = vcombine.low %v3406_v44, %v3410_v46  ;;  %v7571_v16 = vcombine.high %v3414_v29, %v3418_v9  ;;  %v3457_v45 = vld [vmem:[#allocation22 + $0x230] sm:$0xff]  ;;  %v3458_v44 = vld [vmem:[#allocation22 + $0x238] sm:$0xff] }
 0x6bd   :  { %6651 = vmatpush1.bf16.msra.mxu0 %v8028_v19  ;;  %v3422_v19 = vld [vmem:[#allocation22 + $0x118] sm:$0xff] }
 0x6be   :  { %6815 = vmatpush1.bf16.msra.mxu1 %v8030_v20  ;;  %6652 = vmatprep.subr.bf16.mxu0 %v8037_v60  ;;  %v3426_v20 = vld [vmem:[#allocation22 + $0x138] sm:$0xff]  ;;  %v7570_v60 = vcombine.low %v3414_v29, %v3418_v9  ;;  %v7608_v9 = vcombine.low %v3453_v41, %v3457_v45 }
 0x6bf   :  { %6816 = vmatprep.subr.bf16.mxu1 %v8039_v48  ;;  %v7577_v48 = vcombine.high %v3421_v13, %v3425_v18  ;;  %v7579_v50 = vcombine.high %v3422_v19, %v3426_v20  ;;  %v3466_v29 = vld [vmem:[#allocation22 + $0x278] sm:$0xff] }
 0x6c1   :  { %6653 = vmatpush1.bf16.msra.mxu0 %v8036_v59  ;;  %v3434_v59 = vld [vmem:[#allocation22 + $0x178] sm:$0xff] }
 0x6c2   :  { %6817 = vmatpush1.bf16.msra.mxu1 %v8038_v55  ;;  %6654 = vmatprep.subr.bf16.mxu0 %v8045_v37  ;;  %v7576_v55 = vcombine.low %v3421_v13, %v3425_v18  ;;  %v7578_v37 = vcombine.low %v3422_v19, %v3426_v20  ;;  %v3473_v13 = vld [vmem:[#allocation22 + $0x2b0] sm:$0xff]  ;;  %v3470_v18 = vld [vmem:[#allocation22 + $0x298] sm:$0xff] }
 0x6c3   :  { %6818 = vmatprep.subr.bf16.mxu1 %v8047_v25  ;;  %v7587_v25 = vcombine.high %v3430_v49, %v3434_v59  ;;  %v3474_v19 = vld [vmem:[#allocation22 + $0x2b8] sm:$0xff] }
 0x6c5   :  { %6655 = vmatpush1.bf16.msra.mxu0 %v8044_v47  ;;  %v7584_v47 = vcombine.low %v3429_v51, %v3433_v53  ;;  %v3481_v51 = vld [vmem:[#allocation22 + $0x2f0] sm:$0xff]  ;;  %v3478_v53 = vld [vmem:[#allocation22 + $0x2d8] sm:$0xff] }
 0x6c6   :  { %6819 = vmatpush1.bf16.msra.mxu1 %v8046_v15  ;;  %6829 = vmatprep.subr.bf16.mxu0 %v7545_v58  ;;  %v7586_v15 = vcombine.low %v3430_v49, %v3434_v59  ;;  %v7595_v58 = vcombine.high %v3438_v39, %v3442_v43  ;;  %v3482_v49 = vld [vmem:[#allocation22 + $0x2f8] sm:$0xff] }
 0x6c7   :  { %6993 = vmatprep.subr.bf16.mxu1 %v7547_v2  ;;  %v3445_v2 = vld [vmem:[#allocation22 + $0x1d0] sm:$0xff]  ;;  %v3490_v39 = vld [vmem:[#allocation22 + $0x338] sm:$0xff] }
 0x6c8   :  { %6657 = vmatmul.mubr.bf16.vlgmr.msra.gmra.mrb[16].mxu0 %v9253_v61  ;;  %v7600_v46 = vcombine.low %v3445_v2, %v3449_v1 }
 0x6c9   :  { %6821 = vmatmul.mubr.bf16.vlgmr.msra.gmra.mrb[16].mxu1 %v9253_v61  ;;  %6830 = vmatpush1.bf16.msra.mxu0 %v7544_v17  ;;  %v3450_v17 = vld [vmem:[#allocation22 + $0x1f8] sm:$0xff] }
 0x6ca   :  { %6861 = vmatprep.mubr.bf16.mxu0 %v9197_v26  ;;  %6994 = vmatpush1.bf16.msra.mxu1 %v7546_v0  ;;  %v7601_v0 = vcombine.high %v3445_v2, %v3449_v1  ;;  %v3497_v2 = vld [vmem:[#allocation22 + $0x370] sm:$0xff]  ;;  %v3494_v1 = vld [vmem:[#allocation22 + $0x358] sm:$0xff] }
 0x6cb   :  { %7025 = vmatprep.mubr.bf16.mxu1 %v9197_v26  ;;  %6831 = vmatprep.subr.bf16.mxu0 %v7553_v40  ;;  %v7568_v26 = vcombine.low %v3413_v7, %v3417_v8  ;;  %v7603_v40 = vcombine.high %v3446_v27, %v3450_v17  ;;  %v3465_v7 = vld [vmem:[#allocation22 + $0x270] sm:$0xff]  ;;  %v3462_v8 = vld [vmem:[#allocation22 + $0x258] sm:$0xff] }
 0x6cc   :  { %6995 = vmatprep.subr.bf16.mxu1 %v7555_v42  ;;  %v3454_v42 = vld [vmem:[#allocation22 + $0x218] sm:$0xff] }
 0x6cd   :  { %6832 = vmatpush1.bf16.msra.mxu0 %v7552_v4  ;;  %v7602_v4 = vcombine.low %v3446_v27, %v3450_v17  ;;  %v3498_v27 = vld [vmem:[#allocation22 + $0x378] sm:$0xff] }
 0x6ce   :  { %6996 = vmatpush1.bf16.msra.mxu1 %v7554_v33  ;;  %6833 = vmatprep.subr.bf16.mxu0 %v7561_v5  ;;  %v7609_v33 = vcombine.high %v3453_v41, %v3457_v45  ;;  %v7611_v5 = vcombine.high %v3454_v42, %v3458_v44  ;;  %v3505_v41 = vld [vmem:[#allocation22 + $0x3b0] sm:$0xff]  ;;  %v3502_v45 = vld [vmem:[#allocation22 + $0x398] sm:$0xff] }
 0x6cf   :  { %6997 = vmatprep.subr.bf16.mxu1 %v7563_v6  ;;  %v3461_v6 = vld [vmem:[#allocation22 + $0x250] sm:$0xff] }
 0x6d0   :  { %v7616_v20 = vcombine.low %v3461_v6, %v3465_v7 }
 0x6d1   :  { %6834 = vmatpush1.bf16.msra.mxu0 %v7560_v10  ;;  %v7610_v10 = vcombine.low %v3454_v42, %v3458_v44  ;;  %v3506_v42 = vld [vmem:[#allocation22 + $0x3b8] sm:$0xff] }
 0x6d2   :  { %6998 = vmatpush1.bf16.msra.mxu1 %v7562_v11  ;;  %6835 = vmatprep.subr.bf16.mxu0 %v7569_v62  ;;  %v7617_v11 = vcombine.high %v3461_v6, %v3465_v7  ;;  %v7619_v62 = vcombine.high %v3462_v8, %v3466_v29  ;;  %v3513_v6 = vld [vmem:[#allocation22 + $0x3f0] sm:$0xff]  ;;  %v3510_v7 = vld [vmem:[#allocation22 + $0x3d8] sm:$0xff] }
 0x6d3   :  { %6999 = vmatprep.subr.bf16.mxu1 %v7571_v16  ;;  %v3469_v16 = vld [vmem:[#allocation22 + $0x290] sm:$0xff] }
 0x6d4   :  { %v7624_v59 = vcombine.low %v3469_v16, %v3473_v13 }
 0x6d5   :  { %6836 = vmatpush1.bf16.msra.mxu0 %v7568_v26  ;;  %v7618_v26 = vcombine.low %v3462_v8, %v3466_v29  ;;  %v3514_v8 = vld [vmem:[#allocation22 + $0x3f8] sm:$0xff] }
 0x6d6   :  { %7000 = vmatpush1.bf16.msra.mxu1 %v7570_v60  ;;  %6837 = vmatprep.subr.bf16.mxu0 %v7577_v48  ;;  %v7625_v60 = vcombine.high %v3469_v16, %v3473_v13  ;;  %v7627_v48 = vcombine.high %v3470_v18, %v3474_v19  ;;  %v3521_v16 = vld [vmem:[#allocation22 + $0x430] sm:$0xff]  ;;  %v3518_v13 = vld [vmem:[#allocation22 + $0x418] sm:$0xff] }
 0x6d7   :  { %7001 = vmatprep.subr.bf16.mxu1 %v7579_v50  ;;  %v3477_v50 = vld [vmem:[#allocation22 + $0x2d0] sm:$0xff] }
 0x6d8   :  { %v7632_v43 = vcombine.low %v3477_v50, %v3481_v51 }
 0x6d9   :  { %6838 = vmatpush1.bf16.msra.mxu0 %v7576_v55  ;;  %v7626_v55 = vcombine.low %v3470_v18, %v3474_v19  ;;  %v3522_v18 = vld [vmem:[#allocation22 + $0x438] sm:$0xff] }
 0x6da   :  { %7002 = vmatpush1.bf16.msra.mxu1 %v7578_v37  ;;  %6839 = vmatprep.subr.bf16.mxu0 %v7585_v21  ;;  %v7633_v37 = vcombine.high %v3477_v50, %v3481_v51  ;;  %v7635_v21 = vcombine.high %v3478_v53, %v3482_v49  ;;  %v3529_v50 = vld [vmem:[#allocation22 + $0x470] sm:$0xff] }
 0x6db   :  { %7003 = vmatprep.subr.bf16.mxu1 %v7587_v25  ;;  %v3485_v25 = vld [vmem:[#allocation22 + $0x310] sm:$0xff] }
 0x6dc   :  { %v7640_v17 = vcombine.low %v3485_v25, %v3489_v30 }
 0x6dd   :  { %6840 = vmatpush1.bf16.msra.mxu0 %v7584_v47  ;;  %v7634_v47 = vcombine.low %v3478_v53, %v3482_v49  ;;  %v3526_v53 = vld [vmem:[#allocation22 + $0x458] sm:$0xff] }
 0x6de   :  { %7004 = vmatpush1.bf16.msra.mxu1 %v7586_v15  ;;  %6841 = vmatprep.subr.bf16.mxu0 %v7593_v56  ;;  %v7641_v15 = vcombine.high %v3485_v25, %v3489_v30  ;;  %v7643_v56 = vcombine.high %v3486_v38, %v3490_v39  ;;  %v3530_v49 = vld [vmem:[#allocation22 + $0x478] sm:$0xff] }
 0x6df   :  { %7005 = vmatprep.subr.bf16.mxu1 %v7595_v58  ;;  %v3493_v58 = vld [vmem:[#allocation22 + $0x350] sm:$0xff]  ;;  %v7683_v25 = vcombine.high %v3526_v53, %v3530_v49  ;;  %v3534_v30 = vld [vmem:[#allocation22 + $0x498] sm:$0xff] }
 0x6e0   :  { %v7648_v44 = vcombine.low %v3493_v58, %v3497_v2 }
 0x6e1   :  { %6842 = vmatpush1.bf16.msra.mxu0 %v7592_v3  ;;  %v7642_v3 = vcombine.low %v3486_v38, %v3490_v39  ;;  %v3538_v38 = vld [vmem:[#allocation22 + $0x4b8] sm:$0xff] }
 0x6e2   :  { %7006 = vmatpush1.bf16.msra.mxu1 %v7594_v34  ;;  %6843 = vmatprep.subr.bf16.mxu0 %v7601_v0  ;;  %v7649_v34 = vcombine.high %v3493_v58, %v3497_v2  ;;  %v7651_v0 = vcombine.high %v3494_v1, %v3498_v27  ;;  %v3545_v58 = vld [vmem:[#allocation22 + $0x4f0] sm:$0xff]  ;;  %v3542_v2 = vld [vmem:[#allocation22 + $0x4d8] sm:$0xff] }
 0x6e3   :  { %7007 = vmatprep.subr.bf16.mxu1 %v7603_v40  ;;  %v3501_v40 = vld [vmem:[#allocation22 + $0x390] sm:$0xff] }
 0x6e4   :  { %v7656_v29 = vcombine.low %v3501_v40, %v3505_v41 }
 0x6e5   :  { %6844 = vmatpush1.bf16.msra.mxu0 %v7600_v46  ;;  %v7650_v46 = vcombine.low %v3494_v1, %v3498_v27  ;;  %v3546_v1 = vld [vmem:[#allocation22 + $0x4f8] sm:$0xff] }
 0x6e6   :  { %7008 = vmatpush1.bf16.msra.mxu1 %v7602_v4  ;;  %6845 = vmatprep.subr.bf16.mxu0 %v7609_v33  ;;  %v7657_v4 = vcombine.high %v3501_v40, %v3505_v41  ;;  %v7659_v33 = vcombine.high %v3502_v45, %v3506_v42  ;;  %v3550_v40 = vld [vmem:[#allocation22 + $0x518] sm:$0xff] }
 0x6e7   :  { %7009 = vmatprep.subr.bf16.mxu1 %v7611_v5  ;;  %v3509_v5 = vld [vmem:[#allocation22 + $0x3d0] sm:$0xff]  ;;  %v3554_v41 = vld [vmem:[#allocation22 + $0x538] sm:$0xff] }
 0x6e8   :  { %v7664_v19 = vcombine.low %v3509_v5, %v3513_v6 }
 0x6e9   :  { %6846 = vmatpush1.bf16.msra.mxu0 %v7608_v9  ;;  %v7658_v9 = vcombine.low %v3502_v45, %v3506_v42  ;;  %v7698_v45 = vcombine.low %v3542_v2, %v3546_v1 }
 0x6ea   :  { %7010 = vmatpush1.bf16.msra.mxu1 %v7610_v10  ;;  %6847 = vmatprep.subr.bf16.mxu0 %v7617_v11  ;;  %v7665_v10 = vcombine.high %v3509_v5, %v3513_v6  ;;  %v7667_v11 = vcombine.high %v3510_v7, %v3514_v8  ;;  %v3562_v5 = vld [vmem:[#allocation22 + $0x578] sm:$0xff] }
 0x6eb   :  { %7011 = vmatprep.subr.bf16.mxu1 %v7619_v62  ;;  %v3517_v62 = vld [vmem:[#allocation22 + $0x410] sm:$0xff] }
 0x6ec   :  { %v7672_v51 = vcombine.low %v3517_v62, %v3521_v16 }
 0x6ed   :  { %6848 = vmatpush1.bf16.msra.mxu0 %v7616_v20  ;;  %v7666_v20 = vcombine.low %v3510_v7, %v3514_v8  ;;  %v7706_v7 = vcombine.low %v3550_v40, %v3554_v41 }
 0x6ee   :  { %7012 = vmatpush1.bf16.msra.mxu1 %v7618_v26  ;;  %6849 = vmatprep.subr.bf16.mxu0 %v7625_v60  ;;  %v7673_v26 = vcombine.high %v3517_v62, %v3521_v16  ;;  %v7675_v60 = vcombine.high %v3518_v13, %v3522_v18  ;;  %v3570_v62 = vld [vmem:[#allocation22 + $0x5b8] sm:$0xff] }
 0x6ef   :  { %7013 = vmatprep.subr.bf16.mxu1 %v7627_v48  ;;  %v3525_v48 = vld [vmem:[#allocation22 + $0x450] sm:$0xff] }
 0x6f0   :  { %v7680_v39 = vcombine.low %v3525_v48, %v3529_v50 }
 0x6f1   :  { %6850 = vmatpush1.bf16.msra.mxu0 %v7624_v59  ;;  %v7674_v59 = vcombine.low %v3518_v13, %v3522_v18 }
 0x6f2   :  { %7014 = vmatpush1.bf16.msra.mxu1 %v7626_v55  ;;  %6851 = vmatprep.subr.bf16.mxu0 %v7633_v37  ;;  %v7681_v55 = vcombine.high %v3525_v48, %v3529_v50  ;;  %v3533_v37 = vld [vmem:[#allocation22 + $0x490] sm:$0xff]  ;;  %v3578_v48 = vld [vmem:[#allocation22 + $0x5f8] sm:$0xff] }
 0x6f3   :  { %7015 = vmatprep.subr.bf16.mxu1 %v7635_v21  ;;  %v3537_v21 = vld [vmem:[#allocation22 + $0x4b0] sm:$0xff] }
 0x6f4   :  { %v7688_v27 = vcombine.low %v3533_v37, %v3537_v21 }
 0x6f5   :  { %6852 = vmatpush1.bf16.msra.mxu0 %v7632_v43  ;;  %v7682_v43 = vcombine.low %v3526_v53, %v3530_v49 }
 0x6f6   :  { %7016 = vmatpush1.bf16.msra.mxu1 %v7634_v47  ;;  %6853 = vmatprep.subr.bf16.mxu0 %v7641_v15  ;;  %v7689_v47 = vcombine.high %v3533_v37, %v3537_v21  ;;  %v7691_v15 = vcombine.high %v3534_v30, %v3538_v38  ;;  %v3582_v37 = vld [vmem:[#allocation22 + $0x618] sm:$0xff] }
 0x6f7   :  { %7017 = vmatprep.subr.bf16.mxu1 %v7643_v56  ;;  %v3541_v56 = vld [vmem:[#allocation22 + $0x4d0] sm:$0xff]  ;;  %v3586_v21 = vld [vmem:[#allocation22 + $0x638] sm:$0xff] }
 0x6f9   :  { %6854 = vmatpush1.bf16.msra.mxu0 %v7640_v17  ;;  %v7697_v17 = vcombine.high %v3541_v56, %v3545_v58 }
 0x6fa   :  { %7018 = vmatpush1.bf16.msra.mxu1 %v7642_v3  ;;  %6855 = vmatprep.subr.bf16.mxu0 %v7649_v34  ;;  %v7699_v3 = vcombine.high %v3542_v2, %v3546_v1  ;;  %v3549_v34 = vld [vmem:[#allocation22 + $0x510] sm:$0xff]  ;;  %v7738_v2 = vcombine.low %v3582_v37, %v3586_v21 }
 0x6fb   :  { %7019 = vmatprep.subr.bf16.mxu1 %v7651_v0  ;;  %v3553_v0 = vld [vmem:[#allocation22 + $0x530] sm:$0xff] }
 0x6fc   :  { %v7705_v42 = vcombine.high %v3549_v34, %v3553_v0  ;;  %v7704_v6 = vcombine.low %v3549_v34, %v3553_v0  ;;  %v3602_v34 = vld [vmem:[#allocation22 + $0x6b8] sm:$0xff] }
 0x6fd   :  { %6856 = vmatpush1.bf16.msra.mxu0 %v7648_v44  ;;  %v7707_v44 = vcombine.high %v3550_v40, %v3554_v41 }
 0x6fe   :  { %7020 = vmatpush1.bf16.msra.mxu1 %v7650_v46  ;;  %6857 = vmatprep.subr.bf16.mxu0 %v7657_v4  ;;  %v3557_v46 = vld [vmem:[#allocation22 + $0x550] sm:$0xff] }
 0x6ff   :  { %7021 = vmatprep.subr.bf16.mxu1 %v7659_v33  ;;  %v3561_v4 = vld [vmem:[#allocation22 + $0x570] sm:$0xff]  ;;  %v3558_v33 = vld [vmem:[#allocation22 + $0x558] sm:$0xff] }
 0x700   :  { %v7713_v8 = vcombine.high %v3557_v46, %v3561_v4  ;;  %v7712_v16 = vcombine.low %v3557_v46, %v3561_v4  ;;  %v7714_v13 = vcombine.low %v3558_v33, %v3562_v5  ;;  %v3610_v46 = vld [vmem:[#allocation22 + $0x6f8] sm:$0xff] }
 0x701   :  { %6858 = vmatpush1.bf16.msra.mxu0 %v7656_v29  ;;  %v7715_v29 = vcombine.high %v3558_v33, %v3562_v5 }
 0x702   :  { %7022 = vmatpush1.bf16.msra.mxu1 %v7658_v9  ;;  %6859 = vmatprep.subr.bf16.mxu0 %v7665_v10  ;;  %v3565_v9 = vld [vmem:[#allocation22 + $0x590] sm:$0xff] }
 0x703   :  { %7023 = vmatprep.subr.bf16.mxu1 %v7667_v11  ;;  %v3569_v10 = vld [vmem:[#allocation22 + $0x5b0] sm:$0xff]  ;;  %v3566_v11 = vld [vmem:[#allocation22 + $0x598] sm:$0xff] }
 0x704   :  { %v7721_v18 = vcombine.high %v3565_v9, %v3569_v10  ;;  %v7720_v50 = vcombine.low %v3565_v9, %v3569_v10  ;;  %v3618_v9 = vld [vmem:[#allocation22 + $0x738] sm:$0xff] }
 0x705   :  { %6860 = vmatpush1.bf16.msra.mxu0 %v7664_v19  ;;  %v7723_v19 = vcombine.high %v3566_v11, %v3570_v62 }
 0x706   :  { %7024 = vmatpush1.bf16.msra.mxu1 %v7666_v20  ;;  %6870 = vmatprep.subr.bf16.mxu0 %v7673_v26  ;;  %v3573_v20 = vld [vmem:[#allocation22 + $0x5d0] sm:$0xff] }
 0x707   :  { %7034 = vmatprep.subr.bf16.mxu1 %v7675_v60  ;;  %v3577_v26 = vld [vmem:[#allocation22 + $0x5f0] sm:$0xff]  ;;  %v3574_v60 = vld [vmem:[#allocation22 + $0x5d8] sm:$0xff] }
 0x708   :  { %6862 = vmatmul.mubr.bf16.vlgmr.msra.gmra.mrb[20].mxu0 %v9199_v28  ;;  %v7729_v53 = vcombine.high %v3573_v20, %v3577_v26  ;;  %v7731_v49 = vcombine.high %v3574_v60, %v3578_v48 }
 0x709   :  { %7026 = vmatmul.mubr.bf16.vlgmr.msra.gmra.mrb[20].mxu1 %v9199_v28  ;;  %6871 = vmatpush1.bf16.msra.mxu0 %v7672_v51  ;;  %v7690_v28 = vcombine.low %v3534_v30, %v3538_v38  ;;  %v7722_v51 = vcombine.low %v3566_v11, %v3570_v62  ;;  %v7730_v30 = vcombine.low %v3574_v60, %v3578_v48 }
 0x70a   :  { %6902 = vmatprep.mubr.bf16.mxu0 %v9210_v36  ;;  %7035 = vmatpush1.bf16.msra.mxu1 %v7674_v59  ;;  %v3581_v59 = vld [vmem:[#allocation22 + $0x610] sm:$0xff] }
 0x70b   :  { %7066 = vmatprep.mubr.bf16.mxu1 %v9210_v36  ;;  %6872 = vmatprep.subr.bf16.mxu0 %v7681_v55  ;;  %v7696_v36 = vcombine.low %v3541_v56, %v3545_v58  ;;  %v3585_v55 = vld [vmem:[#allocation22 + $0x630] sm:$0xff]  ;;  %v3594_v56 = vld [vmem:[#allocation22 + $0x678] sm:$0xff] }
 0x70c   :  { %7036 = vmatprep.subr.bf16.mxu1 %v7683_v25  ;;  %v7728_v25 = vcombine.low %v3573_v20, %v3577_v26  ;;  %v7737_v38 = vcombine.high %v3581_v59, %v3585_v55  ;;  %v7736_v58 = vcombine.low %v3581_v59, %v3585_v55  ;;  %v3626_v20 = vld [vmem:[#allocation22 + $0x778] sm:$0xff] }
 0x70d   :  { %6873 = vmatpush1.bf16.msra.mxu0 %v7680_v39  ;;  %v7739_v39 = vcombine.high %v3582_v37, %v3586_v21  ;;  %v3634_v59 = vld [vmem:[#allocation22 + $0x7b8] sm:$0xff] }
 0x70e   :  { %7037 = vmatpush1.bf16.msra.mxu1 %v7682_v43  ;;  %6874 = vmatprep.subr.bf16.mxu0 %v7689_v47  ;;  %v3589_v43 = vld [vmem:[#allocation22 + $0x650] sm:$0xff] }
 0x70f   :  { %7038 = vmatprep.subr.bf16.mxu1 %v7691_v15  ;;  %v3593_v47 = vld [vmem:[#allocation22 + $0x670] sm:$0xff]  ;;  %v3590_v15 = vld [vmem:[#allocation22 + $0x658] sm:$0xff] }
 0x710   :  { %v7745_v1 = vcombine.high %v3589_v43, %v3593_v47  ;;  %v7744_v0 = vcombine.low %v3589_v43, %v3593_v47  ;;  %v7746_v40 = vcombine.low %v3590_v15, %v3594_v56  ;;  %v3642_v43 = vld [vmem:[#allocation22 + $0x7f8] sm:$0xff] }
 0x711   :  { %6875 = vmatpush1.bf16.msra.mxu0 %v7688_v27  ;;  %v7747_v27 = vcombine.high %v3590_v15, %v3594_v56 }
 0x712   :  { %7039 = vmatpush1.bf16.msra.mxu1 %v7690_v28  ;;  %6876 = vmatprep.subr.bf16.mxu0 %v7697_v17  ;;  %v3597_v28 = vld [vmem:[#allocation22 + $0x690] sm:$0xff] }
 0x713   :  { %7040 = vmatprep.subr.bf16.mxu1 %v7699_v3  ;;  %v3601_v17 = vld [vmem:[#allocation22 + $0x6b0] sm:$0xff]  ;;  %v3598_v3 = vld [vmem:[#allocation22 + $0x698] sm:$0xff] }
 0x714   :  { %v7753_v41 = vcombine.high %v3597_v28, %v3601_v17  ;;  %v7752_v4 = vcombine.low %v3597_v28, %v3601_v17  ;;  %v7754_v33 = vcombine.low %v3598_v3, %v3602_v34  ;;  %v3650_v28 = vld [vmem:[#allocation22 + $0x838] sm:$0xff] }
 0x715   :  { %6877 = vmatpush1.bf16.msra.mxu0 %v7696_v36  ;;  %v7755_v36 = vcombine.high %v3598_v3, %v3602_v34 }
 0x716   :  { %7041 = vmatpush1.bf16.msra.mxu1 %v7698_v45  ;;  %6878 = vmatprep.subr.bf16.mxu0 %v7705_v42  ;;  %v3605_v45 = vld [vmem:[#allocation22 + $0x6d0] sm:$0xff] }
 0x717   :  { %7042 = vmatprep.subr.bf16.mxu1 %v7707_v44  ;;  %v3609_v42 = vld [vmem:[#allocation22 + $0x6f0] sm:$0xff]  ;;  %v3606_v44 = vld [vmem:[#allocation22 + $0x6d8] sm:$0xff] }
 0x718   :  { %v7761_v5 = vcombine.high %v3605_v45, %v3609_v42  ;;  %v7760_v10 = vcombine.low %v3605_v45, %v3609_v42  ;;  %v7762_v11 = vcombine.low %v3606_v44, %v3610_v46  ;;  %v3654_v45 = vld [vmem:[#allocation22 + $0x858] sm:$0xff] }
 0x719   :  { %6879 = vmatpush1.bf16.msra.mxu0 %v7704_v6  ;;  %v7763_v6 = vcombine.high %v3606_v44, %v3610_v46  ;;  %v3658_v42 = vld [vmem:[#allocation22 + $0x878] sm:$0xff] }
 0x71a   :  { %7043 = vmatpush1.bf16.msra.mxu1 %v7706_v7  ;;  %6880 = vmatprep.subr.bf16.mxu0 %v7713_v8  ;;  %v3613_v7 = vld [vmem:[#allocation22 + $0x710] sm:$0xff] }
 0x71b   :  { %7044 = vmatprep.subr.bf16.mxu1 %v7715_v29  ;;  %v3617_v8 = vld [vmem:[#allocation22 + $0x730] sm:$0xff]  ;;  %v3614_v29 = vld [vmem:[#allocation22 + $0x718] sm:$0xff] }
 0x71c   :  { %v7769_v62 = vcombine.high %v3613_v7, %v3617_v8  ;;  %v7768_v26 = vcombine.low %v3613_v7, %v3617_v8  ;;  %v7770_v60 = vcombine.low %v3614_v29, %v3618_v9  ;;  %v3666_v7 = vld [vmem:[#allocation22 + $0x8b8] sm:$0xff] }
 0x71d   :  { %6881 = vmatpush1.bf16.msra.mxu0 %v7712_v16  ;;  %v7771_v16 = vcombine.high %v3614_v29, %v3618_v9  ;;  %v7810_v29 = vcombine.low %v3654_v45, %v3658_v42 }
 0x71e   :  { %7045 = vmatpush1.bf16.msra.mxu1 %v7714_v13  ;;  %6882 = vmatprep.subr.bf16.mxu0 %v7721_v18  ;;  %v3621_v13 = vld [vmem:[#allocation22 + $0x750] sm:$0xff] }
 0x71f   :  { %7046 = vmatprep.subr.bf16.mxu1 %v7723_v19  ;;  %v3625_v18 = vld [vmem:[#allocation22 + $0x770] sm:$0xff]  ;;  %v3622_v19 = vld [vmem:[#allocation22 + $0x758] sm:$0xff] }
 0x720   :  { %v7777_v48 = vcombine.high %v3621_v13, %v3625_v18  ;;  %v7776_v55 = vcombine.low %v3621_v13, %v3625_v18  ;;  %v7778_v37 = vcombine.low %v3622_v19, %v3626_v20  ;;  %v3674_v13 = vld [vmem:[#allocation22 + $0x8f8] sm:$0xff] }
 0x721   :  { %6883 = vmatpush1.bf16.msra.mxu0 %v7720_v50  ;;  %v7779_v50 = vcombine.high %v3622_v19, %v3626_v20 }
 0x722   :  { %7047 = vmatpush1.bf16.msra.mxu1 %v7722_v51  ;;  %6884 = vmatprep.subr.bf16.mxu0 %v7729_v53  ;;  %v3629_v51 = vld [vmem:[#allocation22 + $0x790] sm:$0xff] }
 0x723   :  { %7048 = vmatprep.subr.bf16.mxu1 %v7731_v49  ;;  %v3633_v53 = vld [vmem:[#allocation22 + $0x7b0] sm:$0xff]  ;;  %v3630_v49 = vld [vmem:[#allocation22 + $0x798] sm:$0xff] }
 0x724   :  { %v7785_v21 = vcombine.high %v3629_v51, %v3633_v53  ;;  %v7784_v47 = vcombine.low %v3629_v51, %v3633_v53  ;;  %v7786_v15 = vcombine.low %v3630_v49, %v3634_v59 }
 0x725   :  { %6885 = vmatpush1.bf16.msra.mxu0 %v7728_v25  ;;  %v7787_v25 = vcombine.high %v3630_v49, %v3634_v59  ;;  %v3685_v59 = vld [vmem:[#allocation22 + $0x950] sm:$0xff] }
 0x726   :  { %7049 = vmatpush1.bf16.msra.mxu1 %v7730_v30  ;;  %6886 = vmatprep.subr.bf16.mxu0 %v7737_v38  ;;  %v3637_v30 = vld [vmem:[#allocation22 + $0x7d0] sm:$0xff] }
 0x727   :  { %7050 = vmatprep.subr.bf16.mxu1 %v7739_v39  ;;  %v3641_v38 = vld [vmem:[#allocation22 + $0x7f0] sm:$0xff]  ;;  %v3638_v39 = vld [vmem:[#allocation22 + $0x7d8] sm:$0xff] }
 0x728   :  { %v7793_v56 = vcombine.high %v3637_v30, %v3641_v38  ;;  %v7792_v17 = vcombine.low %v3637_v30, %v3641_v38  ;;  %v7794_v3 = vcombine.low %v3638_v39, %v3642_v43 }
 0x729   :  { %6887 = vmatpush1.bf16.msra.mxu0 %v7736_v58  ;;  %v7795_v58 = vcombine.high %v3638_v39, %v3642_v43  ;;  %v3693_v43 = vld [vmem:[#allocation22 + $0x990] sm:$0xff] }
 0x72a   :  { %7051 = vmatpush1.bf16.msra.mxu1 %v7738_v2  ;;  %6888 = vmatprep.subr.bf16.mxu0 %v7745_v1  ;;  %v3645_v2 = vld [vmem:[#allocation22 + $0x810] sm:$0xff] }
 0x72b   :  { %7052 = vmatprep.subr.bf16.mxu1 %v7747_v27  ;;  %v3649_v1 = vld [vmem:[#allocation22 + $0x830] sm:$0xff]  ;;  %v3646_v27 = vld [vmem:[#allocation22 + $0x818] sm:$0xff] }
 0x72c   :  { %v7801_v34 = vcombine.high %v3645_v2, %v3649_v1  ;;  %v7802_v44 = vcombine.low %v3646_v27, %v3650_v28 }
 0x72d   :  { %6889 = vmatpush1.bf16.msra.mxu0 %v7744_v0  ;;  %v7803_v0 = vcombine.high %v3646_v27, %v3650_v28  ;;  %v3701_v28 = vld [vmem:[#allocation22 + $0x9d0] sm:$0xff] }
 0x72e   :  { %7053 = vmatpush1.bf16.msra.mxu1 %v7746_v40  ;;  %6890 = vmatprep.subr.bf16.mxu0 %v7753_v41  ;;  %v3653_v40 = vld [vmem:[#allocation22 + $0x850] sm:$0xff] }
 0x72f   :  { %7054 = vmatprep.subr.bf16.mxu1 %v7755_v36  ;;  %v3657_v41 = vld [vmem:[#allocation22 + $0x870] sm:$0xff]  ;;  %v7800_v36 = vcombine.low %v3645_v2, %v3649_v1 }
 0x730   :  { %v7809_v46 = vcombine.high %v3653_v40, %v3657_v41  ;;  %v7808_v8 = vcombine.low %v3653_v40, %v3657_v41 }
 0x731   :  { %6891 = vmatpush1.bf16.msra.mxu0 %v7752_v4  ;;  %v3661_v4 = vld [vmem:[#allocation22 + $0x890] sm:$0xff] }
 0x732   :  { %7055 = vmatpush1.bf16.msra.mxu1 %v7754_v33  ;;  %6892 = vmatprep.subr.bf16.mxu0 %v7761_v5  ;;  %v3665_v33 = vld [vmem:[#allocation22 + $0x8b0] sm:$0xff]  ;;  %v7811_v5 = vcombine.high %v3654_v45, %v3658_v42 }
 0x733   :  { %7056 = vmatprep.subr.bf16.mxu1 %v7763_v6  ;;  %v3662_v6 = vld [vmem:[#allocation22 + $0x898] sm:$0xff]  ;;  %v7817_v9 = vcombine.high %v3661_v4, %v3665_v33  ;;  %v7816_v18 = vcombine.low %v3661_v4, %v3665_v33  ;;  %v3709_v45 = vld [vmem:[#allocation22 + $0xa10] sm:$0xff] }
 0x734   :  { %v3713_v42 = vld [vmem:[#allocation22 + $0xa30] sm:$0xff] }
 0x735   :  { %6893 = vmatpush1.bf16.msra.mxu0 %v7760_v10  ;;  %v7819_v10 = vcombine.high %v3662_v6, %v3666_v7 }
 0x736   :  { %7057 = vmatpush1.bf16.msra.mxu1 %v7762_v11  ;;  %6894 = vmatprep.subr.bf16.mxu0 %v7769_v62  ;;  %v3669_v11 = vld [vmem:[#allocation22 + $0x8d0] sm:$0xff] }
 0x737   :  { %7058 = vmatprep.subr.bf16.mxu1 %v7771_v16  ;;  %v3673_v62 = vld [vmem:[#allocation22 + $0x8f0] sm:$0xff]  ;;  %v3670_v16 = vld [vmem:[#allocation22 + $0x8d8] sm:$0xff] }
 0x738   :  { %v7825_v19 = vcombine.high %v3669_v11, %v3673_v62  ;;  %v7827_v20 = vcombine.high %v3670_v16, %v3674_v13  ;;  %v7826_v51 = vcombine.low %v3670_v16, %v3674_v13  ;;  %v3725_v13 = vld [vmem:[#allocation22 + $0xa90] sm:$0xff] }
 0x739   :  { %6895 = vmatpush1.bf16.msra.mxu0 %v7768_v26  ;;  %v3677_v26 = vld [vmem:[#allocation22 + $0x910] sm:$0xff] }
 0x73a   :  { %7059 = vmatpush1.bf16.msra.mxu1 %v7770_v60  ;;  %6896 = vmatprep.subr.bf16.mxu0 %v7777_v48  ;;  %v3681_v60 = vld [vmem:[#allocation22 + $0x930] sm:$0xff]  ;;  %v3678_v48 = vld [vmem:[#allocation22 + $0x918] sm:$0xff] }
 0x73b   :  { %7060 = vmatprep.subr.bf16.mxu1 %v7779_v50  ;;  %v3682_v50 = vld [vmem:[#allocation22 + $0x938] sm:$0xff]  ;;  %v7833_v53 = vcombine.high %v3677_v26, %v3681_v60 }
 0x73c   :  { %v7835_v49 = vcombine.high %v3678_v48, %v3682_v50  ;;  %v7834_v30 = vcombine.low %v3678_v48, %v3682_v50  ;;  %v3733_v50 = vld [vmem:[#allocation22 + $0xad0] sm:$0xff] }
 0x73d   :  { %6897 = vmatpush1.bf16.msra.mxu0 %v7776_v55  ;;  %v3689_v55 = vld [vmem:[#allocation22 + $0x970] sm:$0xff] }
 0x73e   :  { %7061 = vmatpush1.bf16.msra.mxu1 %v7778_v37  ;;  %6898 = vmatprep.subr.bf16.mxu0 %v7785_v21  ;;  %v3686_v37 = vld [vmem:[#allocation22 + $0x958] sm:$0xff]  ;;  %v7841_v38 = vcombine.high %v3685_v59, %v3689_v55 }
 0x73f   :  { %7062 = vmatprep.subr.bf16.mxu1 %v7787_v25  ;;  %v3690_v21 = vld [vmem:[#allocation22 + $0x978] sm:$0xff]  ;;  %v7832_v25 = vcombine.low %v3677_v26, %v3681_v60 }
 0x740   :  { %v7843_v39 = vcombine.high %v3686_v37, %v3690_v21  ;;  %v7842_v2 = vcombine.low %v3686_v37, %v3690_v21  ;;  %v3741_v21 = vld [vmem:[#allocation22 + $0xb10] sm:$0xff] }
 0x741   :  { %6899 = vmatpush1.bf16.msra.mxu0 %v7784_v47  ;;  %v3697_v47 = vld [vmem:[#allocation22 + $0x9b0] sm:$0xff] }
 0x742   :  { %7063 = vmatpush1.bf16.msra.mxu1 %v7786_v15  ;;  %6900 = vmatprep.subr.bf16.mxu0 %v7793_v56  ;;  %v3694_v15 = vld [vmem:[#allocation22 + $0x998] sm:$0xff]  ;;  %v7849_v1 = vcombine.high %v3693_v43, %v3697_v47 }
 0x743   :  { %7064 = vmatprep.subr.bf16.mxu1 %v7795_v58  ;;  %v3698_v56 = vld [vmem:[#allocation22 + $0x9b8] sm:$0xff]  ;;  %v7840_v58 = vcombine.low %v3685_v59, %v3689_v55 }
 0x744   :  { %v7851_v27 = vcombine.high %v3694_v15, %v3698_v56  ;;  %v7850_v40 = vcombine.low %v3694_v15, %v3698_v56  ;;  %v3749_v56 = vld [vmem:[#allocation22 + $0xb50] sm:$0xff] }
 0x745   :  { %6901 = vmatpush1.bf16.msra.mxu0 %v7792_v17  ;;  %v3705_v17 = vld [vmem:[#allocation22 + $0x9f0] sm:$0xff] }
 0x746   :  { %7065 = vmatpush1.bf16.msra.mxu1 %v7794_v3  ;;  %6911 = vmatprep.subr.bf16.mxu0 %v7801_v34  ;;  %v3702_v3 = vld [vmem:[#allocation22 + $0x9d8] sm:$0xff]  ;;  %v7857_v41 = vcombine.high %v3701_v28, %v3705_v17  ;;  %v7856_v4 = vcombine.low %v3701_v28, %v3705_v17 }
 0x747   :  { %7075 = vmatprep.subr.bf16.mxu1 %v7803_v0  ;;  %v3706_v34 = vld [vmem:[#allocation22 + $0x9f8] sm:$0xff]  ;;  %v7848_v0 = vcombine.low %v3693_v43, %v3697_v47 }
 0x748   :  { %6903 = vmatmul.mubr.bf16.vlgmr.msra.gmra.mrb[20].mxu0 %v9231_v63  ;;  %v7858_v33 = vcombine.low %v3702_v3, %v3706_v34 }
 0x749   :  { %7067 = vmatmul.mubr.bf16.vlgmr.msra.gmra.mrb[20].mxu1 %v9231_v63  ;;  %6912 = vmatpush1.bf16.msra.mxu0 %v7800_v36  ;;  %v7818_v63 = vcombine.low %v3662_v6, %v3666_v7  ;;  %v7859_v36 = vcombine.high %v3702_v3, %v3706_v34  ;;  %v3717_v7 = vld [vmem:[#allocation22 + $0xa50] sm:$0xff] }
 0x74a   :  { %6943 = vmatprep.mubr.bf16.mxu0 %v9233_v52  ;;  %7076 = vmatpush1.bf16.msra.mxu1 %v7802_v44  ;;  %v3710_v44 = vld [vmem:[#allocation22 + $0xa18] sm:$0xff]  ;;  %v3757_v34 = vld [vmem:[#allocation22 + $0xb90] sm:$0xff] }
 0x74b   :  { %7107 = vmatprep.mubr.bf16.mxu1 %v9233_v52  ;;  %6913 = vmatprep.subr.bf16.mxu0 %v7809_v46  ;;  %v7824_v52 = vcombine.low %v3669_v11, %v3673_v62  ;;  %v3714_v46 = vld [vmem:[#allocation22 + $0xa38] sm:$0xff] }
 0x74c   :  { %7077 = vmatprep.subr.bf16.mxu1 %v7811_v5  ;;  %v7865_v5 = vcombine.high %v3709_v45, %v3713_v42  ;;  %v7867_v6 = vcombine.high %v3710_v44, %v3714_v46  ;;  %v7866_v11 = vcombine.low %v3710_v44, %v3714_v46  ;;  %v3765_v46 = vld [vmem:[#allocation22 + $0xbd0] sm:$0xff] }
 0x74d   :  { %6914 = vmatpush1.bf16.msra.mxu0 %v7808_v8  ;;  %v3721_v8 = vld [vmem:[#allocation22 + $0xa70] sm:$0xff] }
 0x74e   :  { %7078 = vmatpush1.bf16.msra.mxu1 %v7810_v29  ;;  %6915 = vmatprep.subr.bf16.mxu0 %v7817_v9  ;;  %v3718_v29 = vld [vmem:[#allocation22 + $0xa58] sm:$0xff]  ;;  %v7873_v62 = vcombine.high %v3717_v7, %v3721_v8 }
 0x74f   :  { %7079 = vmatprep.subr.bf16.mxu1 %v7819_v10  ;;  %v3722_v9 = vld [vmem:[#allocation22 + $0xa78] sm:$0xff]  ;;  %v7864_v10 = vcombine.low %v3709_v45, %v3713_v42 }
 0x750   :  { %v7875_v16 = vcombine.high %v3718_v29, %v3722_v9  ;;  %v7874_v26 = vcombine.low %v3718_v29, %v3722_v9  ;;  %v3773_v9 = vld [vmem:[#allocation22 + $0xc10] sm:$0xff] }
 0x751   :  { %6916 = vmatpush1.bf16.msra.mxu0 %v7816_v18  ;;  %v3729_v18 = vld [vmem:[#allocation22 + $0xab0] sm:$0xff] }
 0x752   :  { %7080 = vmatpush1.bf16.msra.mxu1 %v7818_v63  ;;  %6917 = vmatprep.subr.bf16.mxu0 %v7825_v19  ;;  %v3726_v63 = vld [vmem:[#allocation22 + $0xa98] sm:$0xff]  ;;  %v7881_v60 = vcombine.high %v3725_v13, %v3729_v18 }
 0x753   :  { %7081 = vmatprep.subr.bf16.mxu1 %v7827_v20  ;;  %v3730_v19 = vld [vmem:[#allocation22 + $0xab8] sm:$0xff]  ;;  %v7872_v20 = vcombine.low %v3717_v7, %v3721_v8 }
 0x754   :  { %v7883_v48 = vcombine.high %v3726_v63, %v3730_v19  ;;  %v7882_v59 = vcombine.low %v3726_v63, %v3730_v19  ;;  %v3781_v19 = vld [vmem:[#allocation22 + $0xc50] sm:$0xff] }
 0x755   :  { %6918 = vmatpush1.bf16.msra.mxu0 %v7824_v52  ;;  %v3737_v52 = vld [vmem:[#allocation22 + $0xaf0] sm:$0xff] }
 0x756   :  { %7082 = vmatpush1.bf16.msra.mxu1 %v7826_v51  ;;  %6919 = vmatprep.subr.bf16.mxu0 %v7833_v53  ;;  %v3734_v51 = vld [vmem:[#allocation22 + $0xad8] sm:$0xff]  ;;  %v7889_v55 = vcombine.high %v3733_v50, %v3737_v52 }
 0x757   :  { %7083 = vmatprep.subr.bf16.mxu1 %v7835_v49  ;;  %v3738_v53 = vld [vmem:[#allocation22 + $0xaf8] sm:$0xff]  ;;  %v7880_v49 = vcombine.low %v3725_v13, %v3729_v18 }
 0x758   :  { %v7891_v37 = vcombine.high %v3734_v51, %v3738_v53  ;;  %v7890_v43 = vcombine.low %v3734_v51, %v3738_v53  ;;  %v3789_v51 = vld [vmem:[#allocation22 + $0xc90] sm:$0xff] }
 0x759   :  { %6920 = vmatpush1.bf16.msra.mxu0 %v7832_v25  ;;  %v3745_v25 = vld [vmem:[#allocation22 + $0xb30] sm:$0xff] }
 0x75a   :  { %7084 = vmatpush1.bf16.msra.mxu1 %v7834_v30  ;;  %6921 = vmatprep.subr.bf16.mxu0 %v7841_v38  ;;  %v3742_v30 = vld [vmem:[#allocation22 + $0xb18] sm:$0xff]  ;;  %v7897_v47 = vcombine.high %v3741_v21, %v3745_v25  ;;  %v3793_v53 = vld [vmem:[#allocation22 + $0xcb0] sm:$0xff] }
 0x75b   :  { %7085 = vmatprep.subr.bf16.mxu1 %v7843_v39  ;;  %v3746_v38 = vld [vmem:[#allocation22 + $0xb38] sm:$0xff]  ;;  %v7888_v39 = vcombine.low %v3733_v50, %v3737_v52 }
 0x75c   :  { %v7899_v15 = vcombine.high %v3742_v30, %v3746_v38  ;;  %v7898_v28 = vcombine.low %v3742_v30, %v3746_v38  ;;  %v3797_v38 = vld [vmem:[#allocation22 + $0xcd0] sm:$0xff] }
 0x75d   :  { %6922 = vmatpush1.bf16.msra.mxu0 %v7840_v58  ;;  %v3753_v58 = vld [vmem:[#allocation22 + $0xb70] sm:$0xff] }
 0x75e   :  { %7086 = vmatpush1.bf16.msra.mxu1 %v7842_v2  ;;  %6923 = vmatprep.subr.bf16.mxu0 %v7849_v1  ;;  %v3750_v2 = vld [vmem:[#allocation22 + $0xb58] sm:$0xff]  ;;  %v7905_v17 = vcombine.high %v3749_v56, %v3753_v58 }
 0x75f   :  { %7087 = vmatprep.subr.bf16.mxu1 %v7851_v27  ;;  %v3754_v1 = vld [vmem:[#allocation22 + $0xb78] sm:$0xff]  ;;  %v7896_v27 = vcombine.low %v3741_v21, %v3745_v25  ;;  %v7945_v25 = vcombine.high %v3789_v51, %v3793_v53 }
 0x760   :  { %v7907_v3 = vcombine.high %v3750_v2, %v3754_v1  ;;  %v7906_v45 = vcombine.low %v3750_v2, %v3754_v1  ;;  %v3805_v2 = vld [vmem:[#allocation22 + $0xd10] sm:$0xff] }
 0x761   :  { %6924 = vmatpush1.bf16.msra.mxu0 %v7848_v0  ;;  %v3761_v0 = vld [vmem:[#allocation22 + $0xbb0] sm:$0xff] }
 0x762   :  { %7088 = vmatpush1.bf16.msra.mxu1 %v7850_v40  ;;  %6925 = vmatprep.subr.bf16.mxu0 %v7857_v41  ;;  %v3758_v40 = vld [vmem:[#allocation22 + $0xb98] sm:$0xff]  ;;  %v7913_v42 = vcombine.high %v3757_v34, %v3761_v0  ;;  %v3809_v1 = vld [vmem:[#allocation22 + $0xd30] sm:$0xff] }
 0x763   :  { %7089 = vmatprep.subr.bf16.mxu1 %v7859_v36  ;;  %v3762_v41 = vld [vmem:[#allocation22 + $0xbb8] sm:$0xff]  ;;  %v7904_v36 = vcombine.low %v3749_v56, %v3753_v58 }
 0x764   :  { %v7915_v44 = vcombine.high %v3758_v40, %v3762_v41  ;;  %v7914_v7 = vcombine.low %v3758_v40, %v3762_v41  ;;  %v3817_v40 = vld [vmem:[#allocation22 + $0xd70] sm:$0xff]  ;;  %v3814_v41 = vld [vmem:[#allocation22 + $0xd58] sm:$0xff] }
 0x765   :  { %6926 = vmatpush1.bf16.msra.mxu0 %v7856_v4  ;;  %v3769_v4 = vld [vmem:[#allocation22 + $0xbf0] sm:$0xff] }
 0x766   :  { %7090 = vmatpush1.bf16.msra.mxu1 %v7858_v33  ;;  %6927 = vmatprep.subr.bf16.mxu0 %v7865_v5  ;;  %v3766_v33 = vld [vmem:[#allocation22 + $0xbd8] sm:$0xff]  ;;  %v7921_v8 = vcombine.high %v3765_v46, %v3769_v4 }
 0x767   :  { %7091 = vmatprep.subr.bf16.mxu1 %v7867_v6  ;;  %v3770_v5 = vld [vmem:[#allocation22 + $0xbf8] sm:$0xff]  ;;  %v7912_v6 = vcombine.low %v3757_v34, %v3761_v0  ;;  %v3813_v0 = vld [vmem:[#allocation22 + $0xd50] sm:$0xff] }
 0x768   :  { %v7923_v29 = vcombine.high %v3766_v33, %v3770_v5  ;;  %v7922_v13 = vcombine.low %v3766_v33, %v3770_v5  ;;  %v3821_v33 = vld [vmem:[#allocation22 + $0xd90] sm:$0xff] }
 0x769   :  { %6928 = vmatpush1.bf16.msra.mxu0 %v7864_v10  ;;  %v3777_v10 = vld [vmem:[#allocation22 + $0xc30] sm:$0xff] }
 0x76a   :  { %7092 = vmatpush1.bf16.msra.mxu1 %v7866_v11  ;;  %6929 = vmatprep.subr.bf16.mxu0 %v7873_v62  ;;  %v3774_v11 = vld [vmem:[#allocation22 + $0xc18] sm:$0xff]  ;;  %v7929_v18 = vcombine.high %v3773_v9, %v3777_v10  ;;  %v3825_v5 = vld [vmem:[#allocation22 + $0xdb0] sm:$0xff] }
 0x76b   :  { %7093 = vmatprep.subr.bf16.mxu1 %v7875_v16  ;;  %v3778_v62 = vld [vmem:[#allocation22 + $0xc38] sm:$0xff]  ;;  %v7920_v16 = vcombine.low %v3765_v46, %v3769_v4  ;;  %v7969_v46 = vcombine.high %v3813_v0, %v3817_v40 }
 0x76c   :  { %v7931_v63 = vcombine.high %v3774_v11, %v3778_v62  ;;  %v7930_v50 = vcombine.low %v3774_v11, %v3778_v62 }
 0x76d   :  { %6930 = vmatpush1.bf16.msra.mxu0 %v7872_v20  ;;  %v3785_v20 = vld [vmem:[#allocation22 + $0xc70] sm:$0xff] }
 0x76e   :  { %7094 = vmatpush1.bf16.msra.mxu1 %v7874_v26  ;;  %6931 = vmatprep.subr.bf16.mxu0 %v7881_v60  ;;  %v7928_v26 = vcombine.low %v3773_v9, %v3777_v10  ;;  %v3782_v60 = vld [vmem:[#allocation22 + $0xc58] sm:$0xff]  ;;  %v7937_v52 = vcombine.high %v3781_v19, %v3785_v20  ;;  %v7968_v10 = vcombine.low %v3813_v0, %v3817_v40 }
 0x76f   :  { %7095 = vmatprep.subr.bf16.mxu1 %v7883_v48  ;;  %v3786_v48 = vld [vmem:[#allocation22 + $0xc78] sm:$0xff] }
 0x770   :  { %v7938_v21 = vcombine.low %v3782_v60, %v3786_v48  ;;  %v3854_v40 = vld [vmem:[#allocation22 + $0xe98] sm:$0xff] }
 0x771   :  { %6932 = vmatpush1.bf16.msra.mxu0 %v7880_v49  ;;  %v7939_v49 = vcombine.high %v3782_v60, %v3786_v48  ;;  %v3834_v60 = vld [vmem:[#allocation22 + $0xdf8] sm:$0xff] }
 0x772   :  { %7096 = vmatpush1.bf16.msra.mxu1 %v7882_v59  ;;  %6933 = vmatprep.subr.bf16.mxu0 %v7889_v55  ;;  %v3790_v59 = vld [vmem:[#allocation22 + $0xc98] sm:$0xff] }
 0x773   :  { %7097 = vmatprep.subr.bf16.mxu1 %v7891_v37  ;;  %v3794_v55 = vld [vmem:[#allocation22 + $0xcb8] sm:$0xff]  ;;  %v7936_v37 = vcombine.low %v3781_v19, %v3785_v20 }
 0x774   :  { %v7947_v30 = vcombine.high %v3790_v59, %v3794_v55 }
 0x775   :  { %6934 = vmatpush1.bf16.msra.mxu0 %v7888_v39  ;;  %v3801_v39 = vld [vmem:[#allocation22 + $0xcf0] sm:$0xff] }
 0x776   :  { %7098 = vmatpush1.bf16.msra.mxu1 %v7890_v43  ;;  %6935 = vmatprep.subr.bf16.mxu0 %v7897_v47  ;;  %v3798_v43 = vld [vmem:[#allocation22 + $0xcd8] sm:$0xff]  ;;  %v7953_v56 = vcombine.high %v3797_v38, %v3801_v39 }
 0x777   :  { %7099 = vmatprep.subr.bf16.mxu1 %v7899_v15  ;;  %v3802_v47 = vld [vmem:[#allocation22 + $0xcf8] sm:$0xff]  ;;  %v7944_v15 = vcombine.low %v3789_v51, %v3793_v53  ;;  %v7976_v51 = vcombine.low %v3821_v33, %v3825_v5 }
 0x778   :  { %v7955_v58 = vcombine.high %v3798_v43, %v3802_v47 }
 0x779   :  { %6936 = vmatpush1.bf16.msra.mxu0 %v7896_v27  ;;  %v3806_v27 = vld [vmem:[#allocation22 + $0xd18] sm:$0xff] }
 0x77a   :  { %7100 = vmatpush1.bf16.msra.mxu1 %v7898_v28  ;;  %6937 = vmatprep.subr.bf16.mxu0 %v7905_v17  ;;  %v3810_v28 = vld [vmem:[#allocation22 + $0xd38] sm:$0xff]  ;;  %v7954_v17 = vcombine.low %v3798_v43, %v3802_v47 }
 0x77b   :  { %7101 = vmatprep.subr.bf16.mxu1 %v7907_v3  ;;  %v7961_v3 = vcombine.high %v3805_v2, %v3809_v1  ;;  %v7963_v34 = vcombine.high %v3806_v27, %v3810_v28 }
 0x77d   :  { %6938 = vmatpush1.bf16.msra.mxu0 %v7904_v36  ;;  %v3818_v36 = vld [vmem:[#allocation22 + $0xd78] sm:$0xff] }
 0x77e   :  { %7102 = vmatpush1.bf16.msra.mxu1 %v7906_v45  ;;  %6939 = vmatprep.subr.bf16.mxu0 %v7913_v42  ;;  %v7960_v45 = vcombine.low %v3805_v2, %v3809_v1  ;;  %v9271_v42 = vld [vmem:[#allocation23] sm:$0xff]  ;;  %v7971_v4 = vcombine.high %v3814_v41, %v3818_v36  ;;  %v7970_v62 = vcombine.low %v3814_v41, %v3818_v36  ;;  %v3846_v2 = vld [vmem:[#allocation22 + $0xe58] sm:$0xff] }
 0x77f   :  { %7103 = vmatprep.subr.bf16.mxu1 %v7915_v44  ;;  %v7962_v44 = vcombine.low %v3806_v27, %v3810_v28  ;;  %v3908_v9 = vrot.slane %v9271_v42, %v8987_v24  ;;  %v3916_v11 = vrot.slane %v9271_v42, %v9029_v31  ;;  %v3850_v1 = vld [vmem:[#allocation22 + $0xe78] sm:$0xff] }
 0x780   :  { %v3858_v41 = vld [vmem:[#allocation22 + $0xeb8] sm:$0xff] }
 0x781   :  { %6940 = vmatpush1.bf16.msra.mxu0 %v7912_v6  ;;  %v3904_v6 = vrot.slane %v9271_v42, %v8984_v23 }
 0x782   :  { %7104 = vmatpush1.bf16.msra.mxu1 %v7914_v7  ;;  %6941 = vmatprep.subr.bf16.mxu0 %v7921_v8  ;;  %v3822_v7 = vld [vmem:[#allocation22 + $0xd98] sm:$0xff] }
 0x783   :  { %7105 = vmatprep.subr.bf16.mxu1 %v7923_v29  ;;  %v3826_v8 = vld [vmem:[#allocation22 + $0xdb8] sm:$0xff]  ;;  %v3912_v29 = vrot.slane %v9271_v42, %v9032_v32 }
 0x784   :  { %v7979_v23 = vcombine.high %v3822_v7, %v3826_v8  ;;  %v3830_v32 = vld [vmem:[#allocation22 + $0xdd8] sm:$0xff] }
 0x785   :  { %6942 = vmatpush1.bf16.msra.mxu0 %v7920_v16  ;;  %v7977_v16 = vcombine.high %v3821_v33, %v3825_v5  ;;  %v7986_v47 = vcombine.low %v3830_v32, %v3834_v60  ;;  %v8011_v5 = vcombine.high %v3854_v40, %v3858_v41 }
 0x786   :  { %7106 = vmatpush1.bf16.msra.mxu1 %v7922_v13  ;;  %6952 = vmatprep.subr.bf16.mxu0 %v7929_v18  ;;  %v3829_v18 = vld [vmem:[#allocation22 + $0xdd0] sm:$0xff] }
 0x787   :  { %7116 = vmatprep.subr.bf16.mxu1 %v7931_v63  ;;  %v3833_v63 = vld [vmem:[#allocation22 + $0xdf0] sm:$0xff] }
 0x788   :  { %6944 = vmatmul.mubr.bf16.vlgmr.msra.gmra.mrb[20].mxu0 %v9243_v22  ;;  %v7984_v43 = vcombine.low %v3829_v18, %v3833_v63 }
 0x789   :  { %7108 = vmatmul.mubr.bf16.vlgmr.msra.gmra.mrb[20].mxu1 %v9243_v22  ;;  %6953 = vmatpush1.bf16.msra.mxu0 %v7928_v26  ;;  %v7946_v22 = vcombine.low %v3790_v59, %v3794_v55  ;;  %v7978_v59 = vcombine.low %v3822_v7, %v3826_v8  ;;  %v7985_v55 = vcombine.high %v3829_v18, %v3833_v63  ;;  %v3865_v7 = vld [vmem:[#allocation22 + $0xef0] sm:$0xff]  ;;  %v3862_v8 = vld [vmem:[#allocation22 + $0xed8] sm:$0xff] }
 0x78a   :  { %6984 = vmatprep.mubr.bf16.mxu0 %v9246_v12  ;;  %7117 = vmatpush1.bf16.msra.mxu1 %v7930_v50  ;;  %v3874_v18 = vld [vmem:[#allocation22 + $0xf38] sm:$0xff] }
 0x78b   :  { %7148 = vmatprep.mubr.bf16.mxu1 %v9246_v12  ;;  %6954 = vmatprep.subr.bf16.mxu0 %v7937_v52  ;;  %v7952_v12 = vcombine.low %v3797_v38, %v3801_v39  ;;  %v3838_v38 = vld [vmem:[#allocation22 + $0xe18] sm:$0xff] }
 0x78c   :  { %7118 = vmatprep.subr.bf16.mxu1 %v7939_v49  ;;  %v3842_v39 = vld [vmem:[#allocation22 + $0xe38] sm:$0xff] }
 0x78d   :  { %6955 = vmatpush1.bf16.msra.mxu0 %v7936_v37  ;;  %v7994_v28 = vcombine.low %v3838_v38, %v3842_v39 }
 0x78e   :  { %7119 = vmatpush1.bf16.msra.mxu1 %v7938_v21  ;;  %6956 = vmatprep.subr.bf16.mxu0 %v7945_v25  ;;  %v7987_v21 = vcombine.high %v3830_v32, %v3834_v60  ;;  %v3837_v25 = vld [vmem:[#allocation22 + $0xe10] sm:$0xff] }
 0x78f   :  { %7120 = vmatprep.subr.bf16.mxu1 %v7947_v30  ;;  %v3841_v30 = vld [vmem:[#allocation22 + $0xe30] sm:$0xff] }
 0x790   :  { %v7992_v27 = vcombine.low %v3837_v25, %v3841_v30  ;;  %v3877_v32 = vld [vmem:[#allocation22 + $0xf50] sm:$0xff] }
 0x791   :  { %6957 = vmatpush1.bf16.msra.mxu0 %v7944_v15  ;;  %v7993_v15 = vcombine.high %v3837_v25, %v3841_v30  ;;  %v3881_v60 = vld [vmem:[#allocation22 + $0xf70] sm:$0xff] }
 0x792   :  { %7121 = vmatpush1.bf16.msra.mxu1 %v7946_v22  ;;  %6958 = vmatprep.subr.bf16.mxu0 %v7953_v56  ;;  %v7995_v22 = vcombine.high %v3838_v38, %v3842_v39  ;;  %v3845_v56 = vld [vmem:[#allocation22 + $0xe50] sm:$0xff] }
 0x793   :  { %7122 = vmatprep.subr.bf16.mxu1 %v7955_v58  ;;  %v3849_v58 = vld [vmem:[#allocation22 + $0xe70] sm:$0xff] }
 0x794   :  { %v3893_v38 = vld [vmem:[#allocation22 + $0xfd0] sm:$0xff] }
 0x795   :  { %6959 = vmatpush1.bf16.msra.mxu0 %v7952_v12  ;;  %v8001_v12 = vcombine.high %v3845_v56, %v3849_v58  ;;  %v3897_v39 = vld [vmem:[#allocation22 + $0xff0] sm:$0xff] }
 0x796   :  { %7123 = vmatpush1.bf16.msra.mxu1 %v7954_v17  ;;  %6960 = vmatprep.subr.bf16.mxu0 %v7961_v3  ;;  %v8003_v17 = vcombine.high %v3846_v2, %v3850_v1  ;;  %v3853_v3 = vld [vmem:[#allocation22 + $0xe90] sm:$0xff] }
 0x797   :  { %7124 = vmatprep.subr.bf16.mxu1 %v7963_v34  ;;  %v3857_v34 = vld [vmem:[#allocation22 + $0xeb0] sm:$0xff] }
 0x799   :  { %6961 = vmatpush1.bf16.msra.mxu0 %v7960_v45  ;;  %v8000_v45 = vcombine.low %v3845_v56, %v3849_v58  ;;  %v8049_v56 = vcombine.high %v3893_v38, %v3897_v39 }
 0x79a   :  { %7125 = vmatpush1.bf16.msra.mxu1 %v7962_v44  ;;  %6962 = vmatprep.subr.bf16.mxu0 %v7969_v46  ;;  %v8002_v46 = vcombine.low %v3846_v2, %v3850_v1  ;;  %v8048_v2 = vcombine.low %v3893_v38, %v3897_v39 }
 0x79b   :  { %v6658_v13 = vpop.f32.mrb[16].mxu0  ;;  %7126 = vmatprep.subr.bf16.mxu1 %v7971_v4  ;;  %v8009_v4 = vcombine.high %v3853_v3, %v3857_v34 }
 0x79c   :  { %v8081_v19 = vadd.f32 %v6658_v13, %v3904_v6  ;;  %v6822_v20 = vpop.f32.mrb[16].mxu1  ;;  %v6660_v26 = vpop.f32.mrb[17].mxu0  ;;  %v3861_v6 = vld [vmem:[#allocation22 + $0xed0] sm:$0xff] }
 0x79d   :  { %v8083_v48 = vadd.f32 %v6822_v20, %v3912_v29  ;;  %v8082_v24 = vadd.f32 %v6660_v26, %v3908_v9  ;;  %v6824_v50 = vpop.f32.mrb[17].mxu1  ;;  %v6662_v52 = vpop.f32.mrb[18].mxu0  ;;  %6963 = vmatpush1.bf16.msra.mxu0 %v7968_v10  ;;  %v3866_v29 = vld [vmem:[#allocation22 + $0xef8] sm:$0xff]  ;;  %v8008_v9 = vcombine.low %v3853_v3, %v3857_v34  ;;  %v8010_v10 = vcombine.low %v3854_v40, %v3858_v41  ;;  %v3873_v13 = vld [vmem:[#allocation22 + $0xf30] sm:$0xff] }
 0x79e   :  { %8336 = vtanh.f32 %v8081_v19  ;;  %v8084_v31 = vadd.f32 %v6824_v50, %v3916_v11  ;;  %v6826_v53 = vpop.f32.mrb[18].mxu1  ;;  %7127 = vmatpush1.bf16.msra.mxu1 %v7970_v62  ;;  %v6663_v49 = vpop.f32.mrb[19].mxu0  ;;  %6964 = vmatprep.subr.bf16.mxu0 %v7977_v16  ;;  %v8017_v11 = vcombine.high %v3861_v6, %v3865_v7  ;;  %v8019_v62 = vcombine.high %v3862_v8, %v3866_v29  ;;  %v3869_v16 = vld [vmem:[#allocation22 + $0xf10] sm:$0xff] }
 0x79f   :  { %8338 = vtanh.f32 %v8083_v48  ;;  %v6827_v37 = vpop.f32.mrb[19].mxu1  ;;  %7128 = vmatprep.subr.bf16.mxu1 %v7979_v23  ;;  %v3870_v23 = vld [vmem:[#allocation22 + $0xf18] sm:$0xff]  ;;  %v8016_v63 = vcombine.low %v3861_v6, %v3865_v7  ;;  %v8018_v19 = vcombine.low %v3862_v8, %v3866_v29  ;;  %v8025_v20 = vcombine.high %v3869_v16, %v3873_v13  ;;  %v3885_v53 = vld [vmem:[#allocation22 + $0xf90] sm:$0xff] }
 0x7a0   :  { %8340 = vtanh.f32 %v8082_v24  ;;  %v8027_v26 = vcombine.high %v3870_v23, %v3874_v18  ;;  %v3878_v48 = vld [vmem:[#allocation22 + $0xf58] sm:$0xff]  ;;  %v8024_v50 = vcombine.low %v3869_v16, %v3873_v13  ;;  %v8026_v52 = vcombine.low %v3870_v23, %v3874_v18  ;;  %v3889_v49 = vld [vmem:[#allocation22 + $0xfb0] sm:$0xff] }
 0x7a1   :  { %8342 = vtanh.f32 %v8084_v31  ;;  %6965 = vmatpush1.bf16.msra.mxu0 %v7976_v51  ;;  %v3882_v24 = vld [vmem:[#allocation22 + $0xf78] sm:$0xff]  ;;  %v8033_v51 = vcombine.high %v3877_v32, %v3881_v60  ;;  %v8032_v37 = vcombine.low %v3877_v32, %v3881_v60  ;;  %v8041_v25 = vcombine.high %v3885_v53, %v3889_v49 }
 0x7a2   :  { %7129 = vmatpush1.bf16.msra.mxu1 %v7978_v59  ;;  %6966 = vmatprep.subr.bf16.mxu0 %v7985_v55  ;;  %v8035_v31 = vcombine.high %v3878_v48, %v3882_v24  ;;  %v3886_v59 = vld [vmem:[#allocation22 + $0xf98] sm:$0xff] }
 0x7a3   :  { %7130 = vmatprep.subr.bf16.mxu1 %v7987_v21  ;;  %v3890_v55 = vld [vmem:[#allocation22 + $0xfb8] sm:$0xff]  ;;  %v8034_v21 = vcombine.low %v3878_v48, %v3882_v24 }
 0x7a4   :  { %v8043_v30 = vcombine.high %v3886_v59, %v3890_v55 }
 0x7a5   :  { %6967 = vmatpush1.bf16.msra.mxu0 %v7984_v43  ;;  %v3894_v43 = vld [vmem:[#allocation22 + $0xfd8] sm:$0xff] }
 0x7a6   :  { %7131 = vmatpush1.bf16.msra.mxu1 %v7986_v47  ;;  %6968 = vmatprep.subr.bf16.mxu0 %v7993_v15  ;;  %v3898_v47 = vld [vmem:[#allocation22 + $0xff8] sm:$0xff]  ;;  %v8040_v15 = vcombine.low %v3885_v53, %v3889_v49 }
 0x7a7   :  { %7132 = vmatprep.subr.bf16.mxu1 %v7995_v22  ;;  %v8042_v22 = vcombine.low %v3886_v59, %v3890_v55  ;;  %v8051_v58 = vcombine.high %v3894_v43, %v3898_v47  ;;  %v8050_v1 = vcombine.low %v3894_v43, %v3898_v47 }
 0x7a8   :  { %v8337_v0 = vpop.eup %8336 }
 0x7a9   :  { %v8339_v36 = vpop.eup %8338  ;;  %7165 = vst [vmem:[#allocation25] sm:$0xff] %v8337_v0  ;;  %6969 = vmatpush1.bf16.msra.mxu0 %v7992_v27  ;;  %v3920_v27 = vrot.slane %v9271_v42, %v9184_v14 }
 0x7aa   :  { %v8341_v44 = vpop.eup %8340  ;;  %7167 = vst [vmem:[#allocation25 + $0x10] sm:$0xff] %v8339_v36  ;;  %7133 = vmatpush1.bf16.msra.mxu1 %v7994_v28  ;;  %6970 = vmatprep.subr.bf16.mxu0 %v8001_v12  ;;  %v3928_v28 = vrot.slane %v9271_v42, %v9195_v54  ;;  %v3924_v12 = vrot.slane %v9271_v42, %v9149_v57 }
 0x7ab   :  { %v8343_v33 = vpop.eup %8342  ;;  %7166 = vst [vmem:[#allocation25 + $0x8] sm:$0xff] %v8341_v44  ;;  %7134 = vmatprep.subr.bf16.mxu1 %v8003_v17  ;;  %v3932_v17 = vrot.slane %v9271_v42, %v9146_v35 }
 0x7ac   :  { %7168 = vst [vmem:[#allocation25 + $0x18] sm:$0xff] %v8343_v33 }
 0x7ad   :  { %6971 = vmatpush1.bf16.msra.mxu0 %v8000_v45 }
 0x7ae   :  { %7135 = vmatpush1.bf16.msra.mxu1 %v8002_v46  ;;  %6972 = vmatprep.subr.bf16.mxu0 %v8009_v4 }
 0x7af   :  { %7136 = vmatprep.subr.bf16.mxu1 %v8011_v5 }
 0x7b1   :  { %6973 = vmatpush1.bf16.msra.mxu0 %v8008_v9 }
 0x7b2   :  { %7137 = vmatpush1.bf16.msra.mxu1 %v8010_v10  ;;  %6974 = vmatprep.subr.bf16.mxu0 %v8017_v11 }
 0x7b3   :  { %7138 = vmatprep.subr.bf16.mxu1 %v8019_v62 }
 0x7b5   :  { %6975 = vmatpush1.bf16.msra.mxu0 %v8016_v63 }
 0x7b6   :  { %7139 = vmatpush1.bf16.msra.mxu1 %v8018_v19  ;;  %6976 = vmatprep.subr.bf16.mxu0 %v8025_v20 }
 0x7b7   :  { %7140 = vmatprep.subr.bf16.mxu1 %v8027_v26 }
 0x7b9   :  { %6977 = vmatpush1.bf16.msra.mxu0 %v8024_v50 }
 0x7ba   :  { %7141 = vmatpush1.bf16.msra.mxu1 %v8026_v52  ;;  %6978 = vmatprep.subr.bf16.mxu0 %v8033_v51 }
 0x7bb   :  { %7142 = vmatprep.subr.bf16.mxu1 %v8035_v31 }
 0x7bd   :  { %6979 = vmatpush1.bf16.msra.mxu0 %v8032_v37 }
 0x7be   :  { %7143 = vmatpush1.bf16.msra.mxu1 %v8034_v21  ;;  %6980 = vmatprep.subr.bf16.mxu0 %v8041_v25 }
 0x7bf   :  { %7144 = vmatprep.subr.bf16.mxu1 %v8043_v30 }
 0x7c1   :  { %6981 = vmatpush1.bf16.msra.mxu0 %v8040_v15 }
 0x7c2   :  { %7145 = vmatpush1.bf16.msra.mxu1 %v8042_v22  ;;  %6982 = vmatprep.subr.bf16.mxu0 %v8049_v56 }
 0x7c3   :  { %7146 = vmatprep.subr.bf16.mxu1 %v8051_v58 }
 0x7c5   :  { %6983 = vmatpush1.bf16.msra.mxu0 %v8048_v2 }
 0x7c6   :  { %7147 = vmatpush1.bf16.msra.mxu1 %v8050_v1 }
 0x7c8   :  { %6985 = vmatmul.mubr.bf16.vlgmr.msra.gmra.mrb[20].mxu0 %v9253_v61 }
 0x7c9   :  { %7149 = vmatmul.mubr.bf16.vlgmr.msra.gmra.mrb[20].mxu1 %v9253_v61 }
 0x89b   :  { %v6986_v3 = vpop.f32.mrb[20].mxu0 }
 0x89c   :  { %v8085_v34 = vadd.f32 %v6986_v3, %v3920_v27  ;;  %v7150_v0 = vpop.f32.mrb[20].mxu1  ;;  %v6988_v40 = vpop.f32.mrb[21].mxu0 }
 0x89d   :  { %v8087_v41 = vadd.f32 %v7150_v0, %v3928_v28  ;;  %v8086_v36 = vadd.f32 %v6988_v40, %v3924_v12  ;;  %v7152_v45 = vpop.f32.mrb[21].mxu1  ;;  %v6990_v61 = vpop.f32.mrb[22].mxu0 }
 0x89e   :  { %8344 = vtanh.f32 %v8085_v34  ;;  %v8088_v44 = vadd.f32 %v7152_v45, %v3932_v17  ;;  %v7154_v14 = vpop.f32.mrb[22].mxu1  ;;  %v6991_v46 = vpop.f32.mrb[23].mxu0 }
 0x89f   :  { %8346 = vtanh.f32 %v8087_v41  ;;  %v7155_v54 = vpop.f32.mrb[23].mxu1 }
 0x8a0   :  { %8348 = vtanh.f32 %v8086_v36 }
 0x8a1   :  { %8350 = vtanh.f32 %v8088_v44 }
 0x8a8   :  { %v8345_v57 = vpop.eup %8344 }
 0x8a9   :  { %v8347_v35 = vpop.eup %8346  ;;  %7169 = vst [vmem:[#allocation25 + $0x20] sm:$0xff] %v8345_v57 }
 0x8aa   :  { %v8349_v42 = vpop.eup %8348  ;;  %7171 = vst [vmem:[#allocation25 + $0x30] sm:$0xff] %v8347_v35 }
 0x8ab   :  { %v8351_v4 = vpop.eup %8350  ;;  %7170 = vst [vmem:[#allocation25 + $0x28] sm:$0xff] %v8349_v42 }
 0x8ac   :  { %7172 = vst [vmem:[#allocation25 + $0x38] sm:$0xff] %v8351_v4 }
 0x8ad   :  { %8671 = shalt.err (!%p8668_p4)
}
 0x8ae   :  { %s8672_s22 = scalar_lea.hbm %s9317_s14, 1024 }
 0x8af   :  { %p8673_p5 = scmp.ne.s32.totalorder %s9317_s14, %s8672_s22  ;;  %p8676_p6 = scmp.lt.u32.totalorder %s8672_s22, %s9317_s14 }
 0x8b1   :  { %p8678_p7 = pnand %p8676_p6, %p8673_p5 }
 0x8b3   :  { %8681 = shalt.err (!%p8678_p7)
}
 0x8b4   :  { %7182 = dma.vmem_to_hbm [thread:$0]  %s7180_s27, 1024, %s9317_s14, [#allocation4]  }
 0x8b5   :  { %8698 = dma.done.wait [#allocation4], 1024  }
 0x8b6   :  { %8699 = vsyncadd [#allocation4], 4294966272 }
 0x8b7   :  { %7186 = vsyncpa [#allocation3], 1 }
 0x8b8   :  { %7187 = vsyncpa [#allocation6], 1 }
 0x8b9   :  { %7188 = vsyncpa [#allocation9], 1 }
 0x8ba   :  { %7189 = vsyncpa [#allocation12], 1 }
 0x8bb   :  { %7190 = vsyncpa [#allocation15], 1 }
 0x8bc   :  { %7191 = vsyncpa [#allocation18], 1 }
 0x8bd   :  { %7192 = vsyncpa [#allocation21], 1 }
 0x8be   :  { %7193 = vsyncpa [#allocation24], 1 }
 0x8bf   :  { %7194 = vsyncpa [#allocation4], 1 }

</bundles_post_ra>
